<compile_context>
chip_gen: v7x
topology: tpu7x:2x2x1
jax: 0.10.0
libtpu: 0.0.40
codegen_flags: <defaults>
</compile_context>

<pallas_src>
import math
import jax
import jax.numpy as jnp
from jax.experimental import pallas as pl
from jax.experimental.pallas import tpu as pltpu

# Small-but-MXU-friendly shapes consistent with the module (batch_first tokens).
B, S, D, HEADS = 4, 64, 32, 4
HD = D // HEADS                  # head dim = 8
B_TILE = 2                       # sequences per grid step -> 128 token rows/step
TOKENS = B_TILE * S              # 128
EPS = 1e-5                       # nn.LayerNorm default eps


def mhsa_kernel(x_ref, w_ref, b_ref, o_ref, ctx_ref):
    x = x_ref[...]                                   # (TOKENS, D) f32

    # unpack the two packed parameter slabs (static slices, done once per step)
    b_all = b_ref[...]                               # (2, 4D) f32
    bqkv = b_all[0:1, 0:3 * D]                       # (1, 3D)
    bo = b_all[0:1, 3 * D:4 * D]                     # (1, D)
    ln_w = b_all[1:2, 0:D]                           # (1, D)
    ln_b = b_all[1:2, D:2 * D]                       # (1, D)
    w_all = w_ref[...]                               # (D, 4D) bf16
    wqkv = w_all[:, 0:3 * D]                         # (D, 3D)
    wo = w_all[:, 3 * D:4 * D]                       # (D, D)

    # --- LayerNorm (biased variance, affine), statistics kept in f32 ---
    mu = jnp.mean(x, axis=-1, keepdims=True)
    var = jnp.mean(jnp.square(x - mu), axis=-1, keepdims=True)
    h = (x - mu) * jax.lax.rsqrt(var + EPS) * ln_w + ln_b

    # --- fused Q|K|V projection: one (TOKENS, D) @ (D, 3D) MXU pass, bf16 in / f32 acc ---
    qkv = jnp.dot(h.astype(jnp.bfloat16), wqkv,
                  preferred_element_type=jnp.float32) + bqkv      # (TOKENS, 3D) f32
    qkv = qkv.reshape(B_TILE, S, 3 * D)

    # --- scaled dot-product attention: batched over sequences, static loop over heads,
    #     per-head context written to VMEM scratch at static lane offsets (no concat) ---
    scale = 1.0 / math.sqrt(HD)
    for hh in range(HEADS):                          # static, HEADS = 4
        q_h = qkv[:, :, hh * HD:(hh + 1) * HD].astype(jnp.bfloat16)
        k_h = qkv[:, :, D + hh * HD:D + (hh + 1) * HD].astype(jnp.bfloat16)
        v_h = qkv[:, :, 2 * D + hh * HD:2 * D + (hh + 1) * HD].astype(jnp.bfloat16)
        sc = jnp.einsum('bqd,bkd->bqk', q_h, k_h,
                        preferred_element_type=jnp.float32) * scale
        sc = sc - jnp.max(sc, axis=-1, keepdims=True)
        p = jnp.exp(sc)
        p = p * pl.reciprocal(jnp.sum(p, axis=-1, keepdims=True), approx=True)
        ctx_h = jnp.einsum('bqk,bkd->bqd', p.astype(jnp.bfloat16), v_h,
                           preferred_element_type=jnp.float32)     # (B_TILE, S, HD) f32
        ctx_ref[:, hh * HD:(hh + 1) * HD] = (
            ctx_h.reshape(TOKENS, HD).astype(jnp.bfloat16))

    # --- output projection; one (TOKENS, D) store per step ---
    ctx = ctx_ref[...]                               # (TOKENS, D) bf16
    o_ref[...] = jnp.dot(ctx, wo, preferred_element_type=jnp.float32) + bo


def mhsa_block(x, params):
    b, s, d = x.shape
    assert b % B_TILE == 0 and s == S and d == D
    tokens = b * s
    out2d = pl.pallas_call(
        mhsa_kernel,
        out_shape=jax.ShapeDtypeStruct((tokens, d), jnp.float32),
        grid_spec=pltpu.PrefetchScalarGridSpec(
            num_scalar_prefetch=0,
            grid=(b // B_TILE,),
            in_specs=[
                pl.BlockSpec((B_TILE * s, d), lambda i: (i, 0)),   # token rows
                pl.BlockSpec((d, 4 * d), lambda i: (0, 0)),        # packed weights
                pl.BlockSpec((2, 4 * d), lambda i: (0, 0)),        # packed biases/LN
            ],
            out_specs=pl.BlockSpec((B_TILE * s, d), lambda i: (i, 0)),
            scratch_shapes=[pltpu.VMEM((B_TILE * s, d), jnp.bfloat16)],
        ),
        compiler_params=pltpu.CompilerParams(
            dimension_semantics=("parallel",)),      # 2 TCs on v7x; serial elsewhere
    )(x.reshape(tokens, d), params["w"], params["b"])
    return out2d.reshape(b, s, d)


def init_params(key):
    k1, k2, k3, k4 = jax.random.split(key, 4)
    wqkv = (0.02 * jax.random.normal(k1, (D, 3 * D))).astype(jnp.float32)
    wo = (0.02 * jax.random.normal(k2, (D, D))).astype(jnp.float32)
    bqkv = (0.02 * jax.random.normal(k3, (3 * D,))).astype(jnp.float32)
    bo = (0.02 * jax.random.normal(k4, (D,))).astype(jnp.float32)
    ln_w = jnp.ones((D,), jnp.float32)               # nn.LayerNorm default init
    ln_b = jnp.zeros((D,), jnp.float32)
    # packed, lane-dense parameter slabs
    w_packed = jnp.concatenate([wqkv, wo], axis=1).astype(jnp.bfloat16)   # (32,128)
    row0 = jnp.concatenate([bqkv, bo])                                    # (128,)
    row1 = jnp.concatenate([ln_w, ln_b, jnp.zeros((2 * D,), jnp.float32)])
    b_packed = jnp.stack([row0, row1]).astype(jnp.float32)                # (2,128)
    return {"w": w_packed, "b": b_packed}


def mhsa_reference(x, params):
    """Pure-JAX f32 reference of the PyTorch forward (same packed params)."""
    b, s, d = x.shape
    w = params["w"].astype(jnp.float32)
    wqkv, wo = w[:, :3 * d], w[:, 3 * d:]
    bias = params["b"]
    bqkv, bo = bias[0, :3 * d], bias[0, 3 * d:]
    ln_w, ln_b = bias[1, :d], bias[1, d:2 * d]
    xt = x.reshape(b * s, d)
    mu = xt.mean(-1, keepdims=True)
    var = ((xt - mu) ** 2).mean(-1, keepdims=True)
    h = (xt - mu) / jnp.sqrt(var + EPS) * ln_w + ln_b
    qkv = (h @ wqkv + bqkv).reshape(b, s, 3, HEADS, HD)
    q = qkv[:, :, 0].transpose(0, 2, 1, 3)           # (b, H, s, HD)
    k = qkv[:, :, 1].transpose(0, 2, 1, 3)
    v = qkv[:, :, 2].transpose(0, 2, 1, 3)
    sc = jnp.einsum('bhqd,bhkd->bhqk', q, k) / math.sqrt(HD)
    p = jax.nn.softmax(sc, axis=-1)
    ctx = jnp.einsum('bhqk,bhkd->bhqd', p, v).transpose(0, 2, 1, 3).reshape(b * s, d)
    return (ctx @ wo + bo).reshape(b, s, d)


if __name__ == "__main__":
    key = jax.random.PRNGKey(0)
    kx, kp = jax.random.split(key)
    x = jax.random.normal(kx, (B, S, D), dtype=jnp.float32)   # (batch, seq, embed)
    params = init_params(kp)

    out = mhsa_block(x, params)
    jax.block_until_ready(out)

    ref = mhsa_reference(x, params)
    assert out.shape == (B, S, D)
    assert bool(jnp.all(jnp.isfinite(out)))
    assert bool(jnp.allclose(out, ref, atol=2e-2, rtol=2e-2))
    print("KERNEL_OK")
</pallas_src>

<mosaic_0001>
module attributes {stable_mosaic.version = 11 : i64} {
  func.func @mhsa_kernel(%arg0: i32, %arg1: memref<128x32xf32, #tpu.memory_space<vmem>>, %arg2: memref<32x128xbf16, #tpu.memory_space<vmem>>, %arg3: memref<2x128xf32, #tpu.memory_space<vmem>>, %arg4: memref<128x32xf32, #tpu.memory_space<vmem>>, %arg5: memref<128x32xbf16, #tpu.memory_space<vmem>>) attributes {dimension_semantics = [#tpu.dimension_semantics<parallel>], iteration_bounds = array<i64: 2>, scalar_prefetch = 0 : i64, scratch_operands = 1 : i64, tpu.core_type = #tpu.core_type<tc>, window_params = [{transform_indices = @transform_0, window_bounds = array<i64: 128, 32>}, {pipeline_mode = #tpu.pipeline_mode<synchronous>, transform_indices = @transform_1, window_bounds = array<i64: 32, 128>}, {pipeline_mode = #tpu.pipeline_mode<synchronous>, transform_indices = @transform_2, window_bounds = array<i64: 2, 128>}, {transform_indices = @transform_3, window_bounds = array<i64: 128, 32>}]} {
    %c0 = arith.constant 0 : index
    %c0_0 = arith.constant 0 : index
    %0 = vector.load %arg1[%c0, %c0_0] : memref<128x32xf32, #tpu.memory_space<vmem>>, vector<128x32xf32>
    %c0_1 = arith.constant 0 : index
    %c0_2 = arith.constant 0 : index
    %1 = vector.load %arg3[%c0_1, %c0_2] : memref<2x128xf32, #tpu.memory_space<vmem>>, vector<2x128xf32>
    %2 = vector.extract_strided_slice %1 {offsets = [0, 0], sizes = [1, 96], strides = [1, 1]} : vector<2x128xf32> to vector<1x96xf32>
    %3 = vector.extract_strided_slice %1 {offsets = [0, 96], sizes = [1, 32], strides = [1, 1]} : vector<2x128xf32> to vector<1x32xf32>
    %4 = vector.extract_strided_slice %1 {offsets = [1, 0], sizes = [1, 32], strides = [1, 1]} : vector<2x128xf32> to vector<1x32xf32>
    %5 = vector.extract_strided_slice %1 {offsets = [1, 32], sizes = [1, 32], strides = [1, 1]} : vector<2x128xf32> to vector<1x32xf32>
    %c0_3 = arith.constant 0 : index
    %c0_4 = arith.constant 0 : index
    %6 = vector.load %arg2[%c0_3, %c0_4] : memref<32x128xbf16, #tpu.memory_space<vmem>>, vector<32x128xbf16>
    %7 = vector.extract_strided_slice %6 {offsets = [0, 0], sizes = [32, 96], strides = [1, 1]} : vector<32x128xbf16> to vector<32x96xbf16>
    %8 = vector.extract_strided_slice %6 {offsets = [0, 96], sizes = [32, 32], strides = [1, 1]} : vector<32x128xbf16> to vector<32x32xbf16>
    %cst = arith.constant dense<0.000000e+00> : vector<128xf32>
    %9 = vector.multi_reduction <add>, %0, %cst [1] : vector<128x32xf32> to vector<128xf32>
    %10 = vector.shape_cast %9 : vector<128xf32> to vector<128x1xf32>
    %cst_5 = arith.constant 3.200000e+01 : f32
    %11 = vector.broadcast %cst_5 : f32 to vector<128x1xf32>
    %12 = arith.divf %10, %11 : vector<128x1xf32>
    %13 = vector.broadcast %12 : vector<128x1xf32> to vector<128x32xf32>
    %14 = arith.subf %0, %13 : vector<128x32xf32>
    %15 = arith.mulf %14, %14 : vector<128x32xf32>
    %cst_6 = arith.constant dense<0.000000e+00> : vector<128xf32>
    %16 = vector.multi_reduction <add>, %15, %cst_6 [1] : vector<128x32xf32> to vector<128xf32>
    %17 = vector.shape_cast %16 : vector<128xf32> to vector<128x1xf32>
    %cst_7 = arith.constant 3.200000e+01 : f32
    %18 = vector.broadcast %cst_7 : f32 to vector<128x1xf32>
    %19 = arith.divf %17, %18 : vector<128x1xf32>
    %20 = vector.broadcast %12 : vector<128x1xf32> to vector<128x32xf32>
    %21 = arith.subf %0, %20 : vector<128x32xf32>
    %cst_8 = arith.constant 9.99999974E-6 : f32
    %22 = vector.broadcast %cst_8 : f32 to vector<128x1xf32>
    %23 = arith.addf %19, %22 : vector<128x1xf32>
    %24 = math.rsqrt %23 : vector<128x1xf32>
    %25 = vector.broadcast %24 : vector<128x1xf32> to vector<128x32xf32>
    %26 = arith.mulf %21, %25 : vector<128x32xf32>
    %27 = vector.broadcast %4 : vector<1x32xf32> to vector<128x32xf32>
    %28 = arith.mulf %26, %27 : vector<128x32xf32>
    %29 = vector.broadcast %5 : vector<1x32xf32> to vector<128x32xf32>
    %30 = arith.addf %28, %29 : vector<128x32xf32>
    %31 = arith.truncf %30 : vector<128x32xf32> to vector<128x32xbf16>
    %cst_9 = arith.constant dense<0.000000e+00> : vector<128x96xf32>
    %32 = tpu.matmul %31, %7, %cst_9 {dimension_numbers = #tpu.dot_dimension_numbers<[1], [0], [0], [1], [0, 0, 1, 1], [], []>} : vector<128x32xbf16>, vector<32x96xbf16>, vector<128x96xf32> -> vector<128x96xf32>
    %33 = vector.broadcast %2 : vector<1x96xf32> to vector<128x96xf32>
    %34 = arith.addf %32, %33 : vector<128x96xf32>
    %35 = vector.shape_cast %34 : vector<128x96xf32> to vector<2x64x96xf32>
    %36 = vector.extract_strided_slice %35 {offsets = [0, 0, 0], sizes = [2, 64, 8], strides = [1, 1, 1]} : vector<2x64x96xf32> to vector<2x64x8xf32>
    %37 = arith.truncf %36 : vector<2x64x8xf32> to vector<2x64x8xbf16>
    %38 = vector.extract_strided_slice %35 {offsets = [0, 0, 32], sizes = [2, 64, 8], strides = [1, 1, 1]} : vector<2x64x96xf32> to vector<2x64x8xf32>
    %39 = arith.truncf %38 : vector<2x64x8xf32> to vector<2x64x8xbf16>
    %40 = vector.extract_strided_slice %35 {offsets = [0, 0, 64], sizes = [2, 64, 8], strides = [1, 1, 1]} : vector<2x64x96xf32> to vector<2x64x8xf32>
    %41 = arith.truncf %40 : vector<2x64x8xf32> to vector<2x64x8xbf16>
    "tpu.trace_start"() <{level = 10 : i32, message = "bqd,bkd->bqk"}> : () -> ()
    %cst_10 = arith.constant dense<0.000000e+00> : vector<2x64x64xf32>
    %42 = tpu.matmul %37, %39, %cst_10 {dimension_numbers = #tpu.dot_dimension_numbers<[2], [2], [1], [1], [0, 0, 0, 1, 1, 1], [0], [0]>} : vector<2x64x8xbf16>, vector<2x64x8xbf16>, vector<2x64x64xf32> -> vector<2x64x64xf32>
    "tpu.trace_stop"() : () -> ()
    %cst_11 = arith.constant 0.353553385 : f32
    %43 = vector.broadcast %cst_11 : f32 to vector<2x64x64xf32>
    %44 = arith.mulf %42, %43 : vector<2x64x64xf32>
    %cst_12 = arith.constant dense<0xFF800000> : vector<2x64xf32>
    %45 = vector.multi_reduction <maximumf>, %44, %cst_12 [2] : vector<2x64x64xf32> to vector<2x64xf32>
    %46 = vector.shape_cast %45 : vector<2x64xf32> to vector<2x64x1xf32>
    %47 = vector.broadcast %46 : vector<2x64x1xf32> to vector<2x64x64xf32>
    %48 = arith.subf %44, %47 : vector<2x64x64xf32>
    %49 = math.exp %48 : vector<2x64x64xf32>
    %cst_13 = arith.constant dense<0.000000e+00> : vector<2x64xf32>
    %50 = vector.multi_reduction <add>, %49, %cst_13 [2] : vector<2x64x64xf32> to vector<2x64xf32>
    %51 = vector.shape_cast %50 : vector<2x64xf32> to vector<2x64x1xf32>
    %52 = tpu.reciprocal %51 {approx = true} : vector<2x64x1xf32> -> vector<2x64x1xf32>
    %53 = vector.broadcast %52 : vector<2x64x1xf32> to vector<2x64x64xf32>
    %54 = arith.mulf %49, %53 : vector<2x64x64xf32>
    %55 = arith.truncf %54 : vector<2x64x64xf32> to vector<2x64x64xbf16>
    "tpu.trace_start"() <{level = 10 : i32, message = "bqk,bkd->bqd"}> : () -> ()
    %cst_14 = arith.constant dense<0.000000e+00> : vector<2x64x8xf32>
    %56 = tpu.matmul %55, %41, %cst_14 {dimension_numbers = #tpu.dot_dimension_numbers<[2], [1], [1], [2], [0, 0, 0, 1, 1, 2], [0], [0]>} : vector<2x64x64xbf16>, vector<2x64x8xbf16>, vector<2x64x8xf32> -> vector<2x64x8xf32>
    "tpu.trace_stop"() : () -> ()
    %57 = vector.shape_cast %56 : vector<2x64x8xf32> to vector<128x8xf32>
    %58 = arith.truncf %57 : vector<128x8xf32> to vector<128x8xbf16>
    %c0_15 = arith.constant 0 : index
    %c0_16 = arith.constant 0 : index
    %59 = vector.load %arg5[%c0_15, %c0_16] : memref<128x32xbf16, #tpu.memory_space<vmem>>, vector<128x8xbf16>
    tpu.vector_store %arg5[%c0_15, %c0_16], %58 {strides = array<i32>} : memref<128x32xbf16, #tpu.memory_space<vmem>>, vector<128x8xbf16>,
    %60 = vector.extract_strided_slice %35 {offsets = [0, 0, 8], sizes = [2, 64, 8], strides = [1, 1, 1]} : vector<2x64x96xf32> to vector<2x64x8xf32>
    %61 = arith.truncf %60 : vector<2x64x8xf32> to vector<2x64x8xbf16>
    %62 = vector.extract_strided_slice %35 {offsets = [0, 0, 40], sizes = [2, 64, 8], strides = [1, 1, 1]} : vector<2x64x96xf32> to vector<2x64x8xf32>
    %63 = arith.truncf %62 : vector<2x64x8xf32> to vector<2x64x8xbf16>
    %64 = vector.extract_strided_slice %35 {offsets = [0, 0, 72], sizes = [2, 64, 8], strides = [1, 1, 1]} : vector<2x64x96xf32> to vector<2x64x8xf32>
    %65 = arith.truncf %64 : vector<2x64x8xf32> to vector<2x64x8xbf16>
    "tpu.trace_start"() <{level = 10 : i32, message = "bqd,bkd->bqk"}> : () -> ()
    %cst_17 = arith.constant dense<0.000000e+00> : vector<2x64x64xf32>
    %66 = tpu.matmul %61, %63, %cst_17 {dimension_numbers = #tpu.dot_dimension_numbers<[2], [2], [1], [1], [0, 0, 0, 1, 1, 1], [0], [0]>} : vector<2x64x8xbf16>, vector<2x64x8xbf16>, vector<2x64x64xf32> -> vector<2x64x64xf32>
    "tpu.trace_stop"() : () -> ()
    %cst_18 = arith.constant 0.353553385 : f32
    %67 = vector.broadcast %cst_18 : f32 to vector<2x64x64xf32>
    %68 = arith.mulf %66, %67 : vector<2x64x64xf32>
    %cst_19 = arith.constant dense<0xFF800000> : vector<2x64xf32>
    %69 = vector.multi_reduction <maximumf>, %68, %cst_19 [2] : vector<2x64x64xf32> to vector<2x64xf32>
    %70 = vector.shape_cast %69 : vector<2x64xf32> to vector<2x64x1xf32>
    %71 = vector.broadcast %70 : vector<2x64x1xf32> to vector<2x64x64xf32>
    %72 = arith.subf %68, %71 : vector<2x64x64xf32>
    %73 = math.exp %72 : vector<2x64x64xf32>
    %cst_20 = arith.constant dense<0.000000e+00> : vector<2x64xf32>
    %74 = vector.multi_reduction <add>, %73, %cst_20 [2] : vector<2x64x64xf32> to vector<2x64xf32>
    %75 = vector.shape_cast %74 : vector<2x64xf32> to vector<2x64x1xf32>
    %76 = tpu.reciprocal %75 {approx = true} : vector<2x64x1xf32> -> vector<2x64x1xf32>
    %77 = vector.broadcast %76 : vector<2x64x1xf32> to vector<2x64x64xf32>
    %78 = arith.mulf %73, %77 : vector<2x64x64xf32>
    %79 = arith.truncf %78 : vector<2x64x64xf32> to vector<2x64x64xbf16>
    "tpu.trace_start"() <{level = 10 : i32, message = "bqk,bkd->bqd"}> : () -> ()
    %cst_21 = arith.constant dense<0.000000e+00> : vector<2x64x8xf32>
    %80 = tpu.matmul %79, %65, %cst_21 {dimension_numbers = #tpu.dot_dimension_numbers<[2], [1], [1], [2], [0, 0, 0, 1, 1, 2], [0], [0]>} : vector<2x64x64xbf16>, vector<2x64x8xbf16>, vector<2x64x8xf32> -> vector<2x64x8xf32>
    "tpu.trace_stop"() : () -> ()
    %81 = vector.shape_cast %80 : vector<2x64x8xf32> to vector<128x8xf32>
    %82 = arith.truncf %81 : vector<128x8xf32> to vector<128x8xbf16>
    %c0_22 = arith.constant 0 : index
    %c8 = arith.constant 8 : index
    %83 = vector.load %arg5[%c0_22, %c8] : memref<128x32xbf16, #tpu.memory_space<vmem>>, vector<128x8xbf16>
    tpu.vector_store %arg5[%c0_22, %c8], %82 {strides = array<i32>} : memref<128x32xbf16, #tpu.memory_space<vmem>>, vector<128x8xbf16>,
    %84 = vector.extract_strided_slice %35 {offsets = [0, 0, 16], sizes = [2, 64, 8], strides = [1, 1, 1]} : vector<2x64x96xf32> to vector<2x64x8xf32>
    %85 = arith.truncf %84 : vector<2x64x8xf32> to vector<2x64x8xbf16>
    %86 = vector.extract_strided_slice %35 {offsets = [0, 0, 48], sizes = [2, 64, 8], strides = [1, 1, 1]} : vector<2x64x96xf32> to vector<2x64x8xf32>
    %87 = arith.truncf %86 : vector<2x64x8xf32> to vector<2x64x8xbf16>
    %88 = vector.extract_strided_slice %35 {offsets = [0, 0, 80], sizes = [2, 64, 8], strides = [1, 1, 1]} : vector<2x64x96xf32> to vector<2x64x8xf32>
    %89 = arith.truncf %88 : vector<2x64x8xf32> to vector<2x64x8xbf16>
    "tpu.trace_start"() <{level = 10 : i32, message = "bqd,bkd->bqk"}> : () -> ()
    %cst_23 = arith.constant dense<0.000000e+00> : vector<2x64x64xf32>
    %90 = tpu.matmul %85, %87, %cst_23 {dimension_numbers = #tpu.dot_dimension_numbers<[2], [2], [1], [1], [0, 0, 0, 1, 1, 1], [0], [0]>} : vector<2x64x8xbf16>, vector<2x64x8xbf16>, vector<2x64x64xf32> -> vector<2x64x64xf32>
    "tpu.trace_stop"() : () -> ()
    %cst_24 = arith.constant 0.353553385 : f32
    %91 = vector.broadcast %cst_24 : f32 to vector<2x64x64xf32>
    %92 = arith.mulf %90, %91 : vector<2x64x64xf32>
    %cst_25 = arith.constant dense<0xFF800000> : vector<2x64xf32>
    %93 = vector.multi_reduction <maximumf>, %92, %cst_25 [2] : vector<2x64x64xf32> to vector<2x64xf32>
    %94 = vector.shape_cast %93 : vector<2x64xf32> to vector<2x64x1xf32>
    %95 = vector.broadcast %94 : vector<2x64x1xf32> to vector<2x64x64xf32>
    %96 = arith.subf %92, %95 : vector<2x64x64xf32>
    %97 = math.exp %96 : vector<2x64x64xf32>
    %cst_26 = arith.constant dense<0.000000e+00> : vector<2x64xf32>
    %98 = vector.multi_reduction <add>, %97, %cst_26 [2] : vector<2x64x64xf32> to vector<2x64xf32>
    %99 = vector.shape_cast %98 : vector<2x64xf32> to vector<2x64x1xf32>
    %100 = tpu.reciprocal %99 {approx = true} : vector<2x64x1xf32> -> vector<2x64x1xf32>
    %101 = vector.broadcast %100 : vector<2x64x1xf32> to vector<2x64x64xf32>
    %102 = arith.mulf %97, %101 : vector<2x64x64xf32>
    %103 = arith.truncf %102 : vector<2x64x64xf32> to vector<2x64x64xbf16>
    "tpu.trace_start"() <{level = 10 : i32, message = "bqk,bkd->bqd"}> : () -> ()
    %cst_27 = arith.constant dense<0.000000e+00> : vector<2x64x8xf32>
    %104 = tpu.matmul %103, %89, %cst_27 {dimension_numbers = #tpu.dot_dimension_numbers<[2], [1], [1], [2], [0, 0, 0, 1, 1, 2], [0], [0]>} : vector<2x64x64xbf16>, vector<2x64x8xbf16>, vector<2x64x8xf32> -> vector<2x64x8xf32>
    "tpu.trace_stop"() : () -> ()
    %105 = vector.shape_cast %104 : vector<2x64x8xf32> to vector<128x8xf32>
    %106 = arith.truncf %105 : vector<128x8xf32> to vector<128x8xbf16>
    %c0_28 = arith.constant 0 : index
    %c16 = arith.constant 16 : index
    %107 = vector.load %arg5[%c0_28, %c16] : memref<128x32xbf16, #tpu.memory_space<vmem>>, vector<128x8xbf16>
    tpu.vector_store %arg5[%c0_28, %c16], %106 {strides = array<i32>} : memref<128x32xbf16, #tpu.memory_space<vmem>>, vector<128x8xbf16>,
    %108 = vector.extract_strided_slice %35 {offsets = [0, 0, 24], sizes = [2, 64, 8], strides = [1, 1, 1]} : vector<2x64x96xf32> to vector<2x64x8xf32>
    %109 = arith.truncf %108 : vector<2x64x8xf32> to vector<2x64x8xbf16>
    %110 = vector.extract_strided_slice %35 {offsets = [0, 0, 56], sizes = [2, 64, 8], strides = [1, 1, 1]} : vector<2x64x96xf32> to vector<2x64x8xf32>
    %111 = arith.truncf %110 : vector<2x64x8xf32> to vector<2x64x8xbf16>
    %112 = vector.extract_strided_slice %35 {offsets = [0, 0, 88], sizes = [2, 64, 8], strides = [1, 1, 1]} : vector<2x64x96xf32> to vector<2x64x8xf32>
    %113 = arith.truncf %112 : vector<2x64x8xf32> to vector<2x64x8xbf16>
    "tpu.trace_start"() <{level = 10 : i32, message = "bqd,bkd->bqk"}> : () -> ()
    %cst_29 = arith.constant dense<0.000000e+00> : vector<2x64x64xf32>
    %114 = tpu.matmul %109, %111, %cst_29 {dimension_numbers = #tpu.dot_dimension_numbers<[2], [2], [1], [1], [0, 0, 0, 1, 1, 1], [0], [0]>} : vector<2x64x8xbf16>, vector<2x64x8xbf16>, vector<2x64x64xf32> -> vector<2x64x64xf32>
    "tpu.trace_stop"() : () -> ()
    %cst_30 = arith.constant 0.353553385 : f32
    %115 = vector.broadcast %cst_30 : f32 to vector<2x64x64xf32>
    %116 = arith.mulf %114, %115 : vector<2x64x64xf32>
    %cst_31 = arith.constant dense<0xFF800000> : vector<2x64xf32>
    %117 = vector.multi_reduction <maximumf>, %116, %cst_31 [2] : vector<2x64x64xf32> to vector<2x64xf32>
    %118 = vector.shape_cast %117 : vector<2x64xf32> to vector<2x64x1xf32>
    %119 = vector.broadcast %118 : vector<2x64x1xf32> to vector<2x64x64xf32>
    %120 = arith.subf %116, %119 : vector<2x64x64xf32>
    %121 = math.exp %120 : vector<2x64x64xf32>
    %cst_32 = arith.constant dense<0.000000e+00> : vector<2x64xf32>
    %122 = vector.multi_reduction <add>, %121, %cst_32 [2] : vector<2x64x64xf32> to vector<2x64xf32>
    %123 = vector.shape_cast %122 : vector<2x64xf32> to vector<2x64x1xf32>
    %124 = tpu.reciprocal %123 {approx = true} : vector<2x64x1xf32> -> vector<2x64x1xf32>
    %125 = vector.broadcast %124 : vector<2x64x1xf32> to vector<2x64x64xf32>
    %126 = arith.mulf %121, %125 : vector<2x64x64xf32>
    %127 = arith.truncf %126 : vector<2x64x64xf32> to vector<2x64x64xbf16>
    "tpu.trace_start"() <{level = 10 : i32, message = "bqk,bkd->bqd"}> : () -> ()
    %cst_33 = arith.constant dense<0.000000e+00> : vector<2x64x8xf32>
    %128 = tpu.matmul %127, %113, %cst_33 {dimension_numbers = #tpu.dot_dimension_numbers<[2], [1], [1], [2], [0, 0, 0, 1, 1, 2], [0], [0]>} : vector<2x64x64xbf16>, vector<2x64x8xbf16>, vector<2x64x8xf32> -> vector<2x64x8xf32>
    "tpu.trace_stop"() : () -> ()
    %129 = vector.shape_cast %128 : vector<2x64x8xf32> to vector<128x8xf32>
    %130 = arith.truncf %129 : vector<128x8xf32> to vector<128x8xbf16>
    %c0_34 = arith.constant 0 : index
    %c24 = arith.constant 24 : index
    %131 = vector.load %arg5[%c0_34, %c24] : memref<128x32xbf16, #tpu.memory_space<vmem>>, vector<128x8xbf16>
    tpu.vector_store %arg5[%c0_34, %c24], %130 {strides = array<i32>} : memref<128x32xbf16, #tpu.memory_space<vmem>>, vector<128x8xbf16>,
    %c0_35 = arith.constant 0 : index
    %c0_36 = arith.constant 0 : index
    %132 = vector.load %arg5[%c0_35, %c0_36] : memref<128x32xbf16, #tpu.memory_space<vmem>>, vector<128x32xbf16>
    %cst_37 = arith.constant dense<0.000000e+00> : vector<128x32xf32>
    %133 = tpu.matmul %132, %8, %cst_37 {dimension_numbers = #tpu.dot_dimension_numbers<[1], [0], [0], [1], [0, 0, 1, 1], [], []>} : vector<128x32xbf16>, vector<32x32xbf16>, vector<128x32xf32> -> vector<128x32xf32>
    %134 = vector.broadcast %3 : vector<1x32xf32> to vector<128x32xf32>
    %135 = arith.addf %133, %134 : vector<128x32xf32>
    %c0_38 = arith.constant 0 : index
    %c0_39 = arith.constant 0 : index
    %136 = vector.load %arg4[%c0_38, %c0_39] : memref<128x32xf32, #tpu.memory_space<vmem>>, vector<128x32xf32>
    tpu.vector_store %arg4[%c0_38, %c0_39], %135 {strides = array<i32>} : memref<128x32xf32, #tpu.memory_space<vmem>>, vector<128x32xf32>,
    return
  }
  func.func @transform_0(%arg0: i32) -> (i32, i32) {
    %c0_i32 = arith.constant 0 : i32
    %c0_i32_0 = arith.constant 0 : i32
    return %arg0, %c0_i32 : i32, i32
  }
  func.func @transform_1(%arg0: i32) -> (i32, i32) {
    %c0_i32 = arith.constant 0 : i32
    %c0_i32_0 = arith.constant 0 : i32
    %c0_i32_1 = arith.constant 0 : i32
    return %c0_i32, %c0_i32_0 : i32, i32
  }
  func.func @transform_2(%arg0: i32) -> (i32, i32) {
    %c0_i32 = arith.constant 0 : i32
    %c0_i32_0 = arith.constant 0 : i32
    %c0_i32_1 = arith.constant 0 : i32
    return %c0_i32, %c0_i32_0 : i32, i32
  }
  func.func @transform_3(%arg0: i32) -> (i32, i32) {
    %c0_i32 = arith.constant 0 : i32
    %c0_i32_0 = arith.constant 0 : i32
    return %arg0, %c0_i32 : i32, i32
  }
}

</mosaic_0001>

<bundles_post_ra>
// kernel: tpu_custom_call.1
= control target key start
LH: loop header
LB: loop body
LE: loop exit
PB: predicated region body
PF: predicated region fallthrough
CT: control target
= control target key end

     0   :  { %s4246_s12 = smov 0   ;;  %s5770_s0 = inlined_call_operand.vmem [shape: f32[256,32], index: 0, kind: input, shape index: {}]   ;;  %s5771_s1 = inlined_call_operand.vmem [shape: bf16[32,128], index: 1, kind: input, shape index: {}]   ;;  %s5772_s2 = inlined_call_operand.vmem [shape: f32[2,128], index: 2, kind: input, shape index: {}]   ;;  %s5773_s3 = inlined_call_operand.vmem [shape: f32[256,32], index: 3, kind: output, shape index: {}]  }
   0x1 LB: > { %s3319_s13 = sadd.s32 4294967295, %s4209_s12   ;;  %p3323_p0 = scmp.ge.s32.totalorder %s4209_s12, 1  ;;  %s4209_s12 = sphi %s4246_s12, %s13_s12  }
   0x2   : > { %p138_p1 = scmp.lt.s32.totalorder %s4209_s12, 3 }
   0x4   : > { %p139_p2 = pnand %p3323_p0, %p138_p1 }
   0x6   : > { %142 = sbr.rel (%p139_p2) target bundleno = 4141 (0x102d), region = 32 }
   0xd   : > { %s3324_s14 = sshll.u32 %s3319_s13, 4  ;;  %vm196_vm0 = vcmask 261120   ;;  %s4211_s25 = smov 96   ;;  %vm611_vm1 = vcmask 64512   ;;  %vm818_vm2 = vcmask 523264   ;;  %vm1825_vm3 = vcmask 130112  }
   0xe   : > { %p163_p3 = scmp.lt.s32.totalorder %s3324_s14, 31  ;;  %s4212_s26 = smov 64   ;;  %vm2462_vm4 = vcmask 195712   ;;  %vm3099_vm5 = vcmask 261312  }
   0xf   : > { %s4213_s27 = smov 88   ;;  %s4214_s28 = smov 120  }
  0x10   : > { %s5816_s14 = smov (!%p163_p3, %s3324_s14), 31  ;;  %s4215_s29 = smov 56  }
  0x11   : > { %s3325_s15 = sshll.u32 %s5816_s14, 3  ;;  %s4216_s30 = smov 80  }
  0x12   : > { %s4262_s18 = scalar_lea.vmem %s5770_s0, %s3325_s15  ;;  %s4217_s4 = smov 112  }
  0x13   : > { %v175_v0 = vld [vmem:[%s4262_s18] sm:$0xff]  ;;  %v177_v1 = vld [vmem:[%s4262_s18 + $0x10] sm:$0xff]  ;;  %v176_v2 = vld [vmem:[%s4262_s18 + $0x8] sm:$0xff]  ;;  %s4218_s5 = smov 48   ;;  %s4219_s6 = smov 72  }
  0x14   : > { %v197_v3 = vsel %vm196_vm0, %v175_v0, 0.0  ;;  %v203_v4 = vsel %vm196_vm0, %v177_v1, 0.0  ;;  %v178_v5 = vld [vmem:[%s4262_s18 + $0x18] sm:$0xff]  ;;  %v200_v6 = vsel %vm196_vm0, %v176_v2, 0.0  ;;  %v179_v8 = vld [vmem:[%s4262_s18 + $0x20] sm:$0xff]  ;;  %v180_v9 = vld [vmem:[%s4262_s18 + $0x28] sm:$0xff]  ;;  %s5733_s22 = scalar_lea.vmem %s5773_s3, %s3325_s15 }
  0x15   : > { %198 = vadd.xlane.f32.xlu0 %v197_v3  ;;  %204 = vadd.xlane.f32.xlu1 %v203_v4  ;;  %v206_v7 = vsel %vm196_vm0, %v178_v5, 0.0  ;;  %v209_v10 = vsel %vm196_vm0, %v179_v8, 0.0  ;;  %v212_v11 = vsel %vm196_vm0, %v180_v9, 0.0  ;;  %v4277_v12 = vld [vmem:[%s4262_s18 + $0x30] sm:$0xff]  ;;  %v4280_v13 = vld [vmem:[%s4262_s18 + $0x38] sm:$0xff]  ;;  %v4287_v16 = vld [vmem:[%s4262_s18 + $0x40] sm:$0xff] }
  0x16   : > { %v215_v14 = vsel %vm196_vm0, %v4277_v12, 0.0  ;;  %v218_v15 = vsel %vm196_vm0, %v4280_v13, 0.0  ;;  %v4290_v17 = vld [vmem:[%s4262_s18 + $0x48] sm:$0xff]  ;;  %v221_v18 = vsel %vm196_vm0, %v4287_v16, 0.0  ;;  %v4297_v20 = vld [vmem:[%s4262_s18 + $0x50] sm:$0xff]  ;;  %v4300_v21 = vld [vmem:[%s4262_s18 + $0x58] sm:$0xff] }
  0x17   : > { %v224_v19 = vsel %vm196_vm0, %v4290_v17, 0.0  ;;  %v227_v22 = vsel %vm196_vm0, %v4297_v20, 0.0  ;;  %v230_v23 = vsel %vm196_vm0, %v4300_v21, 0.0  ;;  %v4307_v24 = vld [vmem:[%s4262_s18 + $0x60] sm:$0xff]  ;;  %v4310_v25 = vld [vmem:[%s4262_s18 + $0x68] sm:$0xff]  ;;  %v4317_v28 = vld [vmem:[%s4262_s18 + $0x70] sm:$0xff] }
  0x18   : > { %v233_v26 = vsel %vm196_vm0, %v4307_v24, 0.0  ;;  %v236_v27 = vsel %vm196_vm0, %v4310_v25, 0.0  ;;  %v4320_v29 = vld [vmem:[%s4262_s18 + $0x78] sm:$0xff]  ;;  %v239_v30 = vsel %vm196_vm0, %v4317_v28, 0.0  ;;  %s4220_s7 = smov 104   ;;  %s4221_s8 = smov 40  }
  0x19   : > { %201 = vadd.xlane.f32.xlu0 %v200_v6  ;;  %207 = vadd.xlane.f32.xlu1 %v206_v7  ;;  %v242_v31 = vsel %vm196_vm0, %v4320_v29, 0.0  ;;  %s4222_s9 = smov 8   ;;  %s4223_s10 = smov 16  }
  0x1a   : > { %s4224_s11 = smov 24   ;;  %s4225_s17 = smov 32  }
  0x1d   : > { %210 = vadd.xlane.f32.xlu0 %v209_v10  ;;  %213 = vadd.xlane.f32.xlu1 %v212_v11 }
  0x21   : > { %216 = vadd.xlane.f32.xlu0 %v215_v14  ;;  %219 = vadd.xlane.f32.xlu1 %v218_v15 }
  0x25   : > { %222 = vadd.xlane.f32.xlu0 %v221_v18  ;;  %225 = vadd.xlane.f32.xlu1 %v224_v19 }
  0x29   : > { %228 = vadd.xlane.f32.xlu0 %v227_v22  ;;  %231 = vadd.xlane.f32.xlu1 %v230_v23 }
  0x2d   : > { %234 = vadd.xlane.f32.xlu0 %v233_v26  ;;  %237 = vadd.xlane.f32.xlu1 %v236_v27 }
  0x31   : > { %240 = vadd.xlane.f32.xlu0 %v239_v30  ;;  %243 = vadd.xlane.f32.xlu1 %v242_v31 }
  0xa2   : > { %v199_v32 = vpop.xlane.xlu0 %198  ;;  %v205_v33 = vpop.xlane.xlu1 %204 }
  0xa3   : > { %v246_v34 = vmul.f32 0.03125, %v199_v32  ;;  %v248_v35 = vmul.f32 0.03125, %v205_v33 }
  0xa5   : > { %v4326_v36 = vsub.f32 %v175_v0, %v246_v34  ;;  %v4328_v37 = vsub.f32 %v177_v1, %v248_v35 }
  0xa6   : > { %v202_v38 = vpop.xlane.xlu0 %201  ;;  %v208_v39 = vpop.xlane.xlu1 %207 }
  0xa7   : > { %v247_v40 = vmul.f32 0.03125, %v202_v38  ;;  %v249_v41 = vmul.f32 0.03125, %v208_v39  ;;  %v278_v42 = vmul.f32 %v4326_v36, %v4326_v36  ;;  %v280_v43 = vmul.f32 %v4328_v37, %v4328_v37 }
  0xa9   : > { %v4334_v44 = vsub.f32 %v176_v2, %v247_v40  ;;  %v4336_v45 = vsub.f32 %v178_v5, %v249_v41  ;;  %v294_v46 = vsel %vm196_vm0, %v278_v42, 0.0  ;;  %v300_v49 = vsel %vm196_vm0, %v280_v43, 0.0 }
  0xaa   : > { %295 = vadd.xlane.f32.xlu0 %v294_v46  ;;  %v211_v47 = vpop.xlane.xlu0 %210  ;;  %v214_v48 = vpop.xlane.xlu1 %213 }
  0xab   : > { %v250_v50 = vmul.f32 0.03125, %v211_v47  ;;  %v251_v51 = vmul.f32 0.03125, %v214_v48  ;;  %v279_v52 = vmul.f32 %v4334_v44, %v4334_v44  ;;  %v281_v53 = vmul.f32 %v4336_v45, %v4336_v45 }
  0xad   : > { %v4344_v54 = vsub.f32 %v179_v8, %v250_v50  ;;  %v4346_v55 = vsub.f32 %v180_v9, %v251_v51  ;;  %v297_v56 = vsel %vm196_vm0, %v279_v52, 0.0  ;;  %v303_v59 = vsel %vm196_vm0, %v281_v53, 0.0 }
  0xae   : > { %301 = vadd.xlane.f32.xlu0 %v300_v49  ;;  %298 = vadd.xlane.f32.xlu1 %v297_v56  ;;  %v217_v57 = vpop.xlane.xlu0 %216  ;;  %v220_v58 = vpop.xlane.xlu1 %219  ;;  %v406_v49 = vlaneseq }
  0xaf   : > { %v252_v60 = vmul.f32 0.03125, %v217_v57  ;;  %v253_v61 = vmul.f32 0.03125, %v220_v58  ;;  %v282_v62 = vmul.f32 %v4344_v54, %v4344_v54  ;;  %v283_v63 = vmul.f32 %v4346_v55, %v4346_v55  ;;  %v3911_v57 = vld [vmem:[%s5771_s1] sm:$0xff]  }
  0xb0   : > { %v4412_v52 = vshrl.u32 %v406_v49, 7  ;;  %3560 = vmatprep.subr.bf16.mxu0 %v3911_v57 }
  0xb1   : > { %v4355_v0 = vsub.f32 %v4277_v12, %v252_v60  ;;  %v4358_v1 = vsub.f32 %v4280_v13, %v253_v61  ;;  %v306_v2 = vsel %vm196_vm0, %v282_v62, 0.0  ;;  %v309_v5 = vsel %vm196_vm0, %v283_v63, 0.0  ;;  %3561 = vmatpush3.bf16.msra.mxu0 %v3911_v57  ;;  %v3912_v60 = vld [vmem:[%s5771_s1 + $0x8] sm:$0xff]  }
  0xb2   : > { %304 = vadd.xlane.f32.xlu1 %v303_v59  ;;  %307 = vadd.xlane.f32.xlu0 %v306_v2  ;;  %v223_v3 = vpop.xlane.xlu0 %222  ;;  %v226_v4 = vpop.xlane.xlu1 %225  ;;  %v408_v56 = vsub.s32 1, %v4412_v52 }
  0xb3   : > { %v254_v6 = vmul.f32 0.03125, %v223_v3  ;;  %v255_v7 = vmul.f32 0.03125, %v226_v4  ;;  %v284_v8 = vmul.f32 %v4355_v0, %v4355_v0  ;;  %v285_v9 = vmul.f32 %v4358_v1, %v4358_v1  ;;  %3562 = vmatprep.subr.bf16.mxu0 %v3912_v60 }
  0xb5   : > { %v4367_v10 = vsub.f32 %v4287_v16, %v254_v6  ;;  %v4370_v11 = vsub.f32 %v4290_v17, %v255_v7  ;;  %v312_v12 = vsel %vm196_vm0, %v284_v8, 0.0  ;;  %v315_v15 = vsel %vm196_vm0, %v285_v9, 0.0  ;;  %3563 = vmatpush3.bf16.msra.mxu0 %v3912_v60 }
  0xb6   : > { %310 = vadd.xlane.f32.xlu1 %v309_v5  ;;  %313 = vadd.xlane.f32.xlu0 %v312_v12  ;;  %v229_v13 = vpop.xlane.xlu0 %228  ;;  %v232_v14 = vpop.xlane.xlu1 %231 }
  0xb7   : > { %v256_v18 = vmul.f32 0.03125, %v229_v13  ;;  %v257_v19 = vmul.f32 0.03125, %v232_v14  ;;  %v286_v22 = vmul.f32 %v4367_v10, %v4367_v10  ;;  %v287_v16 = vmul.f32 %v4370_v11, %v4370_v11 }
  0xb9   : > { %v4379_v23 = vsub.f32 %v4297_v20, %v256_v18  ;;  %v4382_v17 = vsub.f32 %v4300_v21, %v257_v19  ;;  %v318_v26 = vsel %vm196_vm0, %v286_v22, 0.0  ;;  %v321_v27 = vsel %vm196_vm0, %v287_v16, 0.0 }
  0xba   : > { %316 = vadd.xlane.f32.xlu1 %v315_v15  ;;  %319 = vadd.xlane.f32.xlu0 %v318_v26  ;;  %v235_v30 = vpop.xlane.xlu0 %234  ;;  %v238_v31 = vpop.xlane.xlu1 %237 }
  0xbb   : > { %v288_v32 = vmul.f32 %v4379_v23, %v4379_v23  ;;  %v258_v33 = vmul.f32 0.03125, %v235_v30  ;;  %v259_v34 = vmul.f32 0.03125, %v238_v31  ;;  %v289_v20 = vmul.f32 %v4382_v17, %v4382_v17 }
  0xbd   : > { %v324_v35 = vsel %vm196_vm0, %v288_v32, 0.0  ;;  %v4392_v21 = vsub.f32 %v4307_v24, %v258_v33  ;;  %v4395_v39 = vsub.f32 %v4310_v25, %v259_v34  ;;  %v327_v40 = vsel %vm196_vm0, %v289_v20, 0.0 }
  0xbe   : > { %322 = vadd.xlane.f32.xlu1 %v321_v27  ;;  %325 = vadd.xlane.f32.xlu0 %v324_v35  ;;  %v241_v38 = vpop.xlane.xlu0 %240  ;;  %v244_v43 = vpop.xlane.xlu1 %243 }
  0xbf   : > { %v290_v41 = vmul.f32 %v4392_v21, %v4392_v21  ;;  %v260_v42 = vmul.f32 0.03125, %v241_v38  ;;  %v261_v24 = vmul.f32 0.03125, %v244_v43  ;;  %v291_v48 = vmul.f32 %v4395_v39, %v4395_v39 }
  0xc1   : > { %v330_v46 = vsel %vm196_vm0, %v290_v41, 0.0  ;;  %v4402_v47 = vsub.f32 %v4317_v28, %v260_v42  ;;  %v4407_v25 = vsub.f32 %v4320_v29, %v261_v24  ;;  %v333_v50 = vsel %vm196_vm0, %v291_v48, 0.0  ;;  %v4421_v29 = vld [vmem:[%s5772_s2] sm:$0x3] }
  0xc2   : > { %328 = vadd.xlane.f32.xlu1 %v327_v40  ;;  %v4428_v59 = vrot.slane %v4421_v29, %v408_v56 }
  0xc3   : > { %v292_v51 = vmul.f32 %v4402_v47, %v4402_v47  ;;  %v293_v53 = vmul.f32 %v4407_v25, %v4407_v25 }
  0xc5   : > { %v336_v28 = vsel %vm196_vm0, %v292_v51, 0.0  ;;  %v339_v58 = vsel %vm196_vm0, %v293_v53, 0.0 }
  0xc6   : > { %331 = vadd.xlane.f32.xlu1 %v330_v46 }
  0xca   : > { %334 = vadd.xlane.f32.xlu1 %v333_v50 }
  0xce   : > { %337 = vadd.xlane.f32.xlu1 %v336_v28 }
  0xd2   : > { %340 = vadd.xlane.f32.xlu1 %v339_v58 }
  0xd4   : > { %427 = vrot.lane.b32.xlu0 %v4428_v59, %s4211_s25 }
 0x137   : > { %v296_v61 = vpop.xlane.xlu0 %295 }
 0x138   : > { %v342_v62 = vmul.f32 0.03125, %v296_v61 }
 0x13a   : > { %v358_v63 = vadd.f32 1e-05, %v342_v62 }
 0x13b   : > { %v299_v2 = vpop.xlane.xlu1 %298  ;;  %v302_v3 = vpop.xlane.xlu0 %301 }
 0x13c   : > { %v343_v4 = vmul.f32 0.03125, %v299_v2  ;;  %v344_v5 = vmul.f32 0.03125, %v302_v3  ;;  %3913 = vrsqrt.f32 %v358_v63 }
 0x13e   : > { %v359_v6 = vadd.f32 1e-05, %v343_v4  ;;  %v360_v7 = vadd.f32 1e-05, %v344_v5 }
 0x13f   : > { %v305_v8 = vpop.xlane.xlu1 %304  ;;  %v308_v9 = vpop.xlane.xlu0 %307 }
 0x140   : > { %3915 = vrsqrt.f32 %v359_v6  ;;  %v345_v12 = vmul.f32 0.03125, %v305_v8  ;;  %v346_v13 = vmul.f32 0.03125, %v308_v9 }
 0x141   : > { %3917 = vrsqrt.f32 %v360_v7 }
 0x142   : > { %v361_v14 = vadd.f32 1e-05, %v345_v12  ;;  %v362_v15 = vadd.f32 1e-05, %v346_v13 }
 0x143   : > { %v311_v18 = vpop.xlane.xlu1 %310  ;;  %v314_v19 = vpop.xlane.xlu0 %313 }
 0x144   : > { %3919 = vrsqrt.f32 %v361_v14  ;;  %v347_v22 = vmul.f32 0.03125, %v311_v18  ;;  %v348_v16 = vmul.f32 0.03125, %v314_v19 }
 0x145   : > { %3921 = vrsqrt.f32 %v362_v15 }
 0x146   : > { %v363_v26 = vadd.f32 1e-05, %v347_v22  ;;  %v364_v27 = vadd.f32 1e-05, %v348_v16  ;;  %v3914_v30 = vpop.eup %3913 }
 0x147   : > { %v317_v31 = vpop.xlane.xlu1 %316  ;;  %v320_v32 = vpop.xlane.xlu0 %319  ;;  %v390_v40 = vmul.f32 %v3914_v30, %v4326_v36 }
 0x148   : > { %3923 = vrsqrt.f32 %v363_v26  ;;  %v349_v33 = vmul.f32 0.03125, %v317_v31  ;;  %v350_v34 = vmul.f32 0.03125, %v320_v32 }
 0x149   : > { %3925 = vrsqrt.f32 %v364_v27  ;;  %v410_v56 = vmul.f32 %v4428_v59, %v390_v40 }
 0x14a   : > { %v3916_v20 = vpop.eup %3915  ;;  %v365_v35 = vadd.f32 1e-05, %v349_v33  ;;  %v366_v38 = vadd.f32 1e-05, %v350_v34 }
 0x14b   : > { %v3918_v41 = vpop.eup %3917  ;;  %v323_v42 = vpop.xlane.xlu1 %322  ;;  %v391_v46 = vmul.f32 %v3916_v20, %v4334_v44 }
 0x14c   : > { %v326_v43 = vpop.xlane.xlu0 %325  ;;  %3927 = vrsqrt.f32 %v365_v35  ;;  %v351_v24 = vmul.f32 0.03125, %v323_v42  ;;  %v392_v49 = vmul.f32 %v3918_v41, %v4328_v37 }
 0x14d   : > { %v352_v48 = vmul.f32 0.03125, %v326_v43  ;;  %3929 = vrsqrt.f32 %v366_v38  ;;  %v411_v50 = vmul.f32 %v4428_v59, %v391_v46 }
 0x14e   : > { %v3920_v51 = vpop.eup %3919  ;;  %v367_v28 = vadd.f32 1e-05, %v351_v24  ;;  %v412_v44 = vmul.f32 %v4428_v59, %v392_v49 }
 0x14f   : > { %v368_v53 = vadd.f32 1e-05, %v352_v48  ;;  %v3922_v57 = vpop.eup %3921  ;;  %v329_v36 = vpop.xlane.xlu1 %328  ;;  %v393_v60 = vmul.f32 %v3920_v51, %v4336_v45 }
 0x150   : > { %v4440_v58 = vpop.permute.xlu0 %427  ;;  %3931 = vrsqrt.f32 %v367_v28  ;;  %v353_v61 = vmul.f32 0.03125, %v329_v36  ;;  %v394_v2 = vmul.f32 %v3922_v57, %v4344_v54 }
 0x151   : > { %v430_v37 = vadd.f32 %v4440_v58, %v410_v56  ;;  %v431_v62 = vadd.f32 %v4440_v58, %v411_v50  ;;  %3933 = vrsqrt.f32 %v368_v53  ;;  %v413_v63 = vmul.f32 %v4428_v59, %v393_v60 }
 0x152   : > { %v3924_v3 = vpop.eup %3923  ;;  %v369_v4 = vadd.f32 1e-05, %v353_v61  ;;  %v432_v45 = vadd.f32 %v4440_v58, %v412_v44  ;;  %v414_v12 = vmul.f32 %v4428_v59, %v394_v2 }
 0x153   : > { %v446_v5 = vpack.c.bf16 %v431_v62, %v430_v37  ;;  %v3926_v6 = vpop.eup %3925  ;;  %v332_v7 = vpop.xlane.xlu1 %331  ;;  %v433_v8 = vadd.f32 %v4440_v58, %v413_v63  ;;  %v395_v9 = vmul.f32 %v3924_v3, %v4346_v55 }
 0x154   : > { %3935 = vrsqrt.f32 %v369_v4  ;;  %v354_v13 = vmul.f32 0.03125, %v332_v7  ;;  %v396_v14 = vmul.f32 %v3926_v6, %v4355_v0  ;;  %v434_v26 = vadd.f32 %v4440_v58, %v414_v12 }
 0x155   : > { %3564 = vmatprep.mubr.msk.bf16.mxu0 %vm196_vm0, %v446_v5  ;;  %v447_v54 = vpack.c.bf16 %v433_v8, %v432_v45  ;;  %v415_v15 = vmul.f32 %v4428_v59, %v395_v9 }
 0x156   : > { %v3928_v18 = vpop.eup %3927  ;;  %v370_v19 = vadd.f32 1e-05, %v354_v13  ;;  %v416_v30 = vmul.f32 %v4428_v59, %v396_v14 }
 0x157   : > { %v3930_v22 = vpop.eup %3929  ;;  %v335_v16 = vpop.xlane.xlu1 %334  ;;  %3565 = vmatmul.mubr.msk.bf16.vlgmr.msra.gmra.mrb[0].mxu0 %vm196_vm0, %v447_v54  ;;  %v435_v55 = vadd.f32 %v4440_v58, %v415_v15  ;;  %v397_v27 = vmul.f32 %v3928_v18, %v4358_v1  ;;  %v456_v54 = vsub.s32 0, %v4412_v52 }
 0x158   : > { %3937 = vrsqrt.f32 %v370_v19  ;;  %v355_v31 = vmul.f32 0.03125, %v335_v16  ;;  %v398_v0 = vmul.f32 %v3930_v22, %v4367_v10  ;;  %v436_v40 = vadd.f32 %v4440_v58, %v416_v30 }
 0x159   : > { %v448_v32 = vpack.c.bf16 %v435_v55, %v434_v26  ;;  %v417_v33 = vmul.f32 %v4428_v59, %v397_v27 }
 0x15a   : > { %v3932_v34 = vpop.eup %3931  ;;  %v371_v20 = vadd.f32 1e-05, %v355_v31  ;;  %v418_v42 = vmul.f32 %v4428_v59, %v398_v0 }
 0x15b   : > { %v3934_v35 = vpop.eup %3933  ;;  %v338_v38 = vpop.xlane.xlu1 %337  ;;  %3568 = vmatprep.mubr.msk.bf16.mxu0 %vm196_vm0, %v448_v32  ;;  %v437_v41 = vadd.f32 %v4440_v58, %v417_v33  ;;  %v399_v1 = vmul.f32 %v3932_v34, %v4370_v11 }
 0x15c   : > { %3939 = vrsqrt.f32 %v371_v20  ;;  %v356_v43 = vmul.f32 0.03125, %v338_v38  ;;  %v400_v10 = vmul.f32 %v3934_v35, %v4379_v23  ;;  %v438_v51 = vadd.f32 %v4440_v58, %v418_v42 }
 0x15d   : > { %v449_v46 = vpack.c.bf16 %v437_v41, %v436_v40  ;;  %v419_v24 = vmul.f32 %v4428_v59, %v399_v1 }
 0x15e   : > { %v3936_v48 = vpop.eup %3935  ;;  %v372_v49 = vadd.f32 1e-05, %v356_v43  ;;  %v420_v53 = vmul.f32 %v4428_v59, %v400_v10 }
 0x15f   : > { %v341_v50 = vpop.xlane.xlu1 %340  ;;  %3569 = vmatmul.mubr.msk.bf16.gmra.mrb[4].mxu0 %vm196_vm0, %v449_v46  ;;  %v439_v28 = vadd.f32 %v4440_v58, %v419_v24  ;;  %v401_v11 = vmul.f32 %v3936_v48, %v4382_v17 }
 0x160   : > { %3941 = vrsqrt.f32 %v372_v49  ;;  %v357_v56 = vmul.f32 0.03125, %v341_v50  ;;  %v440_v44 = vadd.f32 %v4440_v58, %v420_v53 }
 0x161   : > { %v450_v57 = vpack.c.bf16 %v439_v28, %v438_v51  ;;  %v421_v23 = vmul.f32 %v4428_v59, %v401_v11 }
 0x162   : > { %v3938_v36 = vpop.eup %3937  ;;  %v373_v60 = vadd.f32 1e-05, %v357_v56 }
 0x163   : > { %3572 = vmatprep.mubr.msk.bf16.mxu0 %vm196_vm0, %v450_v57  ;;  %v441_v61 = vadd.f32 %v4440_v58, %v421_v23  ;;  %v402_v37 = vmul.f32 %v3938_v36, %v4392_v21 }
 0x164   : > { %3943 = vrsqrt.f32 %v373_v60 }
 0x165   : > { %v451_v62 = vpack.c.bf16 %v441_v61, %v440_v44  ;;  %v422_v2 = vmul.f32 %v4428_v59, %v402_v37 }
 0x166   : > { %v3940_v17 = vpop.eup %3939 }
 0x167   : > { %3573 = vmatmul.mubr.msk.bf16.gmra.mrb[8].mxu0 %vm196_vm0, %v451_v62  ;;  %v403_v63 = vmul.f32 %v3940_v17, %v4395_v39  ;;  %v442_v5 = vadd.f32 %v4440_v58, %v422_v2 }
 0x169   : > { %v423_v3 = vmul.f32 %v4428_v59, %v403_v63 }
 0x16a   : > { %v3942_v4 = vpop.eup %3941 }
 0x16b   : > { %v443_v6 = vadd.f32 %v4440_v58, %v423_v3  ;;  %v404_v7 = vmul.f32 %v3942_v4, %v4402_v47  ;;  %v4495_v47 = vrot.slane %v4421_v29, %v456_v54 }
 0x16d   : > { %v452_v45 = vpack.c.bf16 %v443_v6, %v442_v5  ;;  %v424_v9 = vmul.f32 %v4428_v59, %v404_v7  ;;  %5782 = vst [vmem:[#allocation3_spill] sm:$0xff] %v4495_v47 }
 0x16e   : > { %v3944_v21 = vpop.eup %3943 }
 0x16f   : > { %3576 = vmatprep.mubr.msk.bf16.mxu0 %vm196_vm0, %v452_v45  ;;  %v405_v8 = vmul.f32 %v3944_v21, %v4407_v25  ;;  %v444_v12 = vadd.f32 %v4440_v58, %v424_v9 }
 0x171   : > { %v425_v39 = vmul.f32 %v4428_v59, %v405_v8 }
 0x173   : > { %v445_v13 = vadd.f32 %v4440_v58, %v425_v39 }
 0x175   : > { %v453_v14 = vpack.c.bf16 %v445_v13, %v444_v12 }
 0x177   : > { %3577 = vmatmul.mubr.msk.bf16.gmra.mrb[12].mxu0 %vm196_vm0, %v453_v14 }
 0x22a   : > { %v3566_v15 = vpop.f32.mrb[0].mxu0 }
 0x22b   : > { %v528_v18 = vpop.f32.mrb[1].mxu0  ;;  %v537_v25 = vadd.f32 %v3566_v15, %v4495_v47 }
 0x22c   : > { %v3567_v19 = vpop.f32.mrb[2].mxu0  ;;  %v529_v16 = vadd.f32 %v528_v18, %v4495_v47 }
 0x22d   : > { %v540_v22 = vadd.f32 %v3567_v19, %v4495_v47  ;;  %v531_v59 = vpop.f32.mrb[3].mxu0 }
 0x22e   : > { %v532_v58 = vadd.f32 %v531_v59, %v4495_v47 }
 0x22f   : > { %v4501_v26 = vpack.c.bf16 %v540_v22, %v537_v25 }
 0x230   : > { %v4503_v55 = vpack.c.bf16 %v532_v58, %v529_v16 }
 0x231   : > { %605 = vrot.lane.b32.xlu0 %v4501_v26, %s4211_s25 }
 0x232   : > { %v3570_v52 = vpop.f32.mrb[4].mxu0  ;;  %603 = vrot.lane.b32.xlu1 %v4503_v55, %s4211_s25  ;;  %3588 = vmatprep.mubr.msk.bf16.mxu1 %vm611_vm1, %v4503_v55 }
 0x233   : > { %v544_v29 = vpop.f32.mrb[5].mxu0  ;;  %v553_v30 = vadd.f32 %v3570_v52, %v4495_v47 }
 0x234   : > { %v3571_v27 = vpop.f32.mrb[6].mxu0  ;;  %v545_v32 = vadd.f32 %v544_v29, %v4495_v47 }
 0x235   : > { %v556_v31 = vadd.f32 %v3571_v27, %v4495_v47  ;;  %v547_v0 = vpop.f32.mrb[7].mxu0 }
 0x236   : > { %v548_v33 = vadd.f32 %v547_v0, %v4495_v47 }
 0x237   : > { %v4515_v34 = vpack.c.bf16 %v556_v31, %v553_v30 }
 0x238   : > { %v4517_v20 = vpack.c.bf16 %v548_v33, %v545_v32 }
 0x239   : > { %609 = vrot.lane.b32.xlu1 %v4515_v34, %s4211_s25 }
 0x23a   : > { %v3574_v35 = vpop.f32.mrb[8].mxu0  ;;  %607 = vrot.lane.b32.xlu0 %v4517_v20, %s4211_s25 }
 0x23b   : > { %v560_v38 = vpop.f32.mrb[9].mxu0  ;;  %v569_v41 = vadd.f32 %v3574_v35, %v4495_v47 }
 0x23c   : > { %v3575_v40 = vpop.f32.mrb[10].mxu0  ;;  %v561_v43 = vadd.f32 %v560_v38, %v4495_v47 }
 0x23d   : > { %v572_v1 = vadd.f32 %v3575_v40, %v4495_v47  ;;  %v563_v42 = vpop.f32.mrb[11].mxu0 }
 0x23e   : > { %v564_v10 = vadd.f32 %v563_v42, %v4495_v47 }
 0x23f   : > { %v4527_v46 = vpack.c.bf16 %v572_v1, %v569_v41 }
 0x240   : > { %v4529_v24 = vpack.c.bf16 %v564_v10, %v561_v43 }
 0x242   : > { %3604 = vmatprep.mubr.msk.bf16.mxu0 %vm611_vm1, %v4529_v24  ;;  %705 = vrot.lane.b32.xlu0 %v4529_v24, %s4211_s25 }
 0x246   : > { %707 = vrot.lane.b32.xlu0 %v4527_v46, %s4211_s25 }
 0x24a   : > { %v3578_v48 = vpop.f32.mrb[12].mxu0 }
 0x24b   : > { %v576_v49 = vpop.f32.mrb[13].mxu0  ;;  %v585_v51 = vadd.f32 %v3578_v48, %v4495_v47 }
 0x24c   : > { %v3579_v50 = vpop.f32.mrb[14].mxu0  ;;  %v577_v53 = vadd.f32 %v576_v49, %v4495_v47 }
 0x24d   : > { %v588_v28 = vadd.f32 %v3579_v50, %v4495_v47  ;;  %v579_v11 = vpop.f32.mrb[15].mxu0 }
 0x24e   : > { %v580_v56 = vadd.f32 %v579_v11, %v4495_v47 }
 0x24f   : > { %v4541_v57 = vpack.c.bf16 %v588_v28, %v585_v51 }
 0x250   : > { %v4543_v23 = vpack.c.bf16 %v580_v56, %v577_v53 }
 0x251   : > { %711 = vrot.lane.b32.xlu0 %v4541_v57, %s4211_s25 }
 0x252   : > { %709 = vrot.lane.b32.xlu1 %v4543_v23, %s4211_s25 }
 0x255   : > { %1005 = vrot.lane.b32.xlu0 %v4501_v26, %s4212_s26 }
 0x256   : > { %1003 = vrot.lane.b32.xlu1 %v4503_v55, %s4212_s26 }
 0x259   : > { %1092 = vrot.lane.b32.xlu0 %v4529_v24, %s4212_s26 }
 0x25a   : > { %1007 = vrot.lane.b32.xlu1 %v4517_v20, %s4212_s26 }
 0x25e   : > { %1009 = vrot.lane.b32.xlu1 %v4515_v34, %s4212_s26 }
 0x262   : > { %1094 = vrot.lane.b32.xlu1 %v4527_v46, %s4212_s26 }
 0x266   : > { %1205 = vrot.lane.b32.xlu1 %v4503_v55, %s4213_s27 }
 0x26a   : > { %1098 = vrot.lane.b32.xlu1 %v4541_v57, %s4212_s26 }
 0x26e   : > { %1207 = vrot.lane.b32.xlu1 %v4501_v26, %s4213_s27 }
 0x272   : > { %1209 = vrot.lane.b32.xlu1 %v4517_v20, %s4213_s27 }
 0x276   : > { %1096 = vrot.lane.b32.xlu1 %v4543_v23, %s4212_s26 }
 0x2a3   : > { %v606_v44 = vpop.permute.xlu0 %605 }
 0x2a4   : > { %v604_v36 = vpop.permute.xlu1 %603  ;;  %v628_v61 = vsel %vm611_vm1, %v606_v44, 0 }
 0x2a5   : > { %3856 = vmatprep.subr.msk.bf16.mxu1 %vm611_vm1, %v604_v36  ;;  %v625_v60 = vsel %vm611_vm1, %v604_v36, 0 }
 0x2a6   : > { %3581 = vmatpush3.bf16.xpose.msra.mxu1 %v625_v60 }
 0x2a7   : > { %3857 = vmatprep.subr.msk.bf16.mxu1 %vm611_vm1, %v606_v44 }
 0x2ab   : > { %v610_v2 = vpop.permute.xlu1 %609 }
 0x2ac   : > { %v608_v37 = vpop.permute.xlu0 %607  ;;  %v634_v4 = vsel %vm611_vm1, %v610_v2, 0 }
 0x2ad   : > { %v631_v17 = vsel %vm611_vm1, %v608_v37, 0 }
 0x2ae   : > { %3583 = vmatpush3.bf16.xpose.msra.mxu1 %v628_v61 }
 0x2af   : > { %3858 = vmatprep.subr.msk.bf16.mxu1 %vm611_vm1, %v608_v37 }
 0x2b4   : > { %v706_v62 = vpop.permute.xlu0 %705 }
 0x2b5   : > { %3860 = vmatprep.subr.msk.bf16.mxu0 %vm611_vm1, %v706_v62  ;;  %v726_v63 = vsel %vm611_vm1, %v706_v62, 0 }
 0x2b6   : > { %3585 = vmatpush3.bf16.xpose.msra.mxu1 %v631_v17  ;;  %3597 = vmatpush3.bf16.xpose.msra.mxu0 %v726_v63 }
 0x2b7   : > { %3859 = vmatprep.subr.msk.bf16.mxu1 %vm611_vm1, %v610_v2 }
 0x2b8   : > { %v708_v3 = vpop.permute.xlu0 %707 }
 0x2b9   : > { %3861 = vmatprep.subr.msk.bf16.mxu0 %vm611_vm1, %v708_v3  ;;  %v729_v5 = vsel %vm611_vm1, %v708_v3, 0 }
 0x2be   : > { %3587 = vmatpush3.bf16.xpose.msra.mxu1 %v634_v4  ;;  %3599 = vmatpush3.bf16.xpose.msra.mxu0 %v729_v5 }
 0x2c3   : > { %v712_v45 = vpop.permute.xlu0 %711 }
 0x2c4   : > { %v710_v6 = vpop.permute.xlu1 %709  ;;  %v735_v9 = vsel %vm611_vm1, %v712_v45, 0 }
 0x2c5   : > { %3589 = vmatmul.mubr.msk.bf16.vlgmr.msra.gmra.mrb[0].mxu1 %vm611_vm1, %v4501_v26  ;;  %3862 = vmatprep.subr.msk.bf16.mxu0 %vm611_vm1, %v710_v6  ;;  %v732_v7 = vsel %vm611_vm1, %v710_v6, 0 }
 0x2c6   : > { %3592 = vmatprep.mubr.msk.bf16.mxu1 %vm611_vm1, %v4517_v20  ;;  %3601 = vmatpush3.bf16.xpose.msra.mxu0 %v732_v7 }
 0x2c7   : > { %3863 = vmatprep.subr.msk.bf16.mxu0 %vm611_vm1, %v712_v45  ;;  %v1006_v13 = vpop.permute.xlu0 %1005 }
 0x2c8   : > { %v1004_v21 = vpop.permute.xlu1 %1003 }
 0x2cb   : > { %v4599_v25 = vpop.permute.xlu0 %1092 }
 0x2cc   : > { %v1008_v8 = vpop.permute.xlu1 %1007 }
 0x2cd   : > { %3593 = vmatmul.mubr.msk.bf16.gmra.mrb[4].mxu1 %vm611_vm1, %v4515_v34 }
 0x2ce   : > { %3603 = vmatpush3.bf16.xpose.msra.mxu0 %v735_v9 }
 0x2cf   : > { %3612 = vmatprep.subr.bf16.mxu0 %v1004_v21 }
 0x2d0   : > { %v1010_v39 = vpop.permute.xlu1 %1009 }
 0x2d4   : > { %v4585_v12 = vpop.permute.xlu1 %1094 }
 0x2d5   : > { %3605 = vmatmul.mubr.msk.bf16.vlgmr.msra.gmra.mrb[16].mxu0 %vm611_vm1, %v4527_v46 }
 0x2d6   : > { %3608 = vmatprep.mubr.msk.bf16.mxu0 %vm611_vm1, %v4543_v23  ;;  %3613 = vmatpush3.bf16.msra.mxu0 %v1004_v21 }
 0x2d7   : > { %3614 = vmatprep.subr.bf16.mxu0 %v1006_v13 }
 0x2d8   : > { %v1206_v14 = vpop.permute.xlu1 %1205 }
 0x2d9   : > { %3864 = vmatprep.subr.msk.bf16.mxu1 %vm611_vm1, %v1206_v14  ;;  %v1226_v54 = vsel %vm611_vm1, %v1206_v14, 0 }
 0x2da   : > { %3615 = vmatpush3.bf16.msra.mxu0 %v1006_v13  ;;  %3645 = vmatpush3.bf16.xpose.msra.mxu1 %v1226_v54 }
 0x2db   : > { %3616 = vmatprep.subr.bf16.mxu0 %v1008_v8 }
 0x2dc   : > { %v4593_v15 = vpop.permute.xlu1 %1098 }
 0x2dd   : > { %3609 = vmatmul.mubr.msk.bf16.gmra.mrb[20].mxu0 %vm611_vm1, %v4541_v57 }
 0x2de   : > { %3617 = vmatpush3.bf16.msra.mxu0 %v1008_v8 }
 0x2df   : > { %3618 = vmatprep.subr.bf16.mxu0 %v1010_v39 }
 0x2e0   : > { %v1208_v18 = vpop.permute.xlu1 %1207 }
 0x2e1   : > { %3865 = vmatprep.subr.msk.bf16.mxu1 %vm611_vm1, %v1208_v18  ;;  %v1229_v19 = vsel %vm611_vm1, %v1208_v18, 0 }
 0x2e2   : > { %3619 = vmatpush3.bf16.msra.mxu0 %v1010_v39  ;;  %3647 = vmatpush3.bf16.xpose.msra.mxu1 %v1229_v19 }
 0x2e3   : > { %3628 = vmatprep.subr.bf16.mxu0 %v4599_v25 }
 0x2e4   : > { %v1210_v22 = vpop.permute.xlu1 %1209 }
 0x2e5   : > { %3866 = vmatprep.subr.msk.bf16.mxu1 %vm611_vm1, %v1210_v22  ;;  %v1232_v59 = vsel %vm611_vm1, %v1210_v22, 0 }
 0x2e8   : > { %v4674_v18 = vpop.permute.xlu1 %1096 }
 0x2ea   : > { %3649 = vmatpush3.bf16.xpose.msra.mxu1 %v1232_v59 }
 0x398   : > { %v3590_v16 = vpop.f32.mrb[0].mxu1 }
 0x399   : > { %v4604_v58 = vmul.f32 0.35355338, %v3590_v16  ;;  %v670_v52 = vpop.f32.mrb[1].mxu1 }
 0x39a   : > { %v4606_v29 = vmul.f32 0.35355338, %v670_v52  ;;  %v3591_v27 = vpop.f32.mrb[2].mxu1 }
 0x39b   : > { %v4608_v30 = vmul.f32 0.35355338, %v3591_v27  ;;  %v673_v31 = vpop.f32.mrb[3].mxu1  ;;  %v825_v0 = vsel %vm818_vm2, %v4604_v58, -inf }
 0x39c   : > { %826 = vmax.xlane.f32.xlu0 %v825_v0  ;;  %v819_v32 = vsel %vm818_vm2, %v4606_v29, -inf  ;;  %v4614_v33 = vmul.f32 0.35355338, %v673_v31 }
 0x39d   : > { %820 = vmax.xlane.f32.xlu1 %v819_v32  ;;  %v828_v35 = vsel %vm818_vm2, %v4608_v30, -inf }
 0x39e   : > { %v822_v42 = vsel %vm818_vm2, %v4614_v33, -inf }
 0x3a0   : > { %829 = vmax.xlane.f32.xlu0 %v828_v35  ;;  %v3594_v38 = vpop.f32.mrb[4].mxu1 }
 0x3a1   : > { %v4618_v40 = vmul.f32 0.35355338, %v3594_v38  ;;  %v686_v41 = vpop.f32.mrb[5].mxu1 }
 0x3a2   : > { %v3595_v1 = vpop.f32.mrb[6].mxu1  ;;  %v4622_v43 = vmul.f32 0.35355338, %v686_v41 }
 0x3a3   : > { %v4624_v10 = vmul.f32 0.35355338, %v3595_v1  ;;  %v689_v48 = vpop.f32.mrb[7].mxu1  ;;  %v837_v49 = vsel %vm818_vm2, %v4618_v40, -inf }
 0x3a4   : > { %823 = vmax.xlane.f32.xlu0 %v822_v42  ;;  %838 = vmax.xlane.f32.xlu1 %v837_v49  ;;  %v4628_v50 = vmul.f32 0.35355338, %v689_v48  ;;  %v831_v51 = vsel %vm818_vm2, %v4622_v43, -inf }
 0x3a5   : > { %v840_v28 = vsel %vm818_vm2, %v4624_v10, -inf }
 0x3a6   : > { %v834_v60 = vsel %vm818_vm2, %v4628_v50, -inf }
 0x3a8   : > { %v3606_v11 = vpop.f32.mrb[16].mxu0  ;;  %832 = vmax.xlane.f32.xlu1 %v831_v51  ;;  %841 = vmax.xlane.f32.xlu0 %v840_v28 }
 0x3a9   : > { %v4634_v53 = vmul.f32 0.35355338, %v3606_v11  ;;  %v771_v56 = vpop.f32.mrb[17].mxu0 }
 0x3aa   : > { %v3607_v36 = vpop.f32.mrb[18].mxu0  ;;  %v4638_v44 = vmul.f32 0.35355338, %v771_v56 }
 0x3ab   : > { %v4640_v61 = vmul.f32 0.35355338, %v3607_v36  ;;  %v774_v37 = vpop.f32.mrb[19].mxu0  ;;  %v849_v62 = vsel %vm818_vm2, %v4634_v53, -inf }
 0x3ac   : > { %850 = vmax.xlane.f32.xlu1 %v849_v62  ;;  %835 = vmax.xlane.f32.xlu0 %v834_v60  ;;  %v4644_v17 = vmul.f32 0.35355338, %v774_v37  ;;  %v843_v63 = vsel %vm818_vm2, %v4638_v44, -inf }
 0x3ad   : > { %v852_v2 = vsel %vm818_vm2, %v4640_v61, -inf }
 0x3ae   : > { %v846_v7 = vsel %vm818_vm2, %v4644_v17, -inf }
 0x3b0   : > { %v3610_v3 = vpop.f32.mrb[20].mxu0  ;;  %844 = vmax.xlane.f32.xlu1 %v843_v63  ;;  %853 = vmax.xlane.f32.xlu0 %v852_v2 }
 0x3b1   : > { %v787_v4 = vpop.f32.mrb[21].mxu0  ;;  %v4656_v45 = vmul.f32 0.35355338, %v3610_v3 }
 0x3b2   : > { %v3611_v5 = vpop.f32.mrb[22].mxu0  ;;  %v4658_v21 = vmul.f32 0.35355338, %v787_v4 }
 0x3b3   : > { %v790_v6 = vpop.f32.mrb[23].mxu0  ;;  %v4660_v8 = vmul.f32 0.35355338, %v3611_v5  ;;  %v861_v9 = vsel %vm818_vm2, %v4656_v45, -inf }
 0x3b4   : > { %847 = vmax.xlane.f32.xlu0 %v846_v7  ;;  %v4664_v39 = vmul.f32 0.35355338, %v790_v6  ;;  %v855_v13 = vsel %vm818_vm2, %v4658_v21, -inf }
 0x3b5   : > { %v864_v14 = vsel %vm818_vm2, %v4660_v8, -inf }
 0x3b6   : > { %v858_v54 = vsel %vm818_vm2, %v4664_v39, -inf }
 0x3c1   : > { %1211 = vrot.lane.b32.xlu1 %v4515_v34, %s4213_s27 }
 0x3ca   : > { %1310 = vrot.lane.b32.xlu0 %v4529_v24, %s4213_s27 }
 0x3e5   : > { %862 = vmax.xlane.f32.xlu1 %v861_v9 }
 0x3e9   : > { %856 = vmax.xlane.f32.xlu1 %v855_v13  ;;  %865 = vmax.xlane.f32.xlu0 %v864_v14 }
 0x3ed   : > { %859 = vmax.xlane.f32.xlu0 %v858_v54 }
 0x3fa   : > { %1312 = vrot.lane.b32.xlu1 %v4527_v46, %s4213_s27 }
 0x429   : > { %v827_v19 = vpop.xlane.xlu0 %826 }
 0x42a   : > { %v869_v22 = vsub.f32 %v4604_v58, %v827_v19  ;;  %v821_v59 = vpop.xlane.xlu1 %820 }
 0x42b   : > { %v867_v16 = vsub.f32 %v4606_v29, %v821_v59 }
 0x42c   : > { %v887_v52 = vmul.f32 1.442695, %v869_v22 }
 0x42d   : > { %v883_v27 = vmul.f32 1.442695, %v867_v16  ;;  %v830_v31 = vpop.xlane.xlu0 %829 }
 0x42e   : > { %3945 = vpow2.f32 %v887_v52  ;;  %v870_v0 = vsub.f32 %v4608_v30, %v830_v31 }
 0x42f   : > { %3947 = vpow2.f32 %v883_v27 }
 0x430   : > { %v889_v32 = vmul.f32 1.442695, %v870_v0 }
 0x431   : > { %v824_v35 = vpop.xlane.xlu0 %823  ;;  %v839_v38 = vpop.xlane.xlu1 %838 }
 0x432   : > { %3949 = vpow2.f32 %v889_v32  ;;  %v868_v41 = vsub.f32 %v4614_v33, %v824_v35  ;;  %v873_v1 = vsub.f32 %v4618_v40, %v839_v38 }
 0x434   : > { %v885_v42 = vmul.f32 1.442695, %v868_v41  ;;  %v895_v58 = vmul.f32 1.442695, %v873_v1 }
 0x435   : > { %v833_v48 = vpop.xlane.xlu1 %832  ;;  %v842_v49 = vpop.xlane.xlu0 %841 }
 0x436   : > { %3951 = vpow2.f32 %v885_v42  ;;  %v871_v29 = vsub.f32 %v4622_v43, %v833_v48  ;;  %v874_v51 = vsub.f32 %v4624_v10, %v842_v49 }
 0x437   : > { %3953 = vpow2.f32 %v895_v58 }
 0x438   : > { %v4683_v28 = vpop.eup %3945  ;;  %v891_v30 = vmul.f32 1.442695, %v871_v29  ;;  %v897_v11 = vmul.f32 1.442695, %v874_v51 }
 0x439   : > { %v851_v56 = vpop.xlane.xlu1 %850  ;;  %v836_v36 = vpop.xlane.xlu0 %835  ;;  %v921_v33 = vsel %vm818_vm2, %v4683_v28, 0.0 }
 0x43a   : > { %v4687_v40 = vpop.eup %3947  ;;  %3955 = vpow2.f32 %v891_v30  ;;  %v872_v60 = vsub.f32 %v4628_v50, %v836_v36  ;;  %922 = vadd.xlane.f32.xlu1 %v921_v33  ;;  %v877_v43 = vsub.f32 %v4634_v53, %v851_v56 }
 0x43b   : > { %3957 = vpow2.f32 %v897_v11  ;;  %v915_v2 = vsel %vm818_vm2, %v4687_v40, 0.0 }
 0x43c   : > { %v4690_v37 = vpop.eup %3949  ;;  %v893_v10 = vmul.f32 1.442695, %v872_v60  ;;  %v903_v5 = vmul.f32 1.442695, %v877_v43 }
 0x43d   : > { %v845_v62 = vpop.xlane.xlu1 %844  ;;  %v854_v63 = vpop.xlane.xlu0 %853  ;;  %v924_v3 = vsel %vm818_vm2, %v4690_v37, 0.0 }
 0x43e   : > { %v875_v4 = vsub.f32 %v4638_v44, %v845_v62  ;;  %916 = vadd.xlane.f32.xlu1 %v915_v2  ;;  %925 = vadd.xlane.f32.xlu0 %v924_v3  ;;  %3959 = vpow2.f32 %v893_v10  ;;  %v878_v53 = vsub.f32 %v4640_v61, %v854_v63 }
 0x440   : > { %v4698_v50 = vpop.eup %3951  ;;  %v899_v6 = vmul.f32 1.442695, %v875_v4  ;;  %v905_v19 = vmul.f32 1.442695, %v878_v53 }
 0x441   : > { %v1212_v7 = vpop.permute.xlu1 %1211  ;;  %v848_v9 = vpop.xlane.xlu0 %847  ;;  %v918_v13 = vsel %vm818_vm2, %v4698_v50, 0.0 }
 0x442   : > { %v4703_v14 = vpop.eup %3953  ;;  %3961 = vpow2.f32 %v899_v6  ;;  %3867 = vmatprep.subr.msk.bf16.mxu1 %vm611_vm1, %v1212_v7  ;;  %919 = vadd.xlane.f32.xlu0 %v918_v13  ;;  %v1235_v44 = vsel %vm611_vm1, %v1212_v7, 0  ;;  %v876_v61 = vsub.f32 %v4644_v17, %v848_v9 }
 0x443   : > { %3651 = vmatpush3.bf16.xpose.msra.mxu1 %v1235_v44  ;;  %3963 = vpow2.f32 %v903_v5  ;;  %v933_v59 = vsel %vm818_vm2, %v4703_v14, 0.0 }
 0x444   : > { %v4707_v54 = vpop.eup %3955  ;;  %3965 = vpow2.f32 %v905_v19  ;;  %v901_v52 = vmul.f32 1.442695, %v876_v61 }
 0x445   : > { %v927_v22 = vsel %vm818_vm2, %v4707_v54, 0.0  ;;  %v4714_v16 = vpop.eup %3957  ;;  %v4742_v49 = vpop.permute.xlu0 %1310 }
 0x446   : > { %928 = vadd.xlane.f32.xlu1 %v927_v22  ;;  %934 = vadd.xlane.f32.xlu0 %v933_v59  ;;  %v936_v27 = vsel %vm818_vm2, %v4714_v16, 0.0  ;;  %3967 = vpow2.f32 %v901_v52 }
 0x448   : > { %v4718_v31 = vpop.eup %3959 }
 0x449   : > { %v930_v32 = vsel %vm818_vm2, %v4718_v31, 0.0 }
 0x44a   : > { %937 = vadd.xlane.f32.xlu0 %v936_v27 }
 0x44c   : > { %v4720_v0 = vpop.eup %3961 }
 0x44d   : > { %v939_v17 = vsel %vm818_vm2, %v4720_v0, 0.0  ;;  %v4726_v35 = vpop.eup %3963 }
 0x44e   : > { %940 = vadd.xlane.f32.xlu1 %v939_v17  ;;  %931 = vadd.xlane.f32.xlu0 %v930_v32  ;;  %v945_v38 = vsel %vm818_vm2, %v4726_v35, 0.0  ;;  %v4730_v41 = vpop.eup %3965 }
 0x44f   : > { %v948_v1 = vsel %vm818_vm2, %v4730_v41, 0.0 }
 0x450   : > { %v4734_v42 = vpop.eup %3967 }
 0x451   : > { %v942_v58 = vsel %vm818_vm2, %v4734_v42, 0.0 }
 0x452   : > { %946 = vadd.xlane.f32.xlu0 %v945_v38 }
 0x456   : > { %949 = vadd.xlane.f32.xlu0 %v948_v1 }
 0x45a   : > { %943 = vadd.xlane.f32.xlu0 %v942_v58 }
 0x45f   : > { %1197 = vrot.lane.b32.xlu1 %v4503_v55, %s4214_s28 }
 0x470   : > { %1199 = vrot.lane.b32.xlu0 %v4501_v26, %s4214_s28 }
 0x472   : > { %v863_v48 = vpop.xlane.xlu1 %862 }
 0x473   : > { %v881_v11 = vsub.f32 %v4656_v45, %v863_v48 }
 0x475   : > { %v911_v36 = vmul.f32 1.442695, %v881_v11 }
 0x476   : > { %v857_v29 = vpop.xlane.xlu1 %856  ;;  %v866_v30 = vpop.xlane.xlu0 %865 }
 0x477   : > { %v879_v51 = vsub.f32 %v4658_v21, %v857_v29  ;;  %v882_v33 = vsub.f32 %v4660_v8, %v866_v30 }
 0x479   : > { %v907_v56 = vmul.f32 1.442695, %v879_v51  ;;  %v913_v43 = vmul.f32 1.442695, %v882_v33 }
 0x47a   : > { %v860_v60 = vpop.xlane.xlu0 %859  ;;  %v4780_v5 = vpop.permute.xlu1 %1312 }
 0x47b   : > { %3969 = vpow2.f32 %v907_v56  ;;  %v880_v10 = vsub.f32 %v4664_v39, %v860_v60 }
 0x47c   : > { %3971 = vpow2.f32 %v911_v36 }
 0x47d   : > { %3973 = vpow2.f32 %v913_v43  ;;  %v909_v63 = vmul.f32 1.442695, %v880_v10 }
 0x47f   : > { %3975 = vpow2.f32 %v909_v63 }
 0x485   : > { %v4748_v62 = vpop.eup %3969 }
 0x486   : > { %v951_v21 = vsel %vm818_vm2, %v4748_v62, 0.0  ;;  %v4752_v45 = vpop.eup %3971 }
 0x487   : > { %952 = vadd.xlane.f32.xlu1 %v951_v21  ;;  %v957_v2 = vsel %vm818_vm2, %v4752_v45, 0.0  ;;  %v4756_v8 = vpop.eup %3973 }
 0x488   : > { %v960_v39 = vsel %vm818_vm2, %v4756_v8, 0.0 }
 0x489   : > { %v4760_v3 = vpop.eup %3975 }
 0x48a   : > { %v954_v4 = vsel %vm818_vm2, %v4760_v3, 0.0 }
 0x48f   : > { %958 = vadd.xlane.f32.xlu0 %v957_v2 }
 0x493   : > { %961 = vadd.xlane.f32.xlu0 %v960_v39 }
 0x497   : > { %955 = vadd.xlane.f32.xlu0 %v954_v4 }
 0x498   : > { %1314 = vrot.lane.b32.xlu1 %v4543_v23, %s4213_s27 }
 0x49c   : > { %1302 = vrot.lane.b32.xlu1 %v4529_v24, %s4214_s28 }
 0x4a0   : > { %1201 = vrot.lane.b32.xlu1 %v4517_v20, %s4214_s28 }
 0x4a4   : > { %1306 = vrot.lane.b32.xlu1 %v4543_v23, %s4214_s28 }
 0x4ad   : > { %1316 = vrot.lane.b32.xlu0 %v4541_v57, %s4213_s27 }
 0x4b1   : > { %1304 = vrot.lane.b32.xlu0 %v4527_v46, %s4214_s28 }
 0x4b5   : > { %1203 = vrot.lane.b32.xlu0 %v4515_v34, %s4214_s28 }
 0x4b9   : > { %1308 = vrot.lane.b32.xlu0 %v4541_v57, %s4214_s28 }
 0x4c7   : > { %v923_v6 = vpop.xlane.xlu1 %922 }
 0x4cb   : > { %v917_v53 = vpop.xlane.xlu1 %916  ;;  %v926_v7 = vpop.xlane.xlu0 %925 }
 0x4cc   : > { %3977 = vrcp.f32 %v926_v7 }
 0x4cd   : > { %3979 = vrcp.f32 %v917_v53 }
 0x4ce   : > { %3981 = vrcp.f32 %v923_v6 }
 0x4cf   : > { %v920_v9 = vpop.xlane.xlu0 %919 }
 0x4d0   : > { %3983 = vrcp.f32 %v920_v9 }
 0x4d3   : > { %v935_v13 = vpop.xlane.xlu0 %934  ;;  %v929_v19 = vpop.xlane.xlu1 %928 }
 0x4d6   : > { %v3978_v44 = vpop.eup %3977 }
 0x4d7   : > { %v938_v61 = vpop.xlane.xlu0 %937  ;;  %v3980_v22 = vpop.eup %3979  ;;  %v982_v27 = vmul.f32 %v3978_v44, %v4690_v37 }
 0x4d8   : > { %v3982_v59 = vpop.eup %3981  ;;  %3985 = vrcp.f32 %v938_v61  ;;  %v979_v38 = vmul.f32 %v3980_v22, %v4687_v40 }
 0x4d9   : > { %3987 = vrcp.f32 %v929_v19  ;;  %v981_v58 = vmul.f32 %v3982_v59, %v4683_v28 }
 0x4da   : > { %v3984_v52 = vpop.eup %3983  ;;  %3989 = vrcp.f32 %v935_v13 }
 0x4db   : > { %v941_v17 = vpop.xlane.xlu1 %940  ;;  %v932_v32 = vpop.xlane.xlu0 %931  ;;  %v980_v1 = vmul.f32 %v3984_v52, %v4698_v50  ;;  %v996_v29 = vpack.c.bf16 %v982_v27, %v981_v58 }
 0x4dc   : > { %3991 = vrcp.f32 %v932_v32 }
 0x4dd   : > { %v995_v48 = vpack.c.bf16 %v980_v1, %v979_v38 }
 0x4df   : > { %v1198_v51 = vpop.permute.xlu1 %1197  ;;  %3620 = vmatprep.mubr.msk.bf16.mxu0 %vm818_vm2, %v995_v48  ;;  %v947_v30 = vpop.xlane.xlu0 %946 }
 0x4e0   : > { %3621 = vmatmul.mubr.msk.bf16.vlgmr.msra.gmra.mrb[24].mxu0 %vm818_vm2, %v996_v29  ;;  %3652 = vmatprep.mubr.msk.bf16.mxu1 %vm611_vm1, %v1198_v51 }
 0x4e1   : > { %3629 = vmatpush3.bf16.msra.mxu0 %v4599_v25 }
 0x4e2   : > { %3630 = vmatprep.subr.bf16.mxu0 %v4585_v12  ;;  %v3986_v37 = vpop.eup %3985 }
 0x4e3   : > { %v950_v40 = vpop.xlane.xlu0 %949  ;;  %v3988_v50 = vpop.eup %3987  ;;  %v986_v36 = vmul.f32 %v3986_v37, %v4714_v16 }
 0x4e4   : > { %3993 = vrcp.f32 %v950_v40  ;;  %v3990_v28 = vpop.eup %3989  ;;  %v983_v25 = vmul.f32 %v3988_v50, %v4707_v54 }
 0x4e5   : > { %3631 = vmatpush3.bf16.msra.mxu0 %v4585_v12  ;;  %3995 = vrcp.f32 %v941_v17  ;;  %v985_v60 = vmul.f32 %v3990_v28, %v4703_v14 }
 0x4e6   : > { %3632 = vmatprep.subr.bf16.mxu0 %v4674_v18  ;;  %v3992_v11 = vpop.eup %3991  ;;  %3997 = vrcp.f32 %v947_v30 }
 0x4e7   : > { %v944_v56 = vpop.xlane.xlu0 %943  ;;  %v984_v33 = vmul.f32 %v3992_v11, %v4718_v31  ;;  %v998_v10 = vpack.c.bf16 %v986_v36, %v985_v60 }
 0x4e8   : > { %3999 = vrcp.f32 %v944_v56 }
 0x4e9   : > { %3633 = vmatpush3.bf16.msra.mxu0 %v4674_v18  ;;  %v997_v12 = vpack.c.bf16 %v984_v33, %v983_v25 }
 0x4ea   : > { %3634 = vmatprep.subr.bf16.mxu0 %v4593_v15 }
 0x4eb   : > { %v1200_v43 = vpop.permute.xlu0 %1199  ;;  %3624 = vmatprep.mubr.msk.bf16.mxu0 %vm818_vm2, %v997_v12 }
 0x4ec   : > { %3653 = vmatmul.mubr.msk.bf16.vlgmr.msra.gmra.mrb[8].mxu1 %vm611_vm1, %v1200_v43  ;;  %3625 = vmatmul.mubr.msk.bf16.gmra.mrb[28].mxu0 %vm818_vm2, %v998_v10 }
 0x4ed   : > { %3635 = vmatpush3.bf16.msra.mxu0 %v4593_v15  ;;  %v1331_v15 = vsel %vm611_vm1, %v4742_v49, 0 }
 0x4ee   : > { %v3994_v54 = vpop.eup %3993  ;;  %3868 = vmatprep.subr.msk.bf16.mxu0 %vm611_vm1, %v4742_v49 }
 0x4ef   : > { %v3996_v18 = vpop.eup %3995  ;;  %v990_v31 = vmul.f32 %v3994_v54, %v4730_v41 }
 0x4f0   : > { %v3998_v16 = vpop.eup %3997  ;;  %v987_v63 = vmul.f32 %v3996_v18, %v4720_v0  ;;  %v1334_v0 = vsel %vm611_vm1, %v4780_v5, 0 }
 0x4f1   : > { %v989_v2 = vmul.f32 %v3998_v16, %v4726_v35 }
 0x4f2   : > { %v4000_v14 = vpop.eup %3999 }
 0x4f3   : > { %v988_v21 = vmul.f32 %v4000_v14, %v4734_v42  ;;  %v1000_v4 = vpack.c.bf16 %v990_v31, %v989_v2 }
 0x4f5   : > { %v999_v39 = vpack.c.bf16 %v988_v21, %v987_v63 }
 0x4f7   : > { %3636 = vmatprep.mubr.msk.bf16.mxu0 %vm818_vm2, %v999_v39 }
 0x4f8   : > { %3637 = vmatmul.mubr.msk.bf16.vlgmr.msra.gmra.mrb[32].mxu0 %vm818_vm2, %v1000_v4 }
 0x4f9   : > { %3661 = vmatpush3.bf16.xpose.msra.mxu0 %v1331_v15 }
 0x4fa   : > { %3869 = vmatprep.subr.msk.bf16.mxu0 %vm611_vm1, %v4780_v5 }
 0x501   : > { %3663 = vmatpush3.bf16.xpose.msra.mxu0 %v1334_v0 }
 0x514   : > { %v953_v41 = vpop.xlane.xlu1 %952 }
 0x518   : > { %v1315_v42 = vpop.permute.xlu1 %1314 }
 0x519   : > { %3870 = vmatprep.subr.msk.bf16.mxu0 %vm611_vm1, %v1315_v42  ;;  %v1337_v35 = vsel %vm611_vm1, %v1315_v42, 0 }
 0x51a   : > { %3665 = vmatpush3.bf16.xpose.msra.mxu0 %v1337_v35 }
 0x51c   : > { %v1303_v6 = vpop.permute.xlu1 %1302  ;;  %v959_v53 = vpop.xlane.xlu0 %958 }
 0x520   : > { %v1202_v7 = vpop.permute.xlu1 %1201  ;;  %v962_v9 = vpop.xlane.xlu0 %961 }
 0x521   : > { %3656 = vmatprep.mubr.msk.bf16.mxu1 %vm611_vm1, %v1202_v7  ;;  %4001 = vrcp.f32 %v962_v9 }
 0x522   : > { %4003 = vrcp.f32 %v953_v41 }
 0x523   : > { %4005 = vrcp.f32 %v959_v53 }
 0x524   : > { %v956_v49 = vpop.xlane.xlu0 %955  ;;  %v1307_v48 = vpop.permute.xlu1 %1306 }
 0x525   : > { %4007 = vrcp.f32 %v956_v49 }
 0x528   : > { %v1317_v5 = vpop.permute.xlu0 %1316 }
 0x529   : > { %3871 = vmatprep.subr.msk.bf16.mxu0 %vm611_vm1, %v1317_v5  ;;  %v1340_v13 = vsel %vm611_vm1, %v1317_v5, 0 }
 0x52a   : > { %3667 = vmatpush3.bf16.xpose.msra.mxu0 %v1340_v13 }
 0x52b   : > { %v4002_v44 = vpop.eup %4001 }
 0x52c   : > { %v1305_v19 = vpop.permute.xlu0 %1304  ;;  %v4004_v61 = vpop.eup %4003  ;;  %v994_v52 = vmul.f32 %v4002_v44, %v4756_v8 }
 0x52d   : > { %v4006_v22 = vpop.eup %4005  ;;  %v991_v17 = vmul.f32 %v4004_v61, %v4748_v62 }
 0x52e   : > { %v993_v38 = vmul.f32 %v4006_v22, %v4752_v45 }
 0x52f   : > { %v4008_v59 = vpop.eup %4007 }
 0x530   : > { %v1204_v27 = vpop.permute.xlu0 %1203  ;;  %v992_v32 = vmul.f32 %v4008_v59, %v4760_v3  ;;  %v1002_v58 = vpack.c.bf16 %v994_v52, %v993_v38 }
 0x531   : > { %3657 = vmatmul.mubr.msk.bf16.gmra.mrb[12].mxu1 %vm611_vm1, %v1204_v27 }
 0x532   : > { %v1001_v1 = vpack.c.bf16 %v992_v32, %v991_v17 }
 0x534   : > { %3640 = vmatprep.mubr.msk.bf16.mxu0 %vm818_vm2, %v1001_v1  ;;  %v1309_v62 = vpop.permute.xlu0 %1308 }
 0x535   : > { %3641 = vmatmul.mubr.msk.bf16.gmra.mrb[36].mxu0 %vm818_vm2, %v1002_v58 }
 0x536   : > { %3668 = vmatprep.mubr.msk.bf16.mxu0 %vm611_vm1, %v1303_v6 }
 0x53d   : > { %3669 = vmatmul.mubr.msk.bf16.vlgmr.msra.gmra.mrb[40].mxu0 %vm611_vm1, %v1305_v19 }
 0x53e   : > { %3672 = vmatprep.mubr.msk.bf16.mxu0 %vm611_vm1, %v1307_v48 }
 0x545   : > { %3673 = vmatmul.mubr.msk.bf16.gmra.mrb[44].mxu0 %vm611_vm1, %v1309_v62 }
 0x5b3   : > { %v3622_v8 = vpop.f32.mrb[24].mxu0 }
 0x5b4   : > { %v1061_v3 = vpop.f32.mrb[25].mxu0 }
 0x5b5   : > { %v3623_v29 = vpop.f32.mrb[26].mxu0 }
 0x5b6   : > { %v1182_v45 = vpack.c.bf16 %v3623_v29, %v3622_v8  ;;  %v1064_v51 = vpop.f32.mrb[27].mxu0 }
 0x5b7   : > { %v1181_v30 = vpack.c.bf16 %v1064_v51, %v1061_v3 }
 0x5b8   : > { %1190 = vst.msk [vmem:[#allocation2 + $0x8] sm:$0xff] %vm611_vm1, %v1182_v45 }
 0x5b9   : > { %1189 = vst.msk [vmem:[#allocation2] sm:$0xff] %vm611_vm1, %v1181_v30 }
 0x5bf   : > { %v3654_v40 = vpop.f32.mrb[8].mxu1  ;;  %v3626_v37 = vpop.f32.mrb[28].mxu0 }
 0x5c0   : > { %v1271_v50 = vpop.f32.mrb[9].mxu1  ;;  %v1077_v28 = vpop.f32.mrb[29].mxu0  ;;  %v4841_v54 = vmul.f32 0.35355338, %v3654_v40 }
 0x5c1   : > { %v4835_v11 = vmul.f32 0.35355338, %v1271_v50  ;;  %v3655_v56 = vpop.f32.mrb[10].mxu1  ;;  %v3627_v36 = vpop.f32.mrb[30].mxu0 }
 0x5c2   : > { %v1274_v25 = vpop.f32.mrb[11].mxu1  ;;  %v1184_v33 = vpack.c.bf16 %v3627_v36, %v3626_v37  ;;  %v1080_v60 = vpop.f32.mrb[31].mxu0  ;;  %v4847_v16 = vmul.f32 0.35355338, %v3655_v56  ;;  %v1429_v14 = vsel %vm818_vm2, %v4841_v54, -inf }
 0x5c3   : > { %v4837_v12 = vmul.f32 0.35355338, %v1274_v25  ;;  %v1423_v43 = vsel %vm818_vm2, %v4835_v11, -inf  ;;  %v1183_v10 = vpack.c.bf16 %v1080_v60, %v1077_v28 }
 0x5c4   : > { %1424 = vmax.xlane.f32.xlu1 %v1423_v43  ;;  %1192 = vst.msk [vmem:[#allocation2 + $0x18] sm:$0xff] %vm611_vm1, %v1184_v33  ;;  %v1432_v2 = vsel %vm818_vm2, %v4847_v16, -inf }
 0x5c5   : > { %v1426_v18 = vsel %vm818_vm2, %v4837_v12, -inf  ;;  %1191 = vst.msk [vmem:[#allocation2 + $0x10] sm:$0xff] %vm611_vm1, %v1183_v10 }
 0x5c6   : > { %1427 = vmax.xlane.f32.xlu0 %v1426_v18 }
 0x5ca   : > { %1430 = vmax.xlane.f32.xlu0 %v1429_v14 }
 0x5cb   : > { %v3638_v31 = vpop.f32.mrb[32].mxu0 }
 0x5cc   : > { %v1150_v63 = vpop.f32.mrb[33].mxu0 }
 0x5cd   : > { %v3639_v21 = vpop.f32.mrb[34].mxu0 }
 0x5ce   : > { %v1186_v39 = vpack.c.bf16 %v3639_v21, %v3638_v31  ;;  %v1153_v4 = vpop.f32.mrb[35].mxu0  ;;  %1433 = vmax.xlane.f32.xlu0 %v1432_v2 }
 0x5cf   : > { %v1185_v15 = vpack.c.bf16 %v1153_v4, %v1150_v63 }
 0x5d0   : > { %1194 = vst.msk [vmem:[#allocation2 + $0x28] sm:$0xff] %vm611_vm1, %v1186_v39 }
 0x5d1   : > { %1193 = vst.msk [vmem:[#allocation2 + $0x20] sm:$0xff] %vm611_vm1, %v1185_v15 }
 0x604   : > { %v3658_v0 = vpop.f32.mrb[12].mxu1 }
 0x605   : > { %v1287_v41 = vpop.f32.mrb[13].mxu1  ;;  %v4857_v53 = vmul.f32 0.35355338, %v3658_v0 }
 0x606   : > { %v4855_v42 = vmul.f32 0.35355338, %v1287_v41  ;;  %v3659_v35 = vpop.f32.mrb[14].mxu1 }
 0x607   : > { %v1290_v6 = vpop.f32.mrb[15].mxu1  ;;  %v4863_v13 = vmul.f32 0.35355338, %v3659_v35  ;;  %v1441_v52 = vsel %vm818_vm2, %v4857_v53, -inf }
 0x608   : > { %v4859_v7 = vmul.f32 0.35355338, %v1290_v6  ;;  %v3642_v9 = vpop.f32.mrb[36].mxu0  ;;  %v1435_v49 = vsel %vm818_vm2, %v4855_v42, -inf }
 0x609   : > { %v1166_v5 = vpop.f32.mrb[37].mxu0  ;;  %1436 = vmax.xlane.f32.xlu1 %v1435_v49  ;;  %v1444_v27 = vsel %vm818_vm2, %v4863_v13, -inf }
 0x60a   : > { %v3643_v44 = vpop.f32.mrb[38].mxu0  ;;  %v1438_v19 = vsel %vm818_vm2, %v4859_v7, -inf }
 0x60b   : > { %v1188_v61 = vpack.c.bf16 %v3643_v44, %v3642_v9  ;;  %v1169_v22 = vpop.f32.mrb[39].mxu0  ;;  %1439 = vmax.xlane.f32.xlu0 %v1438_v19 }
 0x60c   : > { %v1187_v59 = vpack.c.bf16 %v1169_v22, %v1166_v5 }
 0x60d   : > { %1196 = vst.msk [vmem:[#allocation2 + $0x38] sm:$0xff] %vm611_vm1, %v1188_v61  ;;  %1442 = vmax.xlane.f32.xlu1 %v1441_v52 }
 0x60e   : > { %1195 = vst.msk [vmem:[#allocation2 + $0x30] sm:$0xff] %vm611_vm1, %v1187_v59 }
 0x60f   : > { %1445 = vmax.xlane.f32.xlu0 %v1444_v27 }
 0x610   : > { %v4873_v17 = vpop.f32.mrb[40].mxu0 }
 0x611   : > { %v4875_v32 = vpop.f32.mrb[41].mxu0 }
 0x612   : > { %v4877_v38 = vpop.f32.mrb[42].mxu0 }
 0x613   : > { %v4879_v1 = vpop.f32.mrb[43].mxu0  ;;  %v4930_v5 = vmul.f32 0.35355338, %v4877_v38 }
 0x614   : > { %v4943_v52 = vmul.f32 0.35355338, %v4879_v1 }
 0x615   : > { %v1456_v27 = vsel %vm818_vm2, %v4930_v5, -inf }
 0x618   : > { %v4881_v58 = vpop.f32.mrb[44].mxu0 }
 0x619   : > { %v4883_v48 = vpop.f32.mrb[45].mxu0 }
 0x61a   : > { %v4885_v62 = vpop.f32.mrb[46].mxu0 }
 0x61b   : > { %v4887_v8 = vpop.f32.mrb[47].mxu0  ;;  %v4954_v1 = vmul.f32 0.35355338, %v4885_v62 }
 0x61d   : > { %v1468_v62 = vsel %vm818_vm2, %v4954_v1, -inf }
 0x61e   : > { %1607 = vrot.lane.b32.xlu1 %v4503_v55, %s4215_s29 }
 0x622   : > { %1611 = vrot.lane.b32.xlu1 %v4517_v20, %s4215_s29 }
 0x625   : > { %1609 = vrot.lane.b32.xlu0 %v4501_v26, %s4215_s29 }
 0x626   : > { %1696 = vrot.lane.b32.xlu1 %v4529_v24, %s4215_s29 }
 0x629   : > { %1613 = vrot.lane.b32.xlu0 %v4515_v34, %s4215_s29 }
 0x62a   : > { %1842 = vrot.lane.b32.xlu1 %v4503_v55, %s4216_s30 }
 0x62d   : > { %1698 = vrot.lane.b32.xlu0 %v4527_v46, %s4215_s29 }
 0x62e   : > { %1700 = vrot.lane.b32.xlu1 %v4543_v23, %s4215_s29 }
 0x631   : > { %1844 = vrot.lane.b32.xlu0 %v4501_v26, %s4216_s30 }
 0x632   : > { %1702 = vrot.lane.b32.xlu1 %v4541_v57, %s4215_s29 }
 0x636   : > { %1846 = vrot.lane.b32.xlu1 %v4517_v20, %s4216_s30 }
 0x651   : > { %v1425_v3 = vpop.xlane.xlu1 %1424 }
 0x652   : > { %v1471_v45 = vsub.f32 %v4835_v11, %v1425_v3 }
 0x653   : > { %v1428_v29 = vpop.xlane.xlu0 %1427 }
 0x654   : > { %v1487_v40 = vmul.f32 1.442695, %v1471_v45  ;;  %v1472_v37 = vsub.f32 %v4837_v12, %v1428_v29  ;;  %v1450_v45 = vsel %vm818_vm2, %v4943_v52, -inf }
 0x656   : > { %v1489_v36 = vmul.f32 1.442695, %v1472_v37  ;;  %v4964_v37 = vmul.f32 0.35355338, %v4887_v8 }
 0x657   : > { %v1431_v51 = vpop.xlane.xlu0 %1430 }
 0x658   : > { %v1473_v30 = vsub.f32 %v4841_v54, %v1431_v51  ;;  %v4959_v51 = vmul.f32 0.35355338, %v4873_v17 }
 0x65a   : > { %v1491_v50 = vmul.f32 1.442695, %v1473_v30  ;;  %v1453_v17 = vsel %vm818_vm2, %v4959_v51, -inf }
 0x65b   : > { %v1434_v28 = vpop.xlane.xlu0 %1433 }
 0x65c   : > { %4009 = vpow2.f32 %v1491_v50  ;;  %v1474_v56 = vsub.f32 %v4847_v16, %v1434_v28  ;;  %v4969_v50 = vmul.f32 0.35355338, %v4875_v32  ;;  %v1462_v28 = vsel %vm818_vm2, %v4964_v37, -inf }
 0x65d   : > { %4011 = vpow2.f32 %v1487_v40 }
 0x65e   : > { %v1493_v25 = vmul.f32 1.442695, %v1474_v56  ;;  %v4976_v56 = vmul.f32 0.35355338, %v4881_v58  ;;  %v1447_v8 = vsel %vm818_vm2, %v4969_v50, -inf }
 0x660   : > { %4013 = vpow2.f32 %v1493_v25  ;;  %v1465_v32 = vsel %vm818_vm2, %v4976_v56, -inf }
 0x661   : > { %4015 = vpow2.f32 %v1489_v36  ;;  %v4981_v36 = vmul.f32 0.35355338, %v4883_v48 }
 0x663   : > { %v1459_v25 = vsel %vm818_vm2, %v4981_v36, -inf }
 0x666   : > { %v4907_v33 = vpop.eup %4009 }
 0x667   : > { %v1525_v11 = vsel %vm818_vm2, %v4907_v33, 0.0  ;;  %v4911_v60 = vpop.eup %4011 }
 0x668   : > { %1526 = vadd.xlane.f32.xlu1 %v1525_v11  ;;  %v1519_v12 = vsel %vm818_vm2, %v4911_v60, 0.0 }
 0x66a   : > { %v4913_v43 = vpop.eup %4013 }
 0x66b   : > { %v1528_v10 = vsel %vm818_vm2, %v4913_v43, 0.0  ;;  %v4919_v54 = vpop.eup %4015 }
 0x66c   : > { %1520 = vadd.xlane.f32.xlu1 %v1519_v12  ;;  %1529 = vadd.xlane.f32.xlu0 %v1528_v10  ;;  %v1522_v18 = vsel %vm818_vm2, %v4919_v54, 0.0 }
 0x670   : > { %1523 = vadd.xlane.f32.xlu0 %v1522_v18 }
 0x696   : > { %v1437_v16 = vpop.xlane.xlu1 %1436 }
 0x697   : > { %v1475_v31 = vsub.f32 %v4855_v42, %v1437_v16 }
 0x698   : > { %v1440_v14 = vpop.xlane.xlu0 %1439 }
 0x699   : > { %v1476_v63 = vsub.f32 %v4859_v7, %v1440_v14  ;;  %v1495_v15 = vmul.f32 1.442695, %v1475_v31 }
 0x69a   : > { %v1443_v21 = vpop.xlane.xlu1 %1442 }
 0x69b   : > { %v1497_v2 = vmul.f32 1.442695, %v1476_v63  ;;  %v1477_v39 = vsub.f32 %v4857_v53, %v1443_v21 }
 0x69c   : > { %v1446_v4 = vpop.xlane.xlu0 %1445 }
 0x69d   : > { %4017 = vpow2.f32 %v1497_v2  ;;  %v1499_v0 = vmul.f32 1.442695, %v1477_v39  ;;  %v1478_v41 = vsub.f32 %v4863_v13, %v1446_v4 }
 0x69e   : > { %v1608_v35 = vpop.permute.xlu1 %1607 }
 0x69f   : > { %4019 = vpow2.f32 %v1499_v0  ;;  %3676 = vmatprep.subr.bf16.mxu1 %v1608_v35  ;;  %v1501_v9 = vmul.f32 1.442695, %v1478_v41 }
 0x6a0   : > { %3677 = vmatpush3.bf16.msra.mxu1 %v1608_v35  ;;  %v1610_v6 = vpop.permute.xlu0 %1609  ;;  %4021 = vpow2.f32 %v1495_v15 }
 0x6a1   : > { %3678 = vmatprep.subr.bf16.mxu1 %v1610_v6  ;;  %4023 = vpow2.f32 %v1501_v9 }
 0x6a2   : > { %v1612_v42 = vpop.permute.xlu1 %1611 }
 0x6a4   : > { %3679 = vmatpush3.bf16.msra.mxu1 %v1610_v6  ;;  %v1614_v7 = vpop.permute.xlu0 %1613 }
 0x6a5   : > { %3680 = vmatprep.subr.bf16.mxu1 %v1612_v42 }
 0x6a6   : > { %v1697_v53 = vpop.permute.xlu1 %1696 }
 0x6a7   : > { %v4927_v49 = vpop.eup %4017  ;;  %3692 = vmatprep.subr.bf16.mxu0 %v1697_v53 }
 0x6a8   : > { %3681 = vmatpush3.bf16.msra.mxu1 %v1612_v42  ;;  %3693 = vmatpush3.bf16.msra.mxu0 %v1697_v53  ;;  %v1699_v13 = vpop.permute.xlu0 %1698  ;;  %v1534_v44 = vsel %vm818_vm2, %v4927_v49, 0.0 }
 0x6a9   : > { %v4934_v19 = vpop.eup %4019  ;;  %1535 = vadd.xlane.f32.xlu0 %v1534_v44  ;;  %3682 = vmatprep.subr.bf16.mxu1 %v1614_v7 }
 0x6aa   : > { %3694 = vmatprep.subr.bf16.mxu0 %v1699_v13  ;;  %v4936_v61 = vpop.permute.xlu1 %1842  ;;  %v1537_v22 = vsel %vm818_vm2, %v4934_v19, 0.0  ;;  %v4940_v59 = vpop.eup %4021 }
 0x6ab   : > { %1538 = vadd.xlane.f32.xlu1 %v1537_v22  ;;  %v1531_v3 = vsel %vm818_vm2, %v4940_v59, 0.0  ;;  %v4951_v29 = vpop.eup %4023  ;;  %v1863_v41 = vsel %vm611_vm1, %v4936_v61, 0 }
 0x6ac   : > { %3683 = vmatpush3.bf16.msra.mxu1 %v1614_v7  ;;  %3695 = vmatpush3.bf16.msra.mxu0 %v1699_v13  ;;  %v1540_v40 = vsel %vm818_vm2, %v4951_v29, 0.0  ;;  %v1845_v48 = vpop.permute.xlu0 %1844 }
 0x6ad   : > { %1457 = vmax.xlane.f32.xlu0 %v1456_v27  ;;  %3872 = vmatprep.subr.msk.bf16.mxu1 %vm611_vm1, %v4936_v61 }
 0x6ae   : > { %v1701_v38 = vpop.permute.xlu1 %1700 }
 0x6af   : > { %1532 = vadd.xlane.f32.xlu1 %v1531_v3  ;;  %3696 = vmatprep.subr.bf16.mxu0 %v1701_v38 }
 0x6b0   : > { %3697 = vmatpush3.bf16.msra.mxu0 %v1701_v38 }
 0x6b1   : > { %1451 = vmax.xlane.f32.xlu0 %v1450_v45 }
 0x6b2   : > { %v1703_v30 = vpop.permute.xlu1 %1702 }
 0x6b3   : > { %1541 = vadd.xlane.f32.xlu1 %v1540_v40  ;;  %3698 = vmatprep.subr.bf16.mxu0 %v1703_v30 }
 0x6b4   : > { %3699 = vmatpush3.bf16.msra.mxu0 %v1703_v30 }
 0x6b5   : > { %1469 = vmax.xlane.f32.xlu0 %v1468_v62 }
 0x6b6   : > { %v1847_v58 = vpop.permute.xlu1 %1846 }
 0x6b7   : > { %1454 = vmax.xlane.f32.xlu1 %v1453_v17 }
 0x6b9   : > { %1463 = vmax.xlane.f32.xlu0 %v1462_v28 }
 0x6bb   : > { %1448 = vmax.xlane.f32.xlu1 %v1447_v8 }
 0x6bf   : > { %1466 = vmax.xlane.f32.xlu1 %v1465_v32 }
 0x6c3   : > { %1460 = vmax.xlane.f32.xlu1 %v1459_v25 }
 0x6cf   : > { %1947 = vrot.lane.b32.xlu0 %v4529_v24, %s4216_s30 }
 0x6d4   : > { %1848 = vrot.lane.b32.xlu1 %v4515_v34, %s4216_s30 }
 0x6d8   : > { %1949 = vrot.lane.b32.xlu1 %v4527_v46, %s4216_s30 }
 0x6f5   : > { %v1527_v11 = vpop.xlane.xlu1 %1526 }
 0x6f9   : > { %v1521_v12 = vpop.xlane.xlu1 %1520  ;;  %v1530_v10 = vpop.xlane.xlu0 %1529 }
 0x6fa   : > { %4025 = vrcp.f32 %v1530_v10 }
 0x6fb   : > { %4027 = vrcp.f32 %v1521_v12 }
 0x6fc   : > { %4029 = vrcp.f32 %v1527_v11 }
 0x6fd   : > { %v1524_v18 = vpop.xlane.xlu0 %1523 }
 0x6fe   : > { %4031 = vrcp.f32 %v1524_v18 }
 0x704   : > { %v4026_v16 = vpop.eup %4025 }
 0x705   : > { %v4028_v14 = vpop.eup %4027  ;;  %v1586_v21 = vmul.f32 %v4026_v16, %v4913_v43  ;;  %v1866_v43 = vsel %vm611_vm1, %v1845_v48, 0 }
 0x706   : > { %v4030_v31 = vpop.eup %4029  ;;  %v1583_v2 = vmul.f32 %v4028_v14, %v4911_v60  ;;  %v1869_v60 = vsel %vm611_vm1, %v1847_v58, 0 }
 0x707   : > { %v1585_v4 = vmul.f32 %v4030_v31, %v4907_v33 }
 0x708   : > { %v4032_v63 = vpop.eup %4031 }
 0x709   : > { %v1584_v39 = vmul.f32 %v4032_v63, %v4919_v54  ;;  %v1600_v0 = vpack.c.bf16 %v1586_v21, %v1585_v4 }
 0x70b   : > { %v1599_v15 = vpack.c.bf16 %v1584_v39, %v1583_v2 }
 0x70d   : > { %3684 = vmatprep.mubr.msk.bf16.mxu1 %vm818_vm2, %v1599_v15 }
 0x70e   : > { %3685 = vmatmul.mubr.msk.bf16.vlgmr.msra.gmra.mrb[16].mxu1 %vm818_vm2, %v1600_v0 }
 0x70f   : > { %3709 = vmatpush3.bf16.xpose.msra.mxu1 %v1863_v41 }
 0x710   : > { %3873 = vmatprep.subr.msk.bf16.mxu1 %vm611_vm1, %v1845_v48 }
 0x717   : > { %3711 = vmatpush3.bf16.xpose.msra.mxu1 %v1866_v43 }
 0x718   : > { %3874 = vmatprep.subr.msk.bf16.mxu1 %vm611_vm1, %v1847_v58 }
 0x71f   : > { %3713 = vmatpush3.bf16.xpose.msra.mxu1 %v1869_v60 }
 0x736   : > { %v1536_v33 = vpop.xlane.xlu0 %1535 }
 0x737   : > { %4033 = vrcp.f32 %v1536_v33 }
 0x738   : > { %v1539_v54 = vpop.xlane.xlu1 %1538 }
 0x73a   : > { %v1458_v35 = vpop.xlane.xlu0 %1457 }
 0x73b   : > { %v1482_v53 = vsub.f32 %v4930_v5, %v1458_v35 }
 0x73c   : > { %v1533_v6 = vpop.xlane.xlu1 %1532 }
 0x73d   : > { %4035 = vrcp.f32 %v1533_v6  ;;  %v1509_v38 = vmul.f32 1.442695, %v1482_v53 }
 0x73e   : > { %v1452_v9 = vpop.xlane.xlu0 %1451  ;;  %4037 = vrcp.f32 %v1539_v54 }
 0x73f   : > { %v1480_v3 = vsub.f32 %v4943_v52, %v1452_v9 }
 0x740   : > { %v1542_v42 = vpop.xlane.xlu1 %1541 }
 0x741   : > { %4039 = vrcp.f32 %v1542_v42  ;;  %v4034_v44 = vpop.eup %4033 }
 0x742   : > { %v1470_v7 = vpop.xlane.xlu0 %1469  ;;  %v1588_v62 = vmul.f32 %v4034_v44, %v4927_v49 }
 0x743   : > { %v1486_v39 = vsub.f32 %v4954_v1, %v1470_v7 }
 0x744   : > { %v1455_v13 = vpop.xlane.xlu1 %1454 }
 0x745   : > { %v1481_v61 = vsub.f32 %v4959_v51, %v1455_v13  ;;  %v1505_v51 = vmul.f32 1.442695, %v1480_v3  ;;  %v1517_v15 = vmul.f32 1.442695, %v1486_v39 }
 0x746   : > { %v1464_v22 = vpop.xlane.xlu0 %1463 }
 0x747   : > { %v4036_v27 = vpop.eup %4035  ;;  %v1507_v45 = vmul.f32 1.442695, %v1481_v61  ;;  %v1484_v0 = vsub.f32 %v4964_v37, %v1464_v22 }
 0x748   : > { %v1449_v30 = vpop.xlane.xlu1 %1448  ;;  %v1587_v40 = vmul.f32 %v4036_v27, %v4940_v59  ;;  %v4038_v17 = vpop.eup %4037 }
 0x749   : > { %4041 = vpow2.f32 %v1507_v45  ;;  %v1479_v28 = vsub.f32 %v4969_v50, %v1449_v30  ;;  %v1589_v59 = vmul.f32 %v4038_v17, %v4934_v19  ;;  %v1513_v41 = vmul.f32 1.442695, %v1484_v0 }
 0x74a   : > { %v5011_v5 = vpop.permute.xlu0 %1947  ;;  %v1601_v8 = vpack.c.bf16 %v1588_v62, %v1587_v40  ;;  %4043 = vpow2.f32 %v1509_v38 }
 0x74b   : > { %v4040_v32 = vpop.eup %4039  ;;  %v1503_v25 = vmul.f32 1.442695, %v1479_v28  ;;  %3876 = vmatprep.subr.msk.bf16.mxu0 %vm611_vm1, %v5011_v5 }
 0x74c   : > { %v1467_v52 = vpop.xlane.xlu1 %1466  ;;  %3688 = vmatprep.mubr.msk.bf16.mxu1 %vm818_vm2, %v1601_v8  ;;  %v1590_v49 = vmul.f32 %v4040_v32, %v4951_v29 }
 0x74d   : > { %4045 = vpow2.f32 %v1503_v25  ;;  %v1485_v21 = vsub.f32 %v4976_v56, %v1467_v52  ;;  %v1968_v52 = vsel %vm611_vm1, %v5011_v5, 0 }
 0x74e   : > { %v1602_v58 = vpack.c.bf16 %v1590_v49, %v1589_v59  ;;  %4047 = vpow2.f32 %v1505_v51 }
 0x74f   : > { %v1515_v4 = vmul.f32 1.442695, %v1485_v21 }
 0x750   : > { %v1461_v50 = vpop.xlane.xlu1 %1460  ;;  %3689 = vmatmul.mubr.msk.bf16.gmra.mrb[20].mxu1 %vm818_vm2, %v1602_v58 }
 0x751   : > { %v1483_v63 = vsub.f32 %v4981_v36, %v1461_v50 }
 0x753   : > { %v5019_v48 = vpop.eup %4041  ;;  %v1511_v2 = vmul.f32 1.442695, %v1483_v63 }
 0x754   : > { %v1849_v11 = vpop.permute.xlu1 %1848  ;;  %v1549_v12 = vsel %vm818_vm2, %v5019_v48, 0.0  ;;  %v5023_v10 = vpop.eup %4043 }
 0x755   : > { %1550 = vadd.xlane.f32.xlu0 %v1549_v12  ;;  %3875 = vmatprep.subr.msk.bf16.mxu1 %vm611_vm1, %v1849_v11  ;;  %v1872_v19 = vsel %vm611_vm1, %v1849_v11, 0  ;;  %v1552_v16 = vsel %vm818_vm2, %v5023_v10, 0.0  ;;  %4049 = vpow2.f32 %v1511_v2 }
 0x756   : > { %3715 = vmatpush3.bf16.xpose.msra.mxu1 %v1872_v19  ;;  %4051 = vpow2.f32 %v1515_v4 }
 0x757   : > { %v5027_v29 = vpop.eup %4045  ;;  %4053 = vpow2.f32 %v1517_v15 }
 0x758   : > { %v1543_v18 = vsel %vm818_vm2, %v5027_v29, 0.0  ;;  %v5033_v14 = vpop.eup %4047  ;;  %4055 = vpow2.f32 %v1513_v41  ;;  %v1950_v35 = vpop.permute.xlu1 %1949 }
 0x759   : > { %1544 = vadd.xlane.f32.xlu1 %v1543_v18  ;;  %1553 = vadd.xlane.f32.xlu0 %v1552_v16  ;;  %v1546_v31 = vsel %vm818_vm2, %v5033_v14, 0.0  ;;  %v1971_v59 = vsel %vm611_vm1, %v1950_v35, 0 }
 0x75d   : > { %1547 = vadd.xlane.f32.xlu0 %v1546_v31 }
 0x75f   : > { %v5045_v43 = vpop.eup %4049 }
 0x760   : > { %v1555_v60 = vsel %vm818_vm2, %v5045_v43, 0.0  ;;  %v5049_v36 = vpop.eup %4051 }
 0x761   : > { %v1561_v1 = vsel %vm818_vm2, %v5049_v36, 0.0  ;;  %v5053_v56 = vpop.eup %4053 }
 0x762   : > { %v1564_v37 = vsel %vm818_vm2, %v5053_v56, 0.0  ;;  %v5057_v33 = vpop.eup %4055 }
 0x763   : > { %v1558_v54 = vsel %vm818_vm2, %v5057_v33, 0.0 }
 0x76a   : > { %1834 = vrot.lane.b32.xlu1 %v4503_v55, %s4217_s4 }
 0x773   : > { %1836 = vrot.lane.b32.xlu0 %v4501_v26, %s4217_s4 }
 0x78e   : > { %1556 = vadd.xlane.f32.xlu1 %v1555_v60 }
 0x792   : > { %1562 = vadd.xlane.f32.xlu0 %v1561_v1 }
 0x796   : > { %1565 = vadd.xlane.f32.xlu0 %v1564_v37 }
 0x79a   : > { %1559 = vadd.xlane.f32.xlu0 %v1558_v54 }
 0x79f   : > { %1951 = vrot.lane.b32.xlu1 %v4543_v23, %s4216_s30 }
 0x7a3   : > { %1939 = vrot.lane.b32.xlu1 %v4529_v24, %s4217_s4 }
 0x7a7   : > { %1838 = vrot.lane.b32.xlu1 %v4517_v20, %s4217_s4 }
 0x7ab   : > { %1943 = vrot.lane.b32.xlu1 %v4543_v23, %s4217_s4 }
 0x7b0   : > { %1953 = vrot.lane.b32.xlu0 %v4541_v57, %s4216_s30 }
 0x7b4   : > { %1941 = vrot.lane.b32.xlu0 %v4527_v46, %s4217_s4 }
 0x7b8   : > { %1840 = vrot.lane.b32.xlu0 %v4515_v34, %s4217_s4 }
 0x7bc   : > { %1945 = vrot.lane.b32.xlu0 %v4541_v57, %s4217_s4 }
 0x7e1   : > { %v5077_v6 = vpop.f32.mrb[16].mxu1 }
 0x7e2   : > { %v5079_v9 = vpop.f32.mrb[17].mxu1  ;;  %v1551_v42 = vpop.xlane.xlu0 %1550 }
 0x7e3   : > { %v5081_v7 = vpop.f32.mrb[18].mxu1 }
 0x7e4   : > { %v5085_v13 = vpop.f32.mrb[19].mxu1 }
 0x7e6   : > { %v1545_v61 = vpop.xlane.xlu1 %1544  ;;  %v1554_v22 = vpop.xlane.xlu0 %1553 }
 0x7e7   : > { %4057 = vrcp.f32 %v1554_v22 }
 0x7e8   : > { %4059 = vrcp.f32 %v1545_v61 }
 0x7e9   : > { %4061 = vrcp.f32 %v1551_v42 }
 0x7ea   : > { %v1835_v27 = vpop.permute.xlu1 %1834  ;;  %v1548_v38 = vpop.xlane.xlu0 %1547 }
 0x7eb   : > { %4063 = vrcp.f32 %v1548_v38  ;;  %3716 = vmatprep.mubr.msk.bf16.mxu1 %vm611_vm1, %v1835_v27 }
 0x7ee   : > { %v1837_v3 = vpop.permute.xlu0 %1836 }
 0x7ef   : > { %3717 = vmatmul.mubr.msk.bf16.vlgmr.msra.gmra.mrb[24].mxu1 %vm611_vm1, %v1837_v3 }
 0x7f1   : > { %v4058_v45 = vpop.eup %4057 }
 0x7f2   : > { %v4060_v30 = vpop.eup %4059  ;;  %v1594_v17 = vmul.f32 %v4058_v45, %v5023_v10 }
 0x7f3   : > { %v4062_v40 = vpop.eup %4061  ;;  %v1591_v28 = vmul.f32 %v4060_v30, %v5027_v29 }
 0x7f4   : > { %v1593_v32 = vmul.f32 %v4062_v40, %v5019_v48 }
 0x7f5   : > { %v4064_v62 = vpop.eup %4063 }
 0x7f6   : > { %v1592_v8 = vmul.f32 %v4064_v62, %v5033_v14  ;;  %v1604_v25 = vpack.c.bf16 %v1594_v17, %v1593_v32 }
 0x7f8   : > { %v1603_v51 = vpack.c.bf16 %v1592_v8, %v1591_v28 }
 0x7fa   : > { %3700 = vmatprep.mubr.msk.bf16.mxu0 %vm818_vm2, %v1603_v51 }
 0x7fb   : > { %3701 = vmatmul.mubr.msk.bf16.vlgmr.msra.gmra.mrb[48].mxu0 %vm818_vm2, %v1604_v25 }
 0x7fc   : > { %3725 = vmatpush3.bf16.xpose.msra.mxu0 %v1968_v52 }
 0x7fd   : > { %3877 = vmatprep.subr.msk.bf16.mxu0 %vm611_vm1, %v1950_v35 }
 0x804   : > { %3727 = vmatpush3.bf16.xpose.msra.mxu0 %v1971_v59 }
 0x81b   : > { %v1557_v49 = vpop.xlane.xlu1 %1556 }
 0x81f   : > { %v1952_v58 = vpop.permute.xlu1 %1951  ;;  %v1563_v50 = vpop.xlane.xlu0 %1562 }
 0x820   : > { %3878 = vmatprep.subr.msk.bf16.mxu0 %vm611_vm1, %v1952_v58  ;;  %v1974_v48 = vsel %vm611_vm1, %v1952_v58, 0 }
 0x821   : > { %3729 = vmatpush3.bf16.xpose.msra.mxu0 %v1974_v48 }
 0x823   : > { %v1940_v11 = vpop.permute.xlu1 %1939  ;;  %v5103_v12 = vpop.f32.mrb[20].mxu1 }
 0x824   : > { %v1566_v10 = vpop.xlane.xlu0 %1565  ;;  %v5105_v19 = vpop.f32.mrb[21].mxu1 }
 0x825   : > { %v5107_v5 = vpop.f32.mrb[22].mxu1  ;;  %4065 = vrcp.f32 %v1566_v10 }
 0x826   : > { %v5111_v18 = vpop.f32.mrb[23].mxu1  ;;  %4067 = vrcp.f32 %v1557_v49 }
 0x827   : > { %v1839_v14 = vpop.permute.xlu1 %1838  ;;  %4069 = vrcp.f32 %v1563_v50 }
 0x828   : > { %v1560_v31 = vpop.xlane.xlu0 %1559  ;;  %3720 = vmatprep.mubr.msk.bf16.mxu1 %vm611_vm1, %v1839_v14 }
 0x829   : > { %4071 = vrcp.f32 %v1560_v31 }
 0x82b   : > { %v1944_v61 = vpop.permute.xlu1 %1943 }
 0x82c   : > { %v1954_v63 = vpop.permute.xlu0 %1953 }
 0x82d   : > { %3879 = vmatprep.subr.msk.bf16.mxu0 %vm611_vm1, %v1954_v63  ;;  %v1977_v21 = vsel %vm611_vm1, %v1954_v63, 0 }
 0x82e   : > { %3731 = vmatpush3.bf16.xpose.msra.mxu0 %v1977_v21 }
 0x82f   : > { %v4066_v2 = vpop.eup %4065 }
 0x830   : > { %v1942_v39 = vpop.permute.xlu0 %1941  ;;  %v4068_v4 = vpop.eup %4067  ;;  %v1598_v41 = vmul.f32 %v4066_v2, %v5053_v56 }
 0x831   : > { %v4070_v15 = vpop.eup %4069  ;;  %v1595_v1 = vmul.f32 %v4068_v4, %v5045_v43 }
 0x832   : > { %v1597_v54 = vmul.f32 %v4070_v15, %v5049_v36 }
 0x833   : > { %v4072_v0 = vpop.eup %4071 }
 0x834   : > { %v1841_v60 = vpop.permute.xlu0 %1840  ;;  %v1596_v37 = vmul.f32 %v4072_v0, %v5057_v33  ;;  %v1606_v42 = vpack.c.bf16 %v1598_v41, %v1597_v54 }
 0x835   : > { %3721 = vmatmul.mubr.msk.bf16.gmra.mrb[28].mxu1 %vm611_vm1, %v1841_v60 }
 0x836   : > { %v1605_v35 = vpack.c.bf16 %v1596_v37, %v1595_v1 }
 0x838   : > { %3704 = vmatprep.mubr.msk.bf16.mxu0 %vm818_vm2, %v1605_v35  ;;  %v1946_v43 = vpop.permute.xlu0 %1945 }
 0x839   : > { %3705 = vmatmul.mubr.msk.bf16.gmra.mrb[52].mxu0 %vm818_vm2, %v1606_v42 }
 0x83a   : > { %3732 = vmatprep.mubr.msk.bf16.mxu0 %vm611_vm1, %v1940_v11 }
 0x841   : > { %3733 = vmatmul.mubr.msk.bf16.vlgmr.msra.gmra.mrb[56].mxu0 %vm611_vm1, %v1942_v39 }
 0x842   : > { %3736 = vmatprep.mubr.msk.bf16.mxu0 %vm611_vm1, %v1944_v61 }
 0x849   : > { %3737 = vmatmul.mubr.msk.bf16.gmra.mrb[60].mxu0 %vm611_vm1, %v1946_v43 }
 0x8c2   : > { %v3718_v56 = vpop.f32.mrb[24].mxu1 }
 0x8c3   : > { %v1908_v33 = vpop.f32.mrb[25].mxu1  ;;  %v5135_v45 = vmul.f32 0.35355338, %v3718_v56 }
 0x8c4   : > { %v5129_v22 = vmul.f32 0.35355338, %v1908_v33  ;;  %v3719_v36 = vpop.f32.mrb[26].mxu1 }
 0x8c5   : > { %v1911_v27 = vpop.f32.mrb[27].mxu1  ;;  %v5139_v40 = vmul.f32 0.35355338, %v3719_v36  ;;  %v2066_v62 = vsel %vm818_vm2, %v5135_v45, -inf }
 0x8c6   : > { %v5131_v38 = vmul.f32 0.35355338, %v1911_v27  ;;  %v2060_v3 = vsel %vm818_vm2, %v5129_v22, -inf }
 0x8c7   : > { %2061 = vmax.xlane.f32.xlu1 %v2060_v3  ;;  %v2069_v32 = vsel %vm818_vm2, %v5139_v40, -inf }
 0x8c8   : > { %v2063_v30 = vsel %vm818_vm2, %v5131_v38, -inf }
 0x8c9   : > { %2064 = vmax.xlane.f32.xlu0 %v2063_v30 }
 0x8cd   : > { %2067 = vmax.xlane.f32.xlu0 %v2066_v62 }
 0x8ce   : > { %v5143_v17 = vpop.f32.mrb[48].mxu0 }
 0x8cf   : > { %v5145_v28 = vpop.f32.mrb[49].mxu0 }
 0x8d0   : > { %v5147_v8 = vpop.f32.mrb[50].mxu0 }
 0x8d1   : > { %v5153_v25 = vpop.f32.mrb[51].mxu0  ;;  %2070 = vmax.xlane.f32.xlu0 %v2069_v32 }
 0x908   : > { %v3722_v59 = vpop.f32.mrb[28].mxu1 }
 0x909   : > { %v1924_v49 = vpop.f32.mrb[29].mxu1  ;;  %v5159_v11 = vmul.f32 0.35355338, %v3722_v59 }
 0x90a   : > { %v5157_v58 = vmul.f32 0.35355338, %v1924_v49  ;;  %v3723_v50 = vpop.f32.mrb[30].mxu1 }
 0x90b   : > { %v1927_v48 = vpop.f32.mrb[31].mxu1  ;;  %v5169_v21 = vmul.f32 0.35355338, %v3723_v50  ;;  %v2078_v41 = vsel %vm818_vm2, %v5159_v11, -inf }
 0x90c   : > { %v5161_v10 = vmul.f32 0.35355338, %v1927_v48  ;;  %v5163_v14 = vpop.f32.mrb[52].mxu0  ;;  %v2072_v31 = vsel %vm818_vm2, %v5157_v58, -inf }
 0x90d   : > { %5783 = vst [vmem:[#allocation4_spill] sm:$0xff] %v5163_v14  ;;  %v5167_v63 = vpop.f32.mrb[53].mxu0  ;;  %2073 = vmax.xlane.f32.xlu1 %v2072_v31  ;;  %v2081_v60 = vsel %vm818_vm2, %v5169_v21, -inf }
 0x90e   : > { %5784 = vst [vmem:[#allocation5_spill] sm:$0xff] %v5167_v63  ;;  %v5171_v2 = vpop.f32.mrb[54].mxu0  ;;  %v2075_v39 = vsel %vm818_vm2, %v5161_v10, -inf }
 0x90f   : > { %v5177_v15 = vpop.f32.mrb[55].mxu0  ;;  %2076 = vmax.xlane.f32.xlu0 %v2075_v39 }
 0x910   : > { %5785 = vst [vmem:[#allocation6_spill] sm:$0xff] %v5177_v15 }
 0x911   : > { %2079 = vmax.xlane.f32.xlu1 %v2078_v41 }
 0x913   : > { %2082 = vmax.xlane.f32.xlu0 %v2081_v60 }
 0x914   : > { %v5185_v1 = vpop.f32.mrb[56].mxu0 }
 0x915   : > { %v5187_v37 = vpop.f32.mrb[57].mxu0 }
 0x916   : > { %v5189_v54 = vpop.f32.mrb[58].mxu0 }
 0x917   : > { %v5191_v35 = vpop.f32.mrb[59].mxu0 }
 0x91c   : > { %v5193_v42 = vpop.f32.mrb[60].mxu0 }
 0x91d   : > { %v5195_v61 = vpop.f32.mrb[61].mxu0 }
 0x91e   : > { %v5197_v43 = vpop.f32.mrb[62].mxu0 }
 0x91f   : > { %v5199_v56 = vpop.f32.mrb[63].mxu0 }
 0x922   : > { %2244 = vrot.lane.b32.xlu1 %v4503_v55, %s4218_s5 }
 0x926   : > { %2248 = vrot.lane.b32.xlu1 %v4517_v20, %s4218_s5 }
 0x929   : > { %2246 = vrot.lane.b32.xlu0 %v4501_v26, %s4218_s5 }
 0x92a   : > { %2333 = vrot.lane.b32.xlu1 %v4529_v24, %s4218_s5 }
 0x92d   : > { %2250 = vrot.lane.b32.xlu0 %v4515_v34, %s4218_s5 }
 0x92e   : > { %2479 = vrot.lane.b32.xlu1 %v4503_v55, %s4219_s6 }
 0x931   : > { %2335 = vrot.lane.b32.xlu0 %v4527_v46, %s4218_s5 }
 0x932   : > { %2337 = vrot.lane.b32.xlu1 %v4543_v23, %s4218_s5 }
 0x935   : > { %2481 = vrot.lane.b32.xlu0 %v4501_v26, %s4219_s6 }
 0x936   : > { %2339 = vrot.lane.b32.xlu1 %v4541_v57, %s4218_s5 }
 0x939   : > { %2584 = vrot.lane.b32.xlu0 %v4529_v24, %s4219_s6 }
 0x93a   : > { %2483 = vrot.lane.b32.xlu1 %v4517_v20, %s4219_s6 }
 0x93e   : > { %2485 = vrot.lane.b32.xlu1 %v4515_v34, %s4219_s6 }
 0x942   : > { %2586 = vrot.lane.b32.xlu1 %v4527_v46, %s4219_s6 }
 0x954   : > { %v2062_v33 = vpop.xlane.xlu1 %2061 }
 0x955   : > { %v2108_v27 = vsub.f32 %v5129_v22, %v2062_v33 }
 0x956   : > { %v2065_v36 = vpop.xlane.xlu0 %2064 }
 0x957   : > { %v2124_v62 = vmul.f32 1.442695, %v2108_v27  ;;  %v2109_v32 = vsub.f32 %v5131_v38, %v2065_v36 }
 0x959   : > { %v2126_v48 = vmul.f32 1.442695, %v2109_v32 }
 0x95a   : > { %v2068_v3 = vpop.xlane.xlu0 %2067 }
 0x95b   : > { %v2110_v30 = vsub.f32 %v5135_v45, %v2068_v3 }
 0x95d   : > { %v2128_v59 = vmul.f32 1.442695, %v2110_v30 }
 0x95e   : > { %v2071_v49 = vpop.xlane.xlu0 %2070 }
 0x95f   : > { %4073 = vpow2.f32 %v2128_v59  ;;  %v2111_v50 = vsub.f32 %v5139_v40, %v2071_v49 }
 0x960   : > { %4075 = vpow2.f32 %v2124_v62 }
 0x961   : > { %v2130_v31 = vmul.f32 1.442695, %v2111_v50 }
 0x963   : > { %4077 = vpow2.f32 %v2130_v31 }
 0x964   : > { %4079 = vpow2.f32 %v2126_v48 }
 0x969   : > { %v5225_v39 = vpop.eup %4073 }
 0x96a   : > { %v2162_v22 = vsel %vm818_vm2, %v5225_v39, 0.0  ;;  %v5229_v41 = vpop.eup %4075 }
 0x96b   : > { %2163 = vadd.xlane.f32.xlu1 %v2162_v22  ;;  %v2156_v38 = vsel %vm818_vm2, %v5229_v41, 0.0 }
 0x96d   : > { %v5231_v45 = vpop.eup %4077 }
 0x96e   : > { %v2165_v40 = vsel %vm818_vm2, %v5231_v45, 0.0  ;;  %v5237_v60 = vpop.eup %4079 }
 0x96f   : > { %2157 = vadd.xlane.f32.xlu1 %v2156_v38  ;;  %2166 = vadd.xlane.f32.xlu0 %v2165_v40  ;;  %v2159_v33 = vsel %vm818_vm2, %v5237_v60, 0.0 }
 0x973   : > { %2160 = vadd.xlane.f32.xlu0 %v2159_v33 }
 0x99a   : > { %v2074_v36 = vpop.xlane.xlu1 %2073 }
 0x99b   : > { %v2112_v3 = vsub.f32 %v5157_v58, %v2074_v36  ;;  %v5248_v36 = vmul.f32 0.35355338, %v5189_v54  ;;  %v5261_v54 = vmul.f32 0.35355338, %v5191_v35  ;;  %v5274_v35 = vmul.f32 0.35355338, %v5197_v43 }
 0x99c   : > { %v2077_v27 = vpop.xlane.xlu0 %2076 }
 0x99d   : > { %v2113_v30 = vsub.f32 %v5161_v10, %v2077_v27  ;;  %v2132_v50 = vmul.f32 1.442695, %v2112_v3  ;;  %v2105_v43 = vsel %vm818_vm2, %v5274_v35, -inf }
 0x99e   : > { %v2080_v62 = vpop.xlane.xlu1 %2079 }
 0x99f   : > { %v2134_v32 = vmul.f32 1.442695, %v2113_v30  ;;  %v2114_v59 = vsub.f32 %v5159_v11, %v2080_v62 }
 0x9a0   : > { %v2083_v49 = vpop.xlane.xlu0 %2082 }
 0x9a1   : > { %4081 = vpow2.f32 %v2134_v32  ;;  %v2136_v48 = vmul.f32 1.442695, %v2114_v59  ;;  %v2115_v31 = vsub.f32 %v5169_v21, %v2083_v49  ;;  %v2093_v59 = vsel %vm818_vm2, %v5248_v36, -inf }
 0x9a2   : > { %v2245_v22 = vpop.permute.xlu1 %2244 }
 0x9a3   : > { %4083 = vpow2.f32 %v2136_v48  ;;  %3740 = vmatprep.subr.bf16.mxu1 %v2245_v22  ;;  %v2138_v40 = vmul.f32 1.442695, %v2115_v31 }
 0x9a4   : > { %3741 = vmatpush3.bf16.msra.mxu1 %v2245_v22  ;;  %v2247_v38 = vpop.permute.xlu0 %2246  ;;  %4085 = vpow2.f32 %v2132_v50  ;;  %v2087_v22 = vsel %vm818_vm2, %v5261_v54, -inf }
 0x9a5   : > { %3742 = vmatprep.subr.bf16.mxu1 %v2247_v38  ;;  %4087 = vpow2.f32 %v2138_v40 }
 0x9a6   : > { %v2249_v58 = vpop.permute.xlu1 %2248 }
 0x9a8   : > { %3743 = vmatpush3.bf16.msra.mxu1 %v2247_v38  ;;  %v2251_v10 = vpop.permute.xlu0 %2250  ;;  %v5279_v38 = vmul.f32 0.35355338, %v5185_v1  ;;  %v5293_v1 = vmul.f32 0.35355338, %v5187_v37 }
 0x9a9   : > { %3744 = vmatprep.subr.bf16.mxu1 %v2249_v58 }
 0x9aa   : > { %v2334_v11 = vpop.permute.xlu1 %2333 }
 0x9ab   : > { %v5245_v33 = vpop.eup %4081  ;;  %3756 = vmatprep.subr.bf16.mxu0 %v2334_v11 }
 0x9ac   : > { %3745 = vmatpush3.bf16.msra.mxu1 %v2249_v58  ;;  %3757 = vmatpush3.bf16.msra.mxu0 %v2334_v11  ;;  %v2336_v21 = vpop.permute.xlu0 %2335  ;;  %v2171_v27 = vsel %vm818_vm2, %v5245_v33, 0.0 }
 0x9ad   : > { %v5252_v3 = vpop.eup %4083  ;;  %2172 = vadd.xlane.f32.xlu0 %v2171_v27  ;;  %3746 = vmatprep.subr.bf16.mxu1 %v2251_v10  ;;  %v5300_v27 = vmul.f32 0.35355338, %v5193_v42 }
 0x9ae   : > { %3758 = vmatprep.subr.bf16.mxu0 %v2336_v21  ;;  %v5254_v30 = vpop.permute.xlu1 %2479  ;;  %v2174_v62 = vsel %vm818_vm2, %v5252_v3, 0.0  ;;  %v5258_v32 = vpop.eup %4085 }
 0x9af   : > { %2175 = vadd.xlane.f32.xlu1 %v2174_v62  ;;  %v2168_v48 = vsel %vm818_vm2, %v5258_v32, 0.0  ;;  %v5271_v31 = vpop.eup %4087  ;;  %v2084_v62 = vsel %vm818_vm2, %v5293_v1, -inf  ;;  %v2102_v37 = vsel %vm818_vm2, %v5300_v27, -inf }
 0x9b0   : > { %3747 = vmatpush3.bf16.msra.mxu1 %v2251_v10  ;;  %3759 = vmatpush3.bf16.msra.mxu0 %v2336_v21  ;;  %v5267_v49 = vpop.permute.xlu0 %2481  ;;  %v2177_v58 = vsel %vm818_vm2, %v5271_v31, 0.0  ;;  %v5284_v10 = vmul.f32 0.35355338, %v5199_v56  ;;  %v2090_v21 = vsel %vm818_vm2, %v5279_v38, -inf }
 0x9b1   : > { %2094 = vmax.xlane.f32.xlu0 %v2093_v59  ;;  %3880 = vmatprep.subr.msk.bf16.mxu1 %vm611_vm1, %v5254_v30  ;;  %v5305_v59 = vmul.f32 0.35355338, %v5195_v61 }
 0x9b2   : > { %v2338_v50 = vpop.permute.xlu1 %2337  ;;  %v2099_v56 = vsel %vm818_vm2, %v5284_v10, -inf }
 0x9b3   : > { %2169 = vadd.xlane.f32.xlu1 %v2168_v48  ;;  %3760 = vmatprep.subr.bf16.mxu0 %v2338_v50 }
 0x9b4   : > { %3761 = vmatpush3.bf16.msra.mxu0 %v2338_v50  ;;  %v5286_v11 = vpop.permute.xlu0 %2584  ;;  %v2096_v50 = vsel %vm818_vm2, %v5305_v59, -inf }
 0x9b5   : > { %2088 = vmax.xlane.f32.xlu0 %v2087_v22 }
 0x9b6   : > { %v2340_v40 = vpop.permute.xlu1 %2339 }
 0x9b7   : > { %2178 = vadd.xlane.f32.xlu1 %v2177_v58  ;;  %3762 = vmatprep.subr.bf16.mxu0 %v2340_v40 }
 0x9b8   : > { %3763 = vmatpush3.bf16.msra.mxu0 %v2340_v40 }
 0x9b9   : > { %2106 = vmax.xlane.f32.xlu0 %v2105_v43  ;;  %3884 = vmatprep.subr.msk.bf16.mxu0 %vm611_vm1, %v5286_v11 }
 0x9ba   : > { %v2484_v42 = vpop.permute.xlu1 %2483 }
 0x9bb   : > { %2091 = vmax.xlane.f32.xlu1 %v2090_v21 }
 0x9bd   : > { %2100 = vmax.xlane.f32.xlu0 %v2099_v56 }
 0x9be   : > { %v2486_v48 = vpop.permute.xlu1 %2485 }
 0x9bf   : > { %2085 = vmax.xlane.f32.xlu1 %v2084_v62 }
 0x9c2   : > { %v5315_v22 = vpop.permute.xlu1 %2586 }
 0x9c3   : > { %2103 = vmax.xlane.f32.xlu1 %v2102_v37 }
 0x9c7   : > { %2097 = vmax.xlane.f32.xlu1 %v2096_v50 }
 0x9d3   : > { %2473 = vrot.lane.b32.xlu0 %v4501_v26, %s4220_s7 }
 0x9d8   : > { %2471 = vrot.lane.b32.xlu1 %v4503_v55, %s4220_s7 }
 0x9f8   : > { %v2164_v61 = vpop.xlane.xlu1 %2163 }
 0x9fc   : > { %v2158_v40 = vpop.xlane.xlu1 %2157  ;;  %v2167_v58 = vpop.xlane.xlu0 %2166 }
 0x9fd   : > { %4089 = vrcp.f32 %v2167_v58 }
 0x9fe   : > { %4091 = vrcp.f32 %v2158_v40 }
 0x9ff   : > { %4093 = vrcp.f32 %v2164_v61  ;;  %v2500_v61 = vsel %vm611_vm1, %v5254_v30, 0 }
 0xa00   : > { %v2161_v43 = vpop.xlane.xlu0 %2160 }
 0xa01   : > { %4095 = vrcp.f32 %v2161_v43 }
 0xa07   : > { %v4090_v21 = vpop.eup %4089 }
 0xa08   : > { %v4092_v56 = vpop.eup %4091  ;;  %v2223_v50 = vmul.f32 %v4090_v21, %v5231_v45 }
 0xa09   : > { %v4094_v62 = vpop.eup %4093  ;;  %v2220_v0 = vmul.f32 %v4092_v56, %v5229_v41  ;;  %v2503_v41 = vsel %vm611_vm1, %v5267_v49, 0 }
 0xa0a   : > { %v2222_v52 = vmul.f32 %v4094_v62, %v5225_v39 }
 0xa0b   : > { %v4096_v37 = vpop.eup %4095 }
 0xa0c   : > { %v2221_v4 = vmul.f32 %v4096_v37, %v5237_v60  ;;  %v2237_v16 = vpack.c.bf16 %v2223_v50, %v2222_v52 }
 0xa0e   : > { %v2236_v51 = vpack.c.bf16 %v2221_v4, %v2220_v0  ;;  %v2506_v4 = vsel %vm611_vm1, %v2484_v42, 0 }
 0xa10   : > { %3748 = vmatprep.mubr.msk.bf16.mxu1 %vm818_vm2, %v2236_v51 }
 0xa11   : > { %3749 = vmatmul.mubr.msk.bf16.vlgmr.msra.gmra.mrb[32].mxu1 %vm818_vm2, %v2237_v16  ;;  %v2509_v16 = vsel %vm611_vm1, %v2486_v48, 0 }
 0xa12   : > { %3773 = vmatpush3.bf16.xpose.msra.mxu1 %v2500_v61 }
 0xa13   : > { %3881 = vmatprep.subr.msk.bf16.mxu1 %vm611_vm1, %v5267_v49 }
 0xa1a   : > { %3775 = vmatpush3.bf16.xpose.msra.mxu1 %v2503_v41 }
 0xa1b   : > { %3882 = vmatprep.subr.msk.bf16.mxu1 %vm611_vm1, %v2484_v42 }
 0xa22   : > { %3777 = vmatpush3.bf16.xpose.msra.mxu1 %v2506_v4 }
 0xa23   : > { %3883 = vmatprep.subr.msk.bf16.mxu1 %vm611_vm1, %v2486_v48 }
 0xa2a   : > { %3779 = vmatpush3.bf16.xpose.msra.mxu1 %v2509_v16 }
 0xa3a   : > { %v2173_v51 = vpop.xlane.xlu0 %2172 }
 0xa3b   : > { %4097 = vrcp.f32 %v2173_v51 }
 0xa3c   : > { %v2176_v52 = vpop.xlane.xlu1 %2175 }
 0xa3e   : > { %v2095_v39 = vpop.xlane.xlu0 %2094 }
 0xa3f   : > { %v2119_v60 = vsub.f32 %v5248_v36, %v2095_v39 }
 0xa40   : > { %v2170_v0 = vpop.xlane.xlu1 %2169 }
 0xa41   : > { %4099 = vrcp.f32 %v2170_v0  ;;  %v2146_v43 = vmul.f32 1.442695, %v2119_v60 }
 0xa42   : > { %4101 = vrcp.f32 %v2176_v52  ;;  %v2089_v30 = vpop.xlane.xlu0 %2088 }
 0xa43   : > { %v2117_v48 = vsub.f32 %v5261_v54, %v2089_v30 }
 0xa44   : > { %v2179_v45 = vpop.xlane.xlu1 %2178 }
 0xa45   : > { %4103 = vrcp.f32 %v2179_v45  ;;  %v4098_v42 = vpop.eup %4097  ;;  %v2142_v4 = vmul.f32 1.442695, %v2117_v48 }
 0xa46   : > { %v2225_v37 = vmul.f32 %v4098_v42, %v5245_v33  ;;  %v2107_v16 = vpop.xlane.xlu0 %2106 }
 0xa48   : > { %v2092_v49 = vpop.xlane.xlu1 %2091 }
 0xa49   : > { %v2118_v40 = vsub.f32 %v5279_v38, %v2092_v49 }
 0xa4b   : > { %v4100_v58 = vpop.eup %4099  ;;  %v2144_v21 = vmul.f32 1.442695, %v2118_v40 }
 0xa4c   : > { %v2086_v56 = vpop.xlane.xlu1 %2085  ;;  %v2224_v62 = vmul.f32 %v4100_v58, %v5258_v32  ;;  %v4102_v50 = vpop.eup %4101 }
 0xa4d   : > { %4105 = vpow2.f32 %v2144_v21  ;;  %v2116_v61 = vsub.f32 %v5293_v1, %v2086_v56  ;;  %v2226_v54 = vmul.f32 %v4102_v50, %v5252_v3  ;;  %v2101_v1 = vpop.xlane.xlu0 %2100  ;;  %v2123_v21 = vsub.f32 %v5274_v35, %v2107_v16 }
 0xa4e   : > { %v2238_v36 = vpack.c.bf16 %v2225_v37, %v2224_v62  ;;  %4107 = vpow2.f32 %v2146_v43  ;;  %v2121_v37 = vsub.f32 %v5284_v10, %v2101_v1 }
 0xa4f   : > { %v4104_v41 = vpop.eup %4103  ;;  %v2140_v38 = vmul.f32 1.442695, %v2116_v61  ;;  %v2154_v62 = vmul.f32 1.442695, %v2123_v21 }
 0xa50   : > { %v2104_v51 = vpop.xlane.xlu1 %2103  ;;  %3752 = vmatprep.mubr.msk.bf16.mxu1 %vm818_vm2, %v2238_v36  ;;  %v2227_v52 = vmul.f32 %v4104_v41, %v5271_v31  ;;  %v2150_v50 = vmul.f32 1.442695, %v2121_v37 }
 0xa51   : > { %4109 = vpow2.f32 %v2140_v38  ;;  %v2474_v31 = vpop.permute.xlu0 %2473  ;;  %v2122_v43 = vsub.f32 %v5300_v27, %v2104_v51 }
 0xa52   : > { %v2239_v32 = vpack.c.bf16 %v2227_v52, %v2226_v54  ;;  %4111 = vpow2.f32 %v2142_v4 }
 0xa53   : > { %v2152_v56 = vmul.f32 1.442695, %v2122_v43 }
 0xa54   : > { %v2098_v33 = vpop.xlane.xlu1 %2097  ;;  %3753 = vmatmul.mubr.msk.bf16.gmra.mrb[36].mxu1 %vm818_vm2, %v2239_v32 }
 0xa55   : > { %v2120_v58 = vsub.f32 %v5305_v59, %v2098_v33 }
 0xa57   : > { %v5343_v0 = vpop.eup %4105  ;;  %v2148_v48 = vmul.f32 1.442695, %v2120_v58 }
 0xa58   : > { %v2472_v39 = vpop.permute.xlu1 %2471  ;;  %v2186_v45 = vsel %vm818_vm2, %v5343_v0, 0.0  ;;  %v5347_v60 = vpop.eup %4107 }
 0xa59   : > { %2187 = vadd.xlane.f32.xlu0 %v2186_v45  ;;  %3780 = vmatprep.mubr.msk.bf16.mxu1 %vm611_vm1, %v2472_v39  ;;  %v2189_v49 = vsel %vm818_vm2, %v5347_v60, 0.0  ;;  %4113 = vpow2.f32 %v2148_v48 }
 0xa5a   : > { %4115 = vpow2.f32 %v2152_v56 }
 0xa5b   : > { %v5350_v3 = vpop.eup %4109  ;;  %4117 = vpow2.f32 %v2154_v62 }
 0xa5c   : > { %3781 = vmatmul.mubr.msk.bf16.vlgmr.msra.gmra.mrb[40].mxu1 %vm611_vm1, %v2474_v31  ;;  %v2180_v30 = vsel %vm818_vm2, %v5350_v3, 0.0  ;;  %v4112_v42 = vpop.eup %4111  ;;  %4119 = vpow2.f32 %v2150_v50  ;;  %v2605_v50 = vsel %vm611_vm1, %v5286_v11, 0 }
 0xa5d   : > { %2181 = vadd.xlane.f32.xlu1 %v2180_v30  ;;  %2190 = vadd.xlane.f32.xlu0 %v2189_v49  ;;  %v2183_v40 = vsel %vm818_vm2, %v4112_v42, 0.0 }
 0xa61   : > { %2184 = vadd.xlane.f32.xlu0 %v2183_v40 }
 0xa63   : > { %v5366_v61 = vpop.eup %4113 }
 0xa64   : > { %v2192_v36 = vsel %vm818_vm2, %v5366_v61, 0.0  ;;  %v5370_v59 = vpop.eup %4115 }
 0xa65   : > { %v2198_v35 = vsel %vm818_vm2, %v5370_v59, 0.0  ;;  %v5374_v27 = vpop.eup %4117 }
 0xa66   : > { %v2201_v10 = vsel %vm818_vm2, %v5374_v27, 0.0  ;;  %v5378_v41 = vpop.eup %4119 }
 0xa67   : > { %v2195_v4 = vsel %vm818_vm2, %v5378_v41, 0.0 }
 0xa6e   : > { %2588 = vrot.lane.b32.xlu1 %v4543_v23, %s4219_s6 }
 0xa77   : > { %2475 = vrot.lane.b32.xlu0 %v4517_v20, %s4220_s7 }
 0xa92   : > { %2193 = vadd.xlane.f32.xlu1 %v2192_v36 }
 0xa96   : > { %2199 = vadd.xlane.f32.xlu0 %v2198_v35 }
 0xa9a   : > { %2202 = vadd.xlane.f32.xlu0 %v2201_v10 }
 0xa9e   : > { %2196 = vadd.xlane.f32.xlu0 %v2195_v4 }
 0xaa3   : > { %2477 = vrot.lane.b32.xlu1 %v4515_v34, %s4220_s7 }
 0xaa7   : > { %2576 = vrot.lane.b32.xlu1 %v4529_v24, %s4220_s7 }
 0xaab   : > { %2580 = vrot.lane.b32.xlu1 %v4543_v23, %s4220_s7 }
 0xab4   : > { %2590 = vrot.lane.b32.xlu0 %v4541_v57, %s4219_s6 }
 0xab8   : > { %2578 = vrot.lane.b32.xlu0 %v4527_v46, %s4220_s7 }
 0xabc   : > { %2582 = vrot.lane.b32.xlu0 %v4541_v57, %s4220_s7 }
 0xae4   : > { %v5394_v16 = vpop.f32.mrb[32].mxu1 }
 0xae5   : > { %v5396_v38 = vpop.f32.mrb[33].mxu1 }
 0xae6   : > { %v2188_v51 = vpop.xlane.xlu0 %2187  ;;  %v5398_v54 = vpop.f32.mrb[34].mxu1 }
 0xae7   : > { %v5402_v32 = vpop.f32.mrb[35].mxu1 }
 0xaea   : > { %v2182_v1 = vpop.xlane.xlu1 %2181  ;;  %v2191_v39 = vpop.xlane.xlu0 %2190 }
 0xaeb   : > { %4121 = vrcp.f32 %v2191_v39 }
 0xaec   : > { %4123 = vrcp.f32 %v2182_v1 }
 0xaed   : > { %4125 = vrcp.f32 %v2188_v51 }
 0xaee   : > { %v2185_v45 = vpop.xlane.xlu0 %2184 }
 0xaef   : > { %4127 = vrcp.f32 %v2185_v45 }
 0xaf2   : > { %v2476_v31 = vpop.permute.xlu0 %2475 }
 0xaf3   : > { %3784 = vmatprep.mubr.msk.bf16.mxu1 %vm611_vm1, %v2476_v31 }
 0xaf5   : > { %v4122_v30 = vpop.eup %4121 }
 0xaf6   : > { %v4124_v49 = vpop.eup %4123  ;;  %v2231_v43 = vmul.f32 %v4122_v30, %v5347_v60  ;;  %v2608_v60 = vsel %vm611_vm1, %v5315_v22, 0 }
 0xaf7   : > { %v4126_v40 = vpop.eup %4125  ;;  %v2228_v48 = vmul.f32 %v4124_v49, %v5350_v3  ;;  %v2589_v3 = vpop.permute.xlu1 %2588 }
 0xaf8   : > { %v2230_v56 = vmul.f32 %v4126_v40, %v5343_v0  ;;  %v2611_v0 = vsel %vm611_vm1, %v2589_v3, 0 }
 0xaf9   : > { %v4128_v58 = vpop.eup %4127 }
 0xafa   : > { %v2229_v21 = vmul.f32 %v4128_v58, %v4112_v42  ;;  %v2241_v37 = vpack.c.bf16 %v2231_v43, %v2230_v56 }
 0xafc   : > { %v2240_v62 = vpack.c.bf16 %v2229_v21, %v2228_v48 }
 0xafe   : > { %3764 = vmatprep.mubr.msk.bf16.mxu0 %vm818_vm2, %v2240_v62 }
 0xaff   : > { %3765 = vmatmul.mubr.msk.bf16.vlgmr.msra.gmra.mrb[64].mxu0 %vm818_vm2, %v2241_v37 }
 0xb00   : > { %3789 = vmatpush3.bf16.xpose.msra.mxu0 %v2605_v50 }
 0xb01   : > { %3885 = vmatprep.subr.msk.bf16.mxu0 %vm611_vm1, %v5315_v22 }
 0xb08   : > { %3791 = vmatpush3.bf16.xpose.msra.mxu0 %v2608_v60 }
 0xb09   : > { %3886 = vmatprep.subr.msk.bf16.mxu0 %vm611_vm1, %v2589_v3 }
 0xb10   : > { %3793 = vmatpush3.bf16.xpose.msra.mxu0 %v2611_v0 }
 0xb1f   : > { %v2194_v42 = vpop.xlane.xlu1 %2193 }
 0xb23   : > { %v2478_v36 = vpop.permute.xlu1 %2477  ;;  %v2200_v35 = vpop.xlane.xlu0 %2199 }
 0xb24   : > { %3785 = vmatmul.mubr.msk.bf16.gmra.mrb[44].mxu1 %vm611_vm1, %v2478_v36 }
 0xb27   : > { %v5421_v11 = vpop.f32.mrb[36].mxu1  ;;  %v2203_v10 = vpop.xlane.xlu0 %2202 }
 0xb28   : > { %v5423_v4 = vpop.f32.mrb[37].mxu1  ;;  %4129 = vrcp.f32 %v2203_v10 }
 0xb29   : > { %v5425_v51 = vpop.f32.mrb[38].mxu1  ;;  %4131 = vrcp.f32 %v2194_v42 }
 0xb2a   : > { %v5429_v1 = vpop.f32.mrb[39].mxu1  ;;  %4133 = vrcp.f32 %v2200_v35 }
 0xb2b   : > { %v2197_v45 = vpop.xlane.xlu0 %2196 }
 0xb2c   : > { %4135 = vrcp.f32 %v2197_v45 }
 0xb2f   : > { %v3782_v31 = vpop.f32.mrb[40].mxu1  ;;  %v2591_v30 = vpop.permute.xlu0 %2590 }
 0xb30   : > { %v2545_v49 = vpop.f32.mrb[41].mxu1  ;;  %v2614_v40 = vsel %vm611_vm1, %v2591_v30, 0  ;;  %3887 = vmatprep.subr.msk.bf16.mxu0 %vm611_vm1, %v2591_v30  ;;  %v5439_v50 = vmul.f32 0.35355338, %v3782_v31 }
 0xb31   : > { %v5434_v58 = vmul.f32 0.35355338, %v2545_v49  ;;  %v3783_v43 = vpop.f32.mrb[42].mxu1  ;;  %3795 = vmatpush3.bf16.xpose.msra.mxu0 %v2614_v40  ;;  %v2577_v40 = vpop.permute.xlu1 %2576 }
 0xb32   : > { %v2548_v48 = vpop.f32.mrb[43].mxu1  ;;  %v4130_v62 = vpop.eup %4129  ;;  %v2684_v10 = vmul.f32 0.35355338, %v3783_v43  ;;  %v2703_v45 = vsel %vm818_vm2, %v5439_v50, -inf }
 0xb33   : > { %v2682_v21 = vmul.f32 0.35355338, %v2548_v48  ;;  %v2697_v56 = vsel %vm818_vm2, %v5434_v58, -inf  ;;  %v4132_v37 = vpop.eup %4131  ;;  %v2235_v42 = vmul.f32 %v4130_v62, %v5374_v27 }
 0xb34   : > { %2698 = vmax.xlane.f32.xlu1 %v2697_v56  ;;  %v4134_v3 = vpop.eup %4133  ;;  %v2232_v36 = vmul.f32 %v4132_v37, %v5366_v61  ;;  %v2706_v27 = vsel %vm818_vm2, %v2684_v10, -inf  ;;  %v2579_v61 = vpop.permute.xlu0 %2578 }
 0xb35   : > { %v2700_v60 = vsel %vm818_vm2, %v2682_v21, -inf  ;;  %v2234_v30 = vmul.f32 %v4134_v3, %v5370_v59 }
 0xb36   : > { %2701 = vmax.xlane.f32.xlu0 %v2700_v60  ;;  %v4136_v0 = vpop.eup %4135 }
 0xb37   : > { %v2233_v35 = vmul.f32 %v4136_v0, %v5378_v41  ;;  %v2243_v49 = vpack.c.bf16 %v2235_v42, %v2234_v30  ;;  %v2581_v41 = vpop.permute.xlu1 %2580 }
 0xb38   : > { %v2583_v59 = vpop.permute.xlu0 %2582 }
 0xb39   : > { %v2242_v31 = vpack.c.bf16 %v2233_v35, %v2232_v36 }
 0xb3a   : > { %2704 = vmax.xlane.f32.xlu0 %v2703_v45 }
 0xb3b   : > { %3768 = vmatprep.mubr.msk.bf16.mxu0 %vm818_vm2, %v2242_v31 }
 0xb3c   : > { %3769 = vmatmul.mubr.msk.bf16.gmra.mrb[68].mxu0 %vm818_vm2, %v2243_v49 }
 0xb3d   : > { %3796 = vmatprep.mubr.msk.bf16.mxu0 %vm611_vm1, %v2577_v40 }
 0xb3e   : > { %2707 = vmax.xlane.f32.xlu0 %v2706_v27 }
 0xb44   : > { %3797 = vmatmul.mubr.msk.bf16.vlgmr.msra.gmra.mrb[72].mxu0 %vm611_vm1, %v2579_v61 }
 0xb45   : > { %3800 = vmatprep.mubr.msk.bf16.mxu0 %vm611_vm1, %v2581_v41 }
 0xb4c   : > { %3801 = vmatmul.mubr.msk.bf16.gmra.mrb[76].mxu0 %vm611_vm1, %v2583_v59 }
 0xbc3   : > { %v2702_v3 = vpop.xlane.xlu0 %2701 }
 0xbc4   : > { %v2746_v35 = vsub.f32 %v2682_v21, %v2702_v3 }
 0xbc6   : > { %v2763_v31 = vmul.f32 1.442695, %v2746_v35 }
 0xbc7   : > { %v2705_v0 = vpop.xlane.xlu0 %2704 }
 0xbcb   : > { %v2708_v42 = vpop.xlane.xlu0 %2707 }
 0xbcc   : > { %v2748_v36 = vsub.f32 %v2684_v10, %v2708_v42 }
 0xbce   : > { %v2767_v45 = vmul.f32 1.442695, %v2748_v36 }
 0xbd0   : > { %4137 = vpow2.f32 %v2767_v45 }
 0xbd1   : > { %4139 = vpow2.f32 %v2763_v31 }
 0xbd2   : > { %v5455_v43 = vpop.f32.mrb[64].mxu0 }
 0xbd3   : > { %v5457_v48 = vpop.f32.mrb[65].mxu0 }
 0xbd4   : > { %v5459_v56 = vpop.f32.mrb[66].mxu0 }
 0xbd5   : > { %v5463_v37 = vpop.f32.mrb[67].mxu0 }
 0xbda   : > { %v5471_v3 = vpop.eup %4137 }
 0xbdb   : > { %v2802_v42 = vsel %vm818_vm2, %v5471_v3, 0.0  ;;  %v5475_v36 = vpop.eup %4139 }
 0xbf7   : > { %v3786_v30 = vpop.f32.mrb[44].mxu1 }
 0xbf8   : > { %v2561_v49 = vpop.f32.mrb[45].mxu1  ;;  %v2687_v41 = vmul.f32 0.35355338, %v3786_v30 }
 0xbf9   : > { %v2685_v40 = vmul.f32 0.35355338, %v2561_v49  ;;  %v3787_v27 = vpop.f32.mrb[46].mxu1 }
 0xbfa   : > { %v2564_v61 = vpop.f32.mrb[47].mxu1  ;;  %v2688_v60 = vmul.f32 0.35355338, %v3787_v27  ;;  %v2715_v21 = vsel %vm818_vm2, %v2687_v41, -inf }
 0xbfb   : > { %v2686_v59 = vmul.f32 0.35355338, %v2564_v61  ;;  %v2709_v62 = vsel %vm818_vm2, %v2685_v40, -inf }
 0xbfc   : > { %2710 = vmax.xlane.f32.xlu1 %v2709_v62  ;;  %v2718_v10 = vsel %vm818_vm2, %v2688_v60, -inf  ;;  %v2796_v62 = vsel %vm818_vm2, %v5475_v36, 0.0 }
 0xbfd   : > { %v2712_v39 = vsel %vm818_vm2, %v2686_v59, -inf }
 0xbfe   : > { %2713 = vmax.xlane.f32.xlu0 %v2712_v39 }
 0xc00   : > { %2716 = vmax.xlane.f32.xlu1 %v2715_v21 }
 0xc02   : > { %2719 = vmax.xlane.f32.xlu0 %v2718_v10 }
 0xc06   : > { %2803 = vadd.xlane.f32.xlu0 %v2802_v42  ;;  %v2747_v42 = vsub.f32 %v5439_v50, %v2705_v0 }
 0xc08   : > { %v2765_v52 = vmul.f32 1.442695, %v2747_v42 }
 0xc0a   : > { %2797 = vadd.xlane.f32.xlu0 %v2796_v62  ;;  %v2699_v62 = vpop.xlane.xlu1 %2698  ;;  %4141 = vpow2.f32 %v2765_v52 }
 0xc0b   : > { %v2745_v33 = vsub.f32 %v5434_v58, %v2699_v62 }
 0xc0d   : > { %v2761_v30 = vmul.f32 1.442695, %v2745_v33 }
 0xc0f   : > { %v5479_v35 = vpop.f32.mrb[68].mxu0  ;;  %4143 = vpow2.f32 %v2761_v30 }
 0xc10   : > { %5786 = vst [vmem:[#allocation7_spill] sm:$0xff] %v5479_v35  ;;  %v5481_v39 = vpop.f32.mrb[69].mxu0 }
 0xc11   : > { %5787 = vst [vmem:[#allocation8_spill] sm:$0xff] %v5481_v39  ;;  %2881 = vrot.lane.b32.xlu1 %v4503_v55, %s4221_s8  ;;  %v5485_v45 = vpop.f32.mrb[70].mxu0 }
 0xc12   : > { %5788 = vst [vmem:[#allocation9_spill] sm:$0xff] %v5485_v45  ;;  %v5489_v31 = vpop.f32.mrb[71].mxu0 }
 0xc13   : > { %5789 = vst [vmem:[#allocation10_spill] sm:$0xff] %v5489_v31 }
 0xc14   : > { %v5495_v53 = vpop.eup %4141 }
 0xc15   : > { %v2799_v49 = vsel %vm818_vm2, %v5495_v53, 0.0 }
 0xc17   : > { %v3798_v27 = vpop.f32.mrb[72].mxu0 }
 0xc18   : > { %v2650_v61 = vpop.f32.mrb[73].mxu0 }
 0xc19   : > { %v3799_v21 = vpop.f32.mrb[74].mxu0  ;;  %v5499_v47 = vpop.eup %4143 }
 0xc1a   : > { %v2653_v10 = vpop.f32.mrb[75].mxu0  ;;  %v2793_v50 = vsel %vm818_vm2, %v5499_v47, 0.0 }
 0xc1f   : > { %v3802_v22 = vpop.f32.mrb[76].mxu0 }
 0xc20   : > { %v2666_v29 = vpop.f32.mrb[77].mxu0 }
 0xc21   : > { %v3803_v55 = vpop.f32.mrb[78].mxu0 }
 0xc22   : > { %v2669_v44 = vpop.f32.mrb[79].mxu0 }
 0xc35   : > { %2800 = vadd.xlane.f32.xlu1 %v2799_v49 }
 0xc39   : > { %2794 = vadd.xlane.f32.xlu1 %v2793_v50 }
 0xc89   : > { %v2711_v0 = vpop.xlane.xlu1 %2710 }
 0xc8a   : > { %v2749_v39 = vsub.f32 %v2685_v40, %v2711_v0  ;;  %v2690_v0 = vmul.f32 0.35355338, %v2653_v10 }
 0xc8b   : > { %v2714_v58 = vpop.xlane.xlu0 %2713 }
 0xc8c   : > { %v2750_v62 = vsub.f32 %v2686_v59, %v2714_v58  ;;  %v2769_v52 = vmul.f32 1.442695, %v2749_v39 }
 0xc8d   : > { %v2717_v42 = vpop.xlane.xlu1 %2716 }
 0xc8e   : > { %v2751_v33 = vsub.f32 %v2687_v41, %v2717_v42  ;;  %v2771_v63 = vmul.f32 1.442695, %v2750_v62  ;;  %v2695_v42 = vmul.f32 0.35355338, %v3802_v22  ;;  %v5522_v62 = vmul.f32 0.35355338, %v3803_v55 }
 0xc8f   : > { %v2720_v30 = vpop.xlane.xlu0 %2719 }
 0xc90   : > { %v2773_v31 = vmul.f32 1.442695, %v2751_v33  ;;  %v2752_v35 = vsub.f32 %v2688_v60, %v2720_v30  ;;  %v5525_v33 = vmul.f32 0.35355338, %v2666_v29  ;;  %v2742_v10 = vsel %vm818_vm2, %v5522_v62, -inf }
 0xc91   : > { %v2882_v45 = vpop.permute.xlu1 %2881 }
 0xc92   : > { %4145 = vpow2.f32 %v2773_v31  ;;  %v2775_v15 = vmul.f32 1.442695, %v2752_v35  ;;  %3804 = vmatprep.subr.bf16.mxu1 %v2882_v45  ;;  %v2691_v35 = vmul.f32 0.35355338, %v3798_v27  ;;  %v2689_v31 = vmul.f32 0.35355338, %v2650_v61 }
 0xc93   : > { %4147 = vpow2.f32 %v2769_v52  ;;  %3805 = vmatpush3.bf16.msra.mxu1 %v2882_v45  ;;  %v2739_v61 = vsel %vm818_vm2, %v2695_v42, -inf  ;;  %v5528_v52 = vmul.f32 0.35355338, %v2669_v44  ;;  %v2733_v22 = vsel %vm818_vm2, %v5525_v33, -inf  ;;  %v2804_v30 = vpop.xlane.xlu0 %2803 }
 0xc94   : > { %4149 = vpow2.f32 %v2775_v15  ;;  %v2692_v15 = vmul.f32 0.35355338, %v3799_v21  ;;  %v2727_v50 = vsel %vm818_vm2, %v2691_v35, -inf  ;;  %v2721_v27 = vsel %vm818_vm2, %v2689_v31, -inf }
 0xc95   : > { %4151 = vpow2.f32 %v2771_v63  ;;  %v2724_v21 = vsel %vm818_vm2, %v2690_v0, -inf  ;;  %v2736_v55 = vsel %vm818_vm2, %v5528_v52, -inf }
 0xc96   : > { %v2730_v58 = vsel %vm818_vm2, %v2692_v15, -inf  ;;  %4153 = vrcp.f32 %v2804_v30 }
 0xc97   : > { %v2798_v29 = vpop.xlane.xlu0 %2797 }
 0xc9c   : > { %v5503_v49 = vpop.eup %4145 }
 0xc9d   : > { %v5505_v40 = vpop.eup %4147  ;;  %v2811_v41 = vsel %vm818_vm2, %v5503_v49, 0.0 }
 0xc9e   : > { %v5509_v59 = vpop.eup %4149  ;;  %2812 = vadd.xlane.f32.xlu1 %v2811_v41  ;;  %v2805_v63 = vsel %vm818_vm2, %v5505_v40, 0.0 }
 0xc9f   : > { %v2814_v60 = vsel %vm818_vm2, %v5509_v59, 0.0  ;;  %v5513_v39 = vpop.eup %4151 }
 0xca0   : > { %2815 = vadd.xlane.f32.xlu0 %v2814_v60  ;;  %v2808_v45 = vsel %vm818_vm2, %v5513_v39, 0.0  ;;  %v4154_v60 = vpop.eup %4153 }
 0xca2   : > { %2806 = vadd.xlane.f32.xlu1 %v2805_v63 }
 0xca4   : > { %2809 = vadd.xlane.f32.xlu0 %v2808_v45  ;;  %v5543_v45 = vmul.f32 %v4154_v60, %v5471_v3 }
 0xca6   : > { %2728 = vmax.xlane.f32.xlu1 %v2727_v50 }
 0xca8   : > { %2731 = vmax.xlane.f32.xlu0 %v2730_v58 }
 0xcaa   : > { %2722 = vmax.xlane.f32.xlu1 %v2721_v27 }
 0xcac   : > { %2725 = vmax.xlane.f32.xlu0 %v2724_v21 }
 0xcae   : > { %2740 = vmax.xlane.f32.xlu1 %v2739_v61 }
 0xcb0   : > { %2743 = vmax.xlane.f32.xlu0 %v2742_v10 }
 0xcb2   : > { %2734 = vmax.xlane.f32.xlu1 %v2733_v22 }
 0xcb4   : > { %2737 = vmax.xlane.f32.xlu0 %v2736_v55 }
 0xcc2   : > { %v2801_v41 = vpop.xlane.xlu1 %2800 }
 0xcc3   : > { %4155 = vrcp.f32 %v2801_v41  ;;  %2883 = vrot.lane.b32.xlu1 %v4501_v26, %s4221_s8 }
 0xcc4   : > { %4157 = vrcp.f32 %v2798_v29 }
 0xcc6   : > { %v2795_v44 = vpop.xlane.xlu1 %2794 }
 0xcc7   : > { %4159 = vrcp.f32 %v2795_v44  ;;  %2887 = vrot.lane.b32.xlu1 %v4515_v34, %s4221_s8 }
 0xcca   : > { %2885 = vrot.lane.b32.xlu0 %v4517_v20, %s4221_s8 }
 0xccd   : > { %v4156_v63 = vpop.eup %4155 }
 0xcce   : > { %v5546_v50 = vmul.f32 %v4156_v63, %v5495_v53  ;;  %v4158_v58 = vpop.eup %4157 }
 0xccf   : > { %v2858_v34 = vmul.f32 %v4158_v58, %v5475_v36 }
 0xcd1   : > { %v4160_v27 = vpop.eup %4159 }
 0xcd2   : > { %v2857_v21 = vmul.f32 %v4160_v27, %v5499_v47 }
 0xcd4   : > { %v2873_v61 = vpack.c.bf16 %v2858_v34, %v2857_v21 }
 0xcd6   : > { %3812 = vmatprep.mubr.msk.bf16.mxu1 %vm818_vm2, %v2873_v61 }
 0xd2b   : > { %v2813_v20 = vpop.xlane.xlu1 %2812 }
 0xd2d   : > { %v2816_v10 = vpop.xlane.xlu0 %2815 }
 0xd2f   : > { %v2807_v22 = vpop.xlane.xlu1 %2806 }
 0xd31   : > { %v2810_v3 = vpop.xlane.xlu0 %2809 }
 0xd33   : > { %v2729_v55 = vpop.xlane.xlu1 %2728 }
 0xd34   : > { %v2755_v30 = vsub.f32 %v2691_v35, %v2729_v55 }
 0xd35   : > { %v2732_v53 = vpop.xlane.xlu0 %2731 }
 0xd36   : > { %v2781_v29 = vmul.f32 1.442695, %v2755_v30  ;;  %v2756_v41 = vsub.f32 %v2692_v15, %v2732_v53 }
 0xd37   : > { %v2723_v44 = vpop.xlane.xlu1 %2722 }
 0xd38   : > { %4161 = vpow2.f32 %v2781_v29  ;;  %v2753_v60 = vsub.f32 %v2689_v31, %v2723_v44  ;;  %v2783_v26 = vmul.f32 1.442695, %v2756_v41 }
 0xd39   : > { %v2726_v63 = vpop.xlane.xlu0 %2725 }
 0xd3a   : > { %v2777_v47 = vmul.f32 1.442695, %v2753_v60  ;;  %v2754_v27 = vsub.f32 %v2690_v0, %v2726_v63 }
 0xd3b   : > { %v2741_v36 = vpop.xlane.xlu1 %2740 }
 0xd3c   : > { %4163 = vpow2.f32 %v2777_v47  ;;  %v2759_v58 = vsub.f32 %v2695_v42, %v2741_v36  ;;  %v2779_v34 = vmul.f32 1.442695, %v2754_v27 }
 0xd3d   : > { %v2744_v21 = vpop.xlane.xlu0 %2743  ;;  %4165 = vpow2.f32 %v2783_v26 }
 0xd3e   : > { %v2789_v61 = vmul.f32 1.442695, %v2759_v58  ;;  %v2760_v14 = vsub.f32 %v5522_v62, %v2744_v21  ;;  %4167 = vrcp.f32 %v2810_v3 }
 0xd3f   : > { %v2735_v35 = vpop.xlane.xlu1 %2734 }
 0xd40   : > { %4169 = vpow2.f32 %v2789_v61  ;;  %v2757_v15 = vsub.f32 %v5525_v33, %v2735_v35  ;;  %v2791_v31 = vmul.f32 1.442695, %v2760_v14 }
 0xd41   : > { %4171 = vrcp.f32 %v2807_v22  ;;  %v2738_v55 = vpop.xlane.xlu0 %2737 }
 0xd42   : > { %v5555_v30 = vpop.eup %4161  ;;  %4173 = vpow2.f32 %v2779_v34  ;;  %v2785_v0 = vmul.f32 1.442695, %v2757_v15  ;;  %v2758_v42 = vsub.f32 %v5528_v52, %v2738_v55 }
 0xd43   : > { %4175 = vrcp.f32 %v2816_v10  ;;  %v2884_v26 = vpop.permute.xlu1 %2883  ;;  %v2823_v53 = vsel %vm818_vm2, %v5555_v30, 0.0 }
 0xd44   : > { %4177 = vpow2.f32 %v2785_v0  ;;  %v2787_v62 = vmul.f32 1.442695, %v2758_v42  ;;  %3806 = vmatprep.subr.bf16.mxu1 %v2884_v26  ;;  %2824 = vadd.xlane.f32.xlu0 %v2823_v53 }
 0xd45   : > { %4179 = vpow2.f32 %v2791_v31  ;;  %3807 = vmatpush3.bf16.msra.mxu1 %v2884_v26  ;;  %v2886_v33 = vpop.permute.xlu0 %2885 }
 0xd46   : > { %v5560_v14 = vpop.eup %4163  ;;  %4181 = vpow2.f32 %v2787_v62  ;;  %3808 = vmatprep.subr.bf16.mxu1 %v2886_v33 }
 0xd47   : > { %v2817_v22 = vsel %vm818_vm2, %v5560_v14, 0.0  ;;  %v5564_v52 = vpop.eup %4165  ;;  %4183 = vrcp.f32 %v2813_v20  ;;  %v2888_v3 = vpop.permute.xlu1 %2887 }
 0xd48   : > { %2818 = vadd.xlane.f32.xlu0 %v2817_v22  ;;  %v4168_v10 = vpop.eup %4167  ;;  %v2826_v60 = vsel %vm818_vm2, %v5564_v52, 0.0 }
 0xd49   : > { %3809 = vmatpush3.bf16.msra.mxu1 %v2886_v33  ;;  %v2862_v47 = vmul.f32 %v4168_v10, %v5513_v39  ;;  %v5790_v39 = vpack.c.bf16 %v5543_v45, %v5546_v50 }
 0xd4a   : > { %v5566_v29 = vpop.eup %4169  ;;  %3810 = vmatprep.subr.bf16.mxu1 %v2888_v3 }
 0xd4b   : > { %v4172_v41 = vpop.eup %4171  ;;  %v2835_v44 = vsel %vm818_vm2, %v5566_v29, 0.0 }
 0xd4c   : > { %v4174_v63 = vpop.eup %4173  ;;  %2836 = vadd.xlane.f32.xlu1 %v2835_v44  ;;  %2827 = vadd.xlane.f32.xlu0 %v2826_v60  ;;  %v2861_v36 = vmul.f32 %v4172_v41, %v5505_v40 }
 0xd4d   : > { %v4176_v20 = vpop.eup %4175  ;;  %3811 = vmatpush3.bf16.msra.mxu1 %v2888_v3  ;;  %v2820_v34 = vsel %vm818_vm2, %v4174_v63, 0.0 }
 0xd4e   : > { %v5573_v27 = vpop.eup %4177  ;;  %v2875_v35 = vpack.c.bf16 %v2862_v47, %v2861_v36  ;;  %v2864_v55 = vmul.f32 %v4176_v20, %v5509_v59  ;;  %v5792_v59 = vpack.c.bf16 %v5085_v13, %v5079_v9 }
 0xd4f   : > { %v5576_v58 = vpop.eup %4179  ;;  %v2829_v21 = vsel %vm818_vm2, %v5573_v27, 0.0 }
 0xd50   : > { %v5581_v61 = vpop.eup %4181  ;;  %2830 = vadd.xlane.f32.xlu1 %v2829_v21  ;;  %2821 = vadd.xlane.f32.xlu0 %v2820_v34  ;;  %v2838_v40 = vsel %vm818_vm2, %v5576_v58, 0.0 }
 0xd51   : > { %3813 = vmatmul.mubr.msk.bf16.vlgmr.msra.gmra.mrb[48].mxu1 %vm818_vm2, %v5790_v39  ;;  %v4184_v15 = vpop.eup %4183  ;;  %v2832_v31 = vsel %vm818_vm2, %v5581_v61, 0.0 }
 0xd52   : > { %3816 = vmatprep.mubr.msk.bf16.mxu1 %vm818_vm2, %v2875_v35  ;;  %v2863_v0 = vmul.f32 %v4184_v15, %v5503_v49  ;;  %v5791_v49 = vpack.c.bf16 %v5081_v7, %v5077_v6 }
 0xd54   : > { %2839 = vadd.xlane.f32.xlu1 %v2838_v40  ;;  %2833 = vadd.xlane.f32.xlu0 %v2832_v31  ;;  %v2876_v42 = vpack.c.bf16 %v2864_v55, %v2863_v0 }
 0xd59   : > { %3817 = vmatmul.mubr.msk.bf16.gmra.mrb[52].mxu1 %vm818_vm2, %v2876_v42 }
 0xd65   : > { %2972 = vrot.lane.b32.xlu1 %v4527_v46, %s4221_s8  ;;  %v5793_v46 = vpack.c.bf16 %v5398_v54, %v5394_v16 }
 0xd69   : > { %2974 = vrot.lane.b32.xlu1 %v4543_v23, %s4221_s8 }
 0xd6a   : > { %2970 = vrot.lane.b32.xlu0 %v4529_v24, %s4221_s8  ;;  %v5794_v24 = vpack.c.bf16 %v5402_v32, %v5396_v38 }
 0xd6d   : > { %2976 = vrot.lane.b32.xlu1 %v4541_v57, %s4221_s8 }
 0xd6e   : > { %1803 = vrot.lane.b32.xlu0 %v5791_v49, %s4222_s9 }
 0xd71   : > { %1801 = vrot.lane.b32.xlu1 %v5792_v59, %s4222_s9 }
 0xd72   : > { %2440 = vrot.lane.b32.xlu0 %v5793_v46, %s4223_s10  ;;  %v4202_v46 = vld [vmem:[%s5771_s1] sm:$0xff]  }
 0xd75   : > { %2438 = vrot.lane.b32.xlu1 %v5794_v24, %s4223_s10 }
 0xdd1   : > { %v2825_v57 = vpop.xlane.xlu0 %2824 }
 0xdd5   : > { %v2819_v23 = vpop.xlane.xlu0 %2818 }
 0xdd6   : > { %4185 = vrcp.f32 %v2819_v23 }
 0xdd9   : > { %v2837_v6 = vpop.xlane.xlu1 %2836  ;;  %v2828_v7 = vpop.xlane.xlu0 %2827 }
 0xddd   : > { %v2831_v45 = vpop.xlane.xlu1 %2830  ;;  %v2822_v50 = vpop.xlane.xlu0 %2821 }
 0xdde   : > { %4187 = vrcp.f32 %v2822_v50  ;;  %v5797_v50 = vpack.c.bf16 %v5425_v51, %v5421_v11  ;;  %v5803_v11 = vld [vmem:[#allocation4_spill] sm:$0xff] }
 0xddf   : > { %4189 = vrcp.f32 %v2828_v7  ;;  %v5795_v7 = vpack.c.bf16 %v5107_v5, %v5103_v12  ;;  %v5799_v12 = vpack.c.bf16 %v5147_v8, %v5143_v17  ;;  %v5801_v5 = vpack.c.bf16 %v5459_v56, %v5455_v43  ;;  %v5805_v8 = vld [vmem:[#allocation6_spill] sm:$0xff] }
 0xde0   : > { %v4186_v26 = vpop.eup %4185  ;;  %v5804_v17 = vpack.c.bf16 %v5171_v2, %v5803_v11 }
 0xde1   : > { %v2840_v9 = vpop.xlane.xlu1 %2839  ;;  %v2834_v13 = vpop.xlane.xlu0 %2833  ;;  %v2865_v62 = vmul.f32 %v4186_v26, %v5560_v14 }
 0xde2   : > { %4191 = vrcp.f32 %v2834_v13 }
 0xde3   : > { %4193 = vrcp.f32 %v2825_v57 }
 0xde4   : > { %4195 = vrcp.f32 %v2831_v45  ;;  %v5796_v45 = vpack.c.bf16 %v5111_v18, %v5105_v19  ;;  %v5800_v19 = vpack.c.bf16 %v5153_v25, %v5145_v28  ;;  %v5802_v18 = vpack.c.bf16 %v5463_v37, %v5457_v48 }
 0xde5   : > { %v2973_v16 = vpop.permute.xlu1 %2972  ;;  %v2971_v54 = vpop.permute.xlu0 %2970  ;;  %4197 = vrcp.f32 %v2840_v9  ;;  %v5798_v9 = vpack.c.bf16 %v5429_v1, %v5423_v4  ;;  %v5806_v4 = vld [vmem:[#allocation5_spill] sm:$0xff] }
 0xde6   : > { %3820 = vmatprep.subr.bf16.mxu0 %v2971_v54  ;;  %4199 = vrcp.f32 %v2837_v6  ;;  %v5807_v28 = vpack.c.bf16 %v5805_v8, %v5806_v4 }
 0xde7   : > { %3821 = vmatpush3.bf16.msra.mxu0 %v2971_v54 }
 0xde8   : > { %3822 = vmatprep.subr.bf16.mxu0 %v2973_v16  ;;  %v4188_v38 = vpop.eup %4187 }
 0xde9   : > { %v2975_v32 = vpop.permute.xlu1 %2974  ;;  %v1804_v53 = vpop.permute.xlu0 %1803  ;;  %v2866_v33 = vmul.f32 %v4188_v38, %v4174_v63 }
 0xdea   : > { %1827 = vst.msk [vmem:[#allocation2 + $0x8] sm:$0xff] %vm1825_vm3, %v1804_v53  ;;  %v4190_v10 = vpop.eup %4189 }
 0xdeb   : > { %3823 = vmatpush3.bf16.msra.mxu0 %v2973_v16  ;;  %v2877_v22 = vpack.c.bf16 %v2866_v33, %v2865_v62  ;;  %v2868_v14 = vmul.f32 %v4190_v10, %v5564_v52 }
 0xdec   : > { %3824 = vmatprep.subr.bf16.mxu0 %v2975_v32  ;;  %v4192_v44 = vpop.eup %4191 }
 0xded   : > { %v2977_v3 = vpop.permute.xlu1 %2976  ;;  %v2441_v41 = vpop.permute.xlu0 %2440  ;;  %3828 = vmatprep.mubr.msk.bf16.mxu0 %vm818_vm2, %v2877_v22  ;;  %v2870_v20 = vmul.f32 %v4192_v44, %v5581_v61 }
 0xdee   : > { %2464 = vst.msk [vmem:[#allocation2 + $0x8] sm:$0xff] %vm2462_vm4, %v2441_v41  ;;  %v4194_v60 = vpop.eup %4193 }
 0xdef   : > { %3825 = vmatpush3.bf16.msra.mxu0 %v2975_v32  ;;  %v4196_v47 = vpop.eup %4195  ;;  %v2867_v36 = vmul.f32 %v4194_v60, %v5555_v30 }
 0xdf0   : > { %3826 = vmatprep.subr.bf16.mxu0 %v2977_v3  ;;  %v2869_v21 = vmul.f32 %v4196_v47, %v5573_v27  ;;  %v4198_v35 = vpop.eup %4197 }
 0xdf1   : > { %v1802_v63 = vpop.permute.xlu1 %1801  ;;  %v2878_v34 = vpack.c.bf16 %v2868_v14, %v2867_v36  ;;  %v4200_v52 = vpop.eup %4199  ;;  %v2872_v61 = vmul.f32 %v4198_v35, %v5576_v58  ;;  %v4201_v58 = vld [vmem:[%s5771_s1 + $0x8] sm:$0xff]   ;;  %v5808_v36 = vld [vmem:[#allocation9_spill] sm:$0xff] }
 0xdf2   : > { %1826 = vst.msk [vmem:[#allocation2] sm:$0xff] %vm1825_vm3, %v1802_v63  ;;  %v2879_v15 = vpack.c.bf16 %v2870_v20, %v2869_v21  ;;  %v2871_v30 = vmul.f32 %v4200_v52, %v5566_v29  ;;  %v5809_v21 = vld [vmem:[#allocation7_spill] sm:$0xff] }
 0xdf3   : > { %3827 = vmatpush3.bf16.msra.mxu0 %v2977_v3 }
 0xdf4   : > { %v2880_v40 = vpack.c.bf16 %v2872_v61, %v2871_v30 }
 0xdf5   : > { %v2439_v39 = vpop.permute.xlu1 %2438 }
 0xdf6   : > { %2463 = vst.msk [vmem:[#allocation2] sm:$0xff] %vm2462_vm4, %v2439_v39  ;;  %3829 = vmatmul.mubr.msk.bf16.vlgmr.msra.gmra.mrb[80].mxu0 %vm818_vm2, %v2878_v34  ;;  %v5810_v34 = vpack.c.bf16 %v5808_v36, %v5809_v21  ;;  %v5811_v39 = vld [vmem:[#allocation10_spill] sm:$0xff] }
 0xdf7   : > { %3832 = vmatprep.mubr.msk.bf16.mxu0 %vm818_vm2, %v2879_v15  ;;  %v5812_v15 = vld [vmem:[#allocation8_spill] sm:$0xff] }
 0xdf8   : > { %v5813_v52 = vpack.c.bf16 %v5811_v39, %v5812_v15 }
 0xdfe   : > { %3833 = vmatmul.mubr.msk.bf16.gmra.mrb[84].mxu0 %vm818_vm2, %v2880_v40 }
 0xe24   : > { %v3814_v31 = vpop.f32.mrb[48].mxu1 }
 0xe25   : > { %v2939_v27 = vpop.f32.mrb[49].mxu1 }
 0xe26   : > { %v3815_v55 = vpop.f32.mrb[50].mxu1 }
 0xe27   : > { %v3060_v0 = vpack.c.bf16 %v3815_v55, %v3814_v31  ;;  %v2942_v42 = vpop.f32.mrb[51].mxu1 }
 0xe28   : > { %v3059_v49 = vpack.c.bf16 %v2942_v42, %v2939_v27  ;;  %v5814_v27 = vld [vmem:[#allocation3_spill] sm:$0xff] }
 0xe29   : > { %3077 = vrot.lane.b32.xlu0 %v3060_v0, %s4224_s11 }
 0xe2a   : > { %3075 = vrot.lane.b32.xlu1 %v3059_v49, %s4224_s11 }
 0xe2c   : > { %v3818_v59 = vpop.f32.mrb[52].mxu1 }
 0xe2d   : > { %3118 = vrot.lane.b32.xlu0 %v4201_v58, %s4225_s17  ;;  %v2955_v29 = vpop.f32.mrb[53].mxu1 }
 0xe2e   : > { %3116 = vrot.lane.b32.xlu1 %v4202_v46, %s4225_s17  ;;  %v3819_v24 = vpop.f32.mrb[54].mxu1 }
 0xe2f   : > { %v3062_v57 = vpack.c.bf16 %v3819_v24, %v3818_v59  ;;  %v2958_v23 = vpop.f32.mrb[55].mxu1 }
 0xe30   : > { %v3061_v6 = vpack.c.bf16 %v2958_v23, %v2955_v29 }
 0xe31   : > { %1807 = vrot.lane.b32.xlu0 %v5795_v7, %s4222_s9 }
 0xe32   : > { %1805 = vrot.lane.b32.xlu1 %v5796_v45, %s4222_s9 }
 0xe35   : > { %2444 = vrot.lane.b32.xlu0 %v5797_v50, %s4223_s10 }
 0xe36   : > { %2442 = vrot.lane.b32.xlu1 %v5798_v9, %s4223_s10 }
 0xe39   : > { %3081 = vrot.lane.b32.xlu0 %v3062_v57, %s4224_s11 }
 0xe3a   : > { %3079 = vrot.lane.b32.xlu1 %v3061_v6, %s4224_s11 }
 0xe3d   : > { %1811 = vrot.lane.b32.xlu0 %v5799_v12, %s4222_s9 }
 0xe3e   : > { %1809 = vrot.lane.b32.xlu1 %v5800_v19, %s4222_s9 }
 0xe41   : > { %2448 = vrot.lane.b32.xlu0 %v5801_v5, %s4223_s10 }
 0xe42   : > { %2446 = vrot.lane.b32.xlu1 %v5802_v18, %s4223_s10 }
 0xe45   : > { %1815 = vrot.lane.b32.xlu0 %v5804_v17, %s4222_s9 }
 0xe46   : > { %1813 = vrot.lane.b32.xlu1 %v5807_v28, %s4222_s9 }
 0xe9b   : > { %v3078_v25 = vpop.permute.xlu0 %3077 }
 0xe9c   : > { %3101 = vst.msk [vmem:[#allocation2 + $0x8] sm:$0xff] %vm3099_vm5, %v3078_v25  ;;  %v3076_v51 = vpop.permute.xlu1 %3075 }
 0xe9d   : > { %3100 = vst.msk [vmem:[#allocation2] sm:$0xff] %vm3099_vm5, %v3076_v51 }
 0xe9f   : > { %v3119_v1 = vpop.permute.xlu0 %3118 }
 0xea0   : > { %v3117_v43 = vpop.permute.xlu1 %3116 }
 0xea1   : > { %3836 = vmatprep.subr.bf16.mxu1 %v3117_v43 }
 0xea2   : > { %3837 = vmatpush3.bf16.msra.mxu1 %v3117_v43 }
 0xea3   : > { %v1808_v48 = vpop.permute.xlu0 %1807  ;;  %3838 = vmatprep.subr.bf16.mxu1 %v3119_v1  ;;  %v3109_v16 = vld [vmem:[#allocation2 + $0x8] sm:$0xff] }
 0xea4   : > { %1829 = vst.msk [vmem:[#allocation2 + $0x18] sm:$0xff] %vm1825_vm3, %v1808_v48  ;;  %v1806_v2 = vpop.permute.xlu1 %1805  ;;  %v3108_v56 = vld [vmem:[#allocation2] sm:$0xff] }
 0xea5   : > { %1828 = vst.msk [vmem:[#allocation2 + $0x10] sm:$0xff] %vm1825_vm3, %v1806_v2  ;;  %3840 = vmatprep.mubr.msk.bf16.mxu1 %vm196_vm0, %v3108_v56 }
 0xea6   : > { %3839 = vmatpush3.bf16.msra.mxu1 %v3119_v1 }
 0xea7   : > { %v2445_v37 = vpop.permute.xlu0 %2444 }
 0xea8   : > { %2466 = vst.msk [vmem:[#allocation2 + $0x18] sm:$0xff] %vm2462_vm4, %v2445_v37  ;;  %v2443_v13 = vpop.permute.xlu1 %2442 }
 0xea9   : > { %2465 = vst.msk [vmem:[#allocation2 + $0x10] sm:$0xff] %vm2462_vm4, %v2443_v13  ;;  %3841 = vmatmul.mubr.msk.bf16.vlgmr.msra.gmra.mrb[56].mxu1 %vm196_vm0, %v3109_v16 }
 0xeab   : > { %v3082_v54 = vpop.permute.xlu0 %3081 }
 0xeac   : > { %3103 = vst.msk [vmem:[#allocation2 + $0x18] sm:$0xff] %vm3099_vm5, %v3082_v54  ;;  %v3080_v26 = vpop.permute.xlu1 %3079 }
 0xead   : > { %3102 = vst.msk [vmem:[#allocation2 + $0x10] sm:$0xff] %vm3099_vm5, %v3080_v26 }
 0xeaf   : > { %v1812_v38 = vpop.permute.xlu0 %1811 }
 0xeb0   : > { %1831 = vst.msk [vmem:[#allocation2 + $0x28] sm:$0xff] %vm1825_vm3, %v1812_v38  ;;  %v1810_v32 = vpop.permute.xlu1 %1809 }
 0xeb1   : > { %1830 = vst.msk [vmem:[#allocation2 + $0x20] sm:$0xff] %vm1825_vm3, %v1810_v32 }
 0xeb3   : > { %v2449_v53 = vpop.permute.xlu0 %2448  ;;  %v3111_v22 = vld [vmem:[#allocation2 + $0x18] sm:$0xff] }
 0xeb4   : > { %2468 = vst.msk [vmem:[#allocation2 + $0x28] sm:$0xff] %vm2462_vm4, %v2449_v53  ;;  %v2447_v62 = vpop.permute.xlu1 %2446  ;;  %v3110_v33 = vld [vmem:[#allocation2 + $0x10] sm:$0xff] }
 0xeb5   : > { %2467 = vst.msk [vmem:[#allocation2 + $0x20] sm:$0xff] %vm2462_vm4, %v2447_v62  ;;  %3844 = vmatprep.mubr.msk.bf16.mxu1 %vm196_vm0, %v3110_v33 }
 0xeb6   : > { %3845 = vmatmul.mubr.msk.bf16.gmra.mrb[60].mxu1 %vm196_vm0, %v3111_v22 }
 0xeb7   : > { %v1816_v10 = vpop.permute.xlu0 %1815 }
 0xeb8   : > { %1833 = vst.msk [vmem:[#allocation2 + $0x38] sm:$0xff] %vm1825_vm3, %v1816_v10  ;;  %v1814_v3 = vpop.permute.xlu1 %1813 }
 0xeb9   : > { %1832 = vst.msk [vmem:[#allocation2 + $0x30] sm:$0xff] %vm1825_vm3, %v1814_v3 }
 0xec9   : > { %v3830_v41 = vpop.f32.mrb[80].mxu0 }
 0xeca   : > { %v3028_v44 = vpop.f32.mrb[81].mxu0 }
 0xecb   : > { %v3831_v60 = vpop.f32.mrb[82].mxu0 }
 0xecc   : > { %v3064_v47 = vpack.c.bf16 %v3831_v60, %v3830_v41  ;;  %v3031_v14 = vpop.f32.mrb[83].mxu0 }
 0xecd   : > { %v3063_v63 = vpack.c.bf16 %v3031_v14, %v3028_v44 }
 0xece   : > { %3085 = vrot.lane.b32.xlu0 %v3064_v47, %s4224_s11 }
 0xecf   : > { %3083 = vrot.lane.b32.xlu1 %v3063_v63, %s4224_s11 }
 0xed1   : > { %v3834_v20 = vpop.f32.mrb[84].mxu0 }
 0xed2   : > { %2452 = vrot.lane.b32.xlu0 %v5810_v34, %s4223_s10  ;;  %v3044_v35 = vpop.f32.mrb[85].mxu0 }
 0xed3   : > { %2450 = vrot.lane.b32.xlu1 %v5813_v52, %s4223_s10  ;;  %v3835_v61 = vpop.f32.mrb[86].mxu0 }
 0xed4   : > { %v3066_v30 = vpack.c.bf16 %v3835_v61, %v3834_v20  ;;  %v3047_v40 = vpop.f32.mrb[87].mxu0 }
 0xed5   : > { %v3065_v31 = vpack.c.bf16 %v3047_v40, %v3044_v35 }
 0xed6   : > { %3089 = vrot.lane.b32.xlu0 %v3066_v30, %s4224_s11 }
 0xed7   : > { %3087 = vrot.lane.b32.xlu1 %v3065_v31, %s4224_s11 }
 0xedb   : > { %3123 = vrot.lane.b32.xlu1 %v5814_v27, %s4225_s17 }
 0xf40   : > { %v3086_v55 = vpop.permute.xlu0 %3085 }
 0xf41   : > { %3105 = vst.msk [vmem:[#allocation2 + $0x28] sm:$0xff] %vm3099_vm5, %v3086_v55  ;;  %v3084_v0 = vpop.permute.xlu1 %3083 }
 0xf42   : > { %3104 = vst.msk [vmem:[#allocation2 + $0x20] sm:$0xff] %vm3099_vm5, %v3084_v0 }
 0xf44   : > { %v2453_v42 = vpop.permute.xlu0 %2452 }
 0xf45   : > { %2470 = vst.msk [vmem:[#allocation2 + $0x38] sm:$0xff] %vm2462_vm4, %v2453_v42  ;;  %v2451_v49 = vpop.permute.xlu1 %2450 }
 0xf46   : > { %2469 = vst.msk [vmem:[#allocation2 + $0x30] sm:$0xff] %vm2462_vm4, %v2451_v49 }
 0xf48   : > { %v3090_v59 = vpop.permute.xlu0 %3089  ;;  %v3113_v46 = vld [vmem:[#allocation2 + $0x28] sm:$0xff] }
 0xf49   : > { %3107 = vst.msk [vmem:[#allocation2 + $0x38] sm:$0xff] %vm3099_vm5, %v3090_v59  ;;  %v3088_v58 = vpop.permute.xlu1 %3087  ;;  %v3112_v29 = vld [vmem:[#allocation2 + $0x20] sm:$0xff] }
 0xf4a   : > { %3106 = vst.msk [vmem:[#allocation2 + $0x30] sm:$0xff] %vm3099_vm5, %v3088_v58  ;;  %3848 = vmatprep.mubr.msk.bf16.mxu1 %vm196_vm0, %v3112_v29 }
 0xf4b   : > { %3849 = vmatmul.mubr.msk.bf16.gmra.mrb[64].mxu1 %vm196_vm0, %v3113_v46 }
 0xf4d   : > { %v3124_v23 = vpop.permute.xlu1 %3123 }
 0xf50   : > { %v3115_v57 = vld [vmem:[#allocation2 + $0x38] sm:$0xff] }
 0xf51   : > { %v3114_v24 = vld [vmem:[#allocation2 + $0x30] sm:$0xff] }
 0xf52   : > { %3852 = vmatprep.mubr.msk.bf16.mxu1 %vm196_vm0, %v3114_v24 }
 0xf53   : > { %3853 = vmatmul.mubr.msk.bf16.gmra.mrb[68].mxu1 %vm196_vm0, %v3115_v57 }
 0xf7c   : > { %v3842_v6 = vpop.f32.mrb[56].mxu1 }
 0xf7d   : > { %v3193_v7 = vadd.f32 %v3842_v6, %v3124_v23  ;;  %v3184_v45 = vpop.f32.mrb[57].mxu1 }
 0xf7e   : > { %v3185_v50 = vadd.f32 %v3184_v45, %v3124_v23  ;;  %v3843_v9 = vpop.f32.mrb[58].mxu1 }
 0xf7f   : > { %3249 = vst.msk [vmem:[%s5733_s22 + $0x10] sm:$0xff] %vm196_vm0, %v3193_v7  ;;  %v3196_v12 = vadd.f32 %v3843_v9, %v3124_v23  ;;  %v3187_v19 = vpop.f32.mrb[59].mxu1 }
 0xf80   : > { %3247 = vst.msk [vmem:[%s5733_s22] sm:$0xff] %vm196_vm0, %v3185_v50  ;;  %v3188_v5 = vadd.f32 %v3187_v19, %v3124_v23 }
 0xf81   : > { %3250 = vst.msk [vmem:[%s5733_s22 + $0x18] sm:$0xff] %vm196_vm0, %v3196_v12 }
 0xf82   : > { %3248 = vst.msk [vmem:[%s5733_s22 + $0x8] sm:$0xff] %vm196_vm0, %v3188_v5 }
 0xf89   : > { %v3846_v18 = vpop.f32.mrb[60].mxu1 }
 0xf8a   : > { %v3209_v11 = vadd.f32 %v3846_v18, %v3124_v23  ;;  %v3200_v17 = vpop.f32.mrb[61].mxu1 }
 0xf8b   : > { %v3201_v8 = vadd.f32 %v3200_v17, %v3124_v23  ;;  %v3847_v4 = vpop.f32.mrb[62].mxu1 }
 0xf8c   : > { %3253 = vst.msk [vmem:[%s5733_s22 + $0x30] sm:$0xff] %vm196_vm0, %v3209_v11  ;;  %v3212_v28 = vadd.f32 %v3847_v4, %v3124_v23  ;;  %v3203_v25 = vpop.f32.mrb[63].mxu1 }
 0xf8d   : > { %3251 = vst.msk [vmem:[%s5733_s22 + $0x20] sm:$0xff] %vm196_vm0, %v3201_v8  ;;  %v3204_v51 = vadd.f32 %v3203_v25, %v3124_v23 }
 0xf8e   : > { %3254 = vst.msk [vmem:[%s5733_s22 + $0x38] sm:$0xff] %vm196_vm0, %v3212_v28 }
 0xf8f   : > { %3252 = vst.msk [vmem:[%s5733_s22 + $0x28] sm:$0xff] %vm196_vm0, %v3204_v51 }
0x101e   : > { %v3850_v1 = vpop.f32.mrb[64].mxu1 }
0x101f   : > { %v3225_v43 = vadd.f32 %v3850_v1, %v3124_v23  ;;  %v3216_v48 = vpop.f32.mrb[65].mxu1 }
0x1020   : > { %v3217_v2 = vadd.f32 %v3216_v48, %v3124_v23  ;;  %v3851_v56 = vpop.f32.mrb[66].mxu1 }
0x1021   : > { %3257 = vst.msk [vmem:[%s5733_s22 + $0x50] sm:$0xff] %vm196_vm0, %v3225_v43  ;;  %v3228_v37 = vadd.f32 %v3851_v56, %v3124_v23  ;;  %v3219_v13 = vpop.f32.mrb[67].mxu1 }
0x1022   : > { %3255 = vst.msk [vmem:[%s5733_s22 + $0x40] sm:$0xff] %vm196_vm0, %v3217_v2  ;;  %v3220_v16 = vadd.f32 %v3219_v13, %v3124_v23 }
0x1023   : > { %3258 = vst.msk [vmem:[%s5733_s22 + $0x58] sm:$0xff] %vm196_vm0, %v3228_v37 }
0x1024   : > { %3256 = vst.msk [vmem:[%s5733_s22 + $0x48] sm:$0xff] %vm196_vm0, %v3220_v16 }
0x1026   : > { %v3854_v54 = vpop.f32.mrb[68].mxu1 }
0x1027   : > { %v3241_v26 = vadd.f32 %v3854_v54, %v3124_v23  ;;  %v3232_v38 = vpop.f32.mrb[69].mxu1 }
0x1028   : > { %v3233_v32 = vadd.f32 %v3232_v38, %v3124_v23  ;;  %v3855_v53 = vpop.f32.mrb[70].mxu1 }
0x1029   : > { %3261 = vst.msk [vmem:[%s5733_s22 + $0x70] sm:$0xff] %vm196_vm0, %v3241_v26  ;;  %v3244_v62 = vadd.f32 %v3855_v53, %v3124_v23  ;;  %v3235_v33 = vpop.f32.mrb[71].mxu1 }
0x102a   : > { %3259 = vst.msk [vmem:[%s5733_s22 + $0x60] sm:$0xff] %vm196_vm0, %v3233_v32  ;;  %v3236_v22 = vadd.f32 %v3235_v33, %v3124_v23 }
0x102b   : > { %3262 = vst.msk [vmem:[%s5733_s22 + $0x78] sm:$0xff] %vm196_vm0, %v3244_v62 }
0x102c   : > { %3260 = vst.msk [vmem:[%s5733_s22 + $0x68] sm:$0xff] %vm196_vm0, %v3236_v22 }
0x102d PF: > { %s13_s12 = sadd.s32 1, %s4209_s12  }
0x102e   : > { %p10_p4 = scmp.ge.s32.totalorder %s13_s12, 4  }
0x1030   :  { %12 = sbr.rel (!%p10_p4) target bundleno = 1 (0x1), region = 62 }

</bundles_post_ra>
